<compile_context>
chip_gen: v7x
topology: tpu7x:2x2x1
jax: 0.10.0
libtpu: 0.0.40
codegen_flags: <defaults>
</compile_context>

<pallas_src>
import functools

import jax
import jax.numpy as jnp
from jax.experimental import pallas as pl
from jax.experimental.pallas import tpu as pltpu


def _round_up(x, m):
    return ((x + m - 1) // m) * m


# ----------------------------------------------------------------------------
# Fused Pallas kernel: [conv3x3 + BN + ReLU] x 2 over one (batch, row-tile)
# ----------------------------------------------------------------------------
def _double_conv_kernel(x_ref, w1_ref, b1_ref, w2_ref, b2_ref, o_ref,
                        *, H, W, TH, W2p, Wm1, Cin, Cmid):
    """One (batch, row-tile) grid step.

    x_ref : (1, TH+4, Wm1+2, Cin)  bf16  spatially pre-padded input tile
                                         (rows [t*TH-2, t*TH+TH+2), cols [-2, Wm1))
    w1_ref: (9*Cin,  Cmid)         bf16  BN-folded conv1 weights, tap-major
    b1_ref: (1, Cmid)              f32
    w2_ref: (9*Cmid, Cmid)         bf16  BN-folded conv2 weights, tap-major
    b2_ref: (1, Cmid)              f32
    o_ref : (1, TH, W2p, Cmid)     f32
    """
    Hm = TH + 2                     # conv1 extended rows (1-row halo each side)
    t = pl.program_id(1)

    # ---- conv1 + BN + ReLU on the halo-extended (Hm, Wm1) region -----------
    # im2col: 9 shifted views concatenated on the lane axis -> one MXU matmul.
    taps1 = [x_ref[0, dy:dy + Hm, dx:dx + Wm1, :]
             for dy in range(3) for dx in range(3)]
    slab1 = jnp.concatenate(taps1, axis=-1).reshape(Hm * Wm1, 9 * Cin)
    a1 = jnp.dot(slab1, w1_ref[...], preferred_element_type=jnp.float32)
    a1 = jnp.maximum(a1 + b1_ref[...], 0.0).reshape(Hm, Wm1, Cmid)

    # Zero the parts of the intermediate that lie outside the true image so
    # conv2 sees its implicit zero padding at tile borders / image edges.
    row_g = t * TH - 1 + jax.lax.broadcasted_iota(jnp.int32, (Hm, Wm1, Cmid), 0)
    col_l = jax.lax.broadcasted_iota(jnp.int32, (Hm, Wm1, Cmid), 1)
    valid = (row_g >= 0) & (row_g < H) & (col_l >= 1) & (col_l <= W)
    mid = jnp.where(valid, a1, 0.0).astype(jnp.bfloat16)

    # ---- conv2 + BN + ReLU ---------------------------------------------------
    taps2 = [mid[dy:dy + TH, dx:dx + W2p, :]
             for dy in range(3) for dx in range(3)]
    slab2 = jnp.concatenate(taps2, axis=-1).reshape(TH * W2p, 9 * Cmid)
    a2 = jnp.dot(slab2, w2_ref[...], preferred_element_type=jnp.float32)
    a2 = jnp.maximum(a2 + b2_ref[...], 0.0)
    o_ref[...] = a2.reshape(1, TH, W2p, Cmid).astype(o_ref.dtype)


# ----------------------------------------------------------------------------
# BN folding (inference-mode running stats) into lane-padded bf16 weights
# ----------------------------------------------------------------------------
def _fold_bn_pad(w_pt, b, gamma, beta, mean, var, cin_pad, cout_pad, eps=1e-5):
    """w_pt: (Cout, Cin, 3, 3) PyTorch layout -> (9*cin_pad, cout_pad) bf16,
    bias (1, cout_pad) f32.  Row index of the weight matrix = (dy*3+dx)*cin_pad + ci,
    matching the kernel's im2col tap order."""
    # TODO(synk): PyTorch's default (training-mode) BN uses batch statistics;
    # here BN is folded in inference mode with fixed running stats.
    scale = gamma / jnp.sqrt(var + eps)
    w_f = w_pt * scale[:, None, None, None]          # (Cout, Cin, 3, 3)
    b_f = (b - mean) * scale + beta                  # (Cout,)
    cout, cin = w_pt.shape[0], w_pt.shape[1]
    w_t = jnp.transpose(w_f, (2, 3, 1, 0))           # (dy, dx, ci, co)
    w_t = jnp.pad(w_t, ((0, 0), (0, 0), (0, cin_pad - cin), (0, cout_pad - cout)))
    w2d = w_t.reshape(9 * cin_pad, cout_pad).astype(jnp.bfloat16)
    b2d = jnp.pad(b_f, (0, cout_pad - cout)).reshape(1, cout_pad).astype(jnp.float32)
    return w2d, b2d


# ----------------------------------------------------------------------------
# Double_conv driver: pad/tile the NHWC input and launch the fused kernel
# ----------------------------------------------------------------------------
def double_conv_pallas(x_nhwc, params, row_tile=None):
    """x_nhwc: (N, H, W, C) f32 -> (N, H, W, out_ch) f32."""
    N, H, W, C = x_nhwc.shape
    out_ch = params["w1"].shape[0]

    Cin_pad = _round_up(C, 128)          # lane-dense input channels
    Cmid = _round_up(out_ch, 128)        # lane-dense output/intermediate channels

    TH = row_tile if row_tile is not None else min(32, H)
    TH = max(1, min(TH, H))
    T = -(-H // TH)                      # number of row tiles
    Hp = T * TH                          # H padded up to a multiple of TH

    W2p = _round_up(W, 8)                # conv2 / output tile width (sublane-aligned)
    Wm1 = _round_up(W2p + 2, 8)          # conv1 intermediate width
    Win = Wm1 + 2                        # input tile width (2-col halo each side)
    Hin = TH + 4                         # input tile rows (2-row halo each side)

    w1, b1 = _fold_bn_pad(params["w1"], params["b1"], params["g1"],
                          params["be1"], params["m1"], params["v1"],
                          Cin_pad, Cmid)
    w2, b2 = _fold_bn_pad(params["w2"], params["b2"], params["g2"],
                          params["be2"], params["m2"], params["v2"],
                          Cmid, Cmid)

    # Spatial + channel zero-pad, bf16 cast, and halo-duplicated row tiling.
    # All of this fuses into a single XLA producer (one HBM write) feeding the
    # kernel's auto-pipelined BlockSpec DMAs.
    xp = jnp.pad(x_nhwc, ((0, 0), (2, Hp - H + 2), (2, Wm1 - W), (0, Cin_pad - C)))
    xp = xp.astype(jnp.bfloat16)                                  # (N, Hp+4, Win, Cin_pad)
    xt = jnp.stack([xp[:, t * TH: t * TH + Hin] for t in range(T)], axis=1)
    xt = xt.reshape(N * T, Hin, Win, Cin_pad)                     # halo-duplicated tiles

    flops = 2 * N * T * (TH + 2) * Wm1 * 9 * Cin_pad * Cmid \
        + 2 * N * T * TH * W2p * 9 * Cmid * Cmid
    bytes_accessed = (xt.size * 2 + w1.size * 2 + w2.size * 2
                      + b1.size * 4 + b2.size * 4
                      + N * Hp * W2p * Cmid * 4)

    kernel = functools.partial(_double_conv_kernel, H=H, W=W, TH=TH,
                               W2p=W2p, Wm1=Wm1, Cin=Cin_pad, Cmid=Cmid)

    y = pl.pallas_call(
        kernel,
        out_shape=jax.ShapeDtypeStruct((N, Hp, W2p, Cmid), jnp.float32),
        grid_spec=pltpu.PrefetchScalarGridSpec(
            num_scalar_prefetch=0,
            grid=(N, T),
            in_specs=[
                pl.BlockSpec((1, Hin, Win, Cin_pad),
                             lambda n, t: (n * T + t, 0, 0, 0)),
                pl.BlockSpec((9 * Cin_pad, Cmid), lambda n, t: (0, 0)),
                pl.BlockSpec((1, Cmid), lambda n, t: (0, 0)),
                pl.BlockSpec((9 * Cmid, Cmid), lambda n, t: (0, 0)),
                pl.BlockSpec((1, Cmid), lambda n, t: (0, 0)),
            ],
            out_specs=pl.BlockSpec((1, TH, W2p, Cmid),
                                   lambda n, t: (n, t, 0, 0)),
        ),
        compiler_params=pltpu.CompilerParams(
            dimension_semantics=("parallel", "parallel"),
            vmem_limit_bytes=64 * 1024 * 1024),
        cost_estimate=pl.CostEstimate(flops=flops, transcendentals=0,
                                      bytes_accessed=bytes_accessed),
    )(xt, w1, b1, w2, b2)

    return y[:, :H, :W, :out_ch]


# ----------------------------------------------------------------------------
# Glue: bilinear upsample (align_corners=True), pad, concat
# ----------------------------------------------------------------------------
def _upsample_bilinear_x2_align_corners(x):
    """x: (N, H, W, C) -> (N, 2H, 2W, C); matches F.interpolate(scale_factor=2,
    mode='bilinear', align_corners=True)."""
    N, H, W, C = x.shape
    Ho, Wo = 2 * H, 2 * W
    ys = jnp.arange(Ho, dtype=jnp.float32) * ((H - 1) / (Ho - 1))
    xs = jnp.arange(Wo, dtype=jnp.float32) * ((W - 1) / (Wo - 1))
    y0 = jnp.floor(ys).astype(jnp.int32)
    y1 = jnp.minimum(y0 + 1, H - 1)
    x0 = jnp.floor(xs).astype(jnp.int32)
    x1 = jnp.minimum(x0 + 1, W - 1)
    wy = (ys - y0.astype(jnp.float32))[None, :, None, None]
    wx = (xs - x0.astype(jnp.float32))[None, None, :, None]

    def g(yi, xi):
        return x[:, yi][:, :, xi]

    top = g(y0, x0) * (1.0 - wx) + g(y0, x1) * wx
    bot = g(y1, x0) * (1.0 - wx) + g(y1, x1) * wx
    return top * (1.0 - wy) + bot * wy


def _prepare_input(x1_nchw, x2_nchw):
    """Upsample x1, pad x2 (preserving the original diffX/diffY quirk), concat
    channels. Returns NHWC tensor."""
    x1 = jnp.transpose(x1_nchw, (0, 2, 3, 1))
    x2 = jnp.transpose(x2_nchw, (0, 2, 3, 1))
    x1 = _upsample_bilinear_x2_align_corners(x1)
    diffX = x1.shape[1] - x2.shape[1]   # PyTorch size()[2] (H) difference
    diffY = x1.shape[2] - x2.shape[2]   # PyTorch size()[3] (W) difference
    # F.pad(x2, (diffX//2, int(diffX/2), diffY//2, int(diffY/2))):
    # the last (W) dim gets the diffX pair, H gets the diffY pair — quirk kept.
    pad_w = (diffX // 2, int(diffX / 2))
    pad_h = (diffY // 2, int(diffY / 2))
    # lax.pad handles negative values by cropping, matching F.pad semantics.
    x2 = jax.lax.pad(x2, jnp.array(0.0, x2.dtype),
                     [(0, 0, 0), (pad_h[0], pad_h[1], 0),
                      (pad_w[0], pad_w[1], 0), (0, 0, 0)])
    return jnp.concatenate([x2, x1], axis=-1)


def up_forward(x1_nchw, x2_nchw, params, row_tile=None):
    """Forward pass of `Up`. Inputs/outputs are NCHW (PyTorch convention)."""
    x = _prepare_input(x1_nchw, x2_nchw)
    y = double_conv_pallas(x, params, row_tile=row_tile)
    return jnp.transpose(y, (0, 3, 1, 2))


# ----------------------------------------------------------------------------
# Pure-JAX reference (for a correctness sanity check)
# ----------------------------------------------------------------------------
def _ref_conv_bn_relu(x_nhwc, w_pt, b, g, be, m, v, eps=1e-5):
    scale = g / jnp.sqrt(v + eps)
    w_f = w_pt * scale[:, None, None, None]
    b_f = (b - m) * scale + be
    w_hwio = jnp.transpose(w_f, (2, 3, 1, 0))
    y = jax.lax.conv_general_dilated(
        x_nhwc, w_hwio, (1, 1), "SAME",
        dimension_numbers=("NHWC", "HWIO", "NHWC"),
        precision=jax.lax.Precision.HIGHEST)
    return jnp.maximum(y + b_f, 0.0)


def up_forward_ref(x1_nchw, x2_nchw, p):
    x = _prepare_input(x1_nchw, x2_nchw)
    y = _ref_conv_bn_relu(x, p["w1"], p["b1"], p["g1"], p["be1"], p["m1"], p["v1"])
    y = _ref_conv_bn_relu(y, p["w2"], p["b2"], p["g2"], p["be2"], p["m2"], p["v2"])
    return jnp.transpose(y, (0, 3, 1, 2))


# ----------------------------------------------------------------------------
if __name__ == "__main__":
    key = jax.random.PRNGKey(0)
    ks = jax.random.split(key, 16)

    N = 2
    c1, c2 = 4, 4          # channels of x1 (coarse) and x2 (skip)
    in_ch = c1 + c2        # Double_conv input channels = 8
    out_ch = 4
    H1 = W1 = 8            # x1 spatial -> upsampled to 16x16
    H2 = W2 = 16           # x2 spatial

    x1 = jax.random.normal(ks[0], (N, c1, H1, W1), jnp.float32)
    x2 = jax.random.normal(ks[1], (N, c2, H2, W2), jnp.float32)

    params = dict(
        w1=0.1 * jax.random.normal(ks[2], (out_ch, in_ch, 3, 3), jnp.float32),
        b1=0.05 * jax.random.normal(ks[3], (out_ch,), jnp.float32),
        g1=1.0 + 0.1 * jax.random.normal(ks[4], (out_ch,), jnp.float32),
        be1=0.05 * jax.random.normal(ks[5], (out_ch,), jnp.float32),
        m1=0.05 * jax.random.normal(ks[6], (out_ch,), jnp.float32),
        v1=1.0 + 0.1 * jax.random.uniform(ks[7], (out_ch,), jnp.float32),
        w2=0.1 * jax.random.normal(ks[8], (out_ch, out_ch, 3, 3), jnp.float32),
        b2=0.05 * jax.random.normal(ks[9], (out_ch,), jnp.float32),
        g2=1.0 + 0.1 * jax.random.normal(ks[10], (out_ch,), jnp.float32),
        be2=0.05 * jax.random.normal(ks[11], (out_ch,), jnp.float32),
        m2=0.05 * jax.random.normal(ks[12], (out_ch,), jnp.float32),
        v2=1.0 + 0.1 * jax.random.uniform(ks[13], (out_ch,), jnp.float32),
    )

    fwd = jax.jit(functools.partial(up_forward, row_tile=8))   # 2 row tiles of 8
    y = jax.block_until_ready(fwd(x1, x2, params))
    assert y.shape == (N, out_ch, H2, W2), y.shape

    y_ref = jax.block_until_ready(jax.jit(up_forward_ref)(x1, x2, params))
    # bf16 matmul inputs with fp32 accumulation -> slightly looser tolerance.
    assert jnp.allclose(y, y_ref, atol=3e-2, rtol=3e-2), \
        f"max abs diff {jnp.max(jnp.abs(y - y_ref))}"

    print("KERNEL_OK")
</pallas_src>

<mosaic_0001>
module attributes {stable_mosaic.version = 11 : i64} {
  func.func @_double_conv_kernel(%arg0: i32, %arg1: i32, %arg2: memref<1x12x26x128xbf16, #tpu.memory_space<vmem>>, %arg3: memref<1152x128xbf16, #tpu.memory_space<vmem>>, %arg4: memref<1x128xf32, #tpu.memory_space<vmem>>, %arg5: memref<1152x128xbf16, #tpu.memory_space<vmem>>, %arg6: memref<1x128xf32, #tpu.memory_space<vmem>>, %arg7: memref<1x8x16x128xf32, #tpu.memory_space<vmem>>) attributes {dimension_semantics = [#tpu.dimension_semantics<parallel>, #tpu.dimension_semantics<parallel>], iteration_bounds = array<i64: 2, 2>, scalar_prefetch = 0 : i64, scratch_operands = 0 : i64, tpu.core_type = #tpu.core_type<tc>, window_params = [{transform_indices = @transform_0, window_bounds = array<i64: 1, 12, 26, 128>}, {pipeline_mode = #tpu.pipeline_mode<synchronous>, transform_indices = @transform_1, window_bounds = array<i64: 1152, 128>}, {pipeline_mode = #tpu.pipeline_mode<synchronous>, transform_indices = @transform_2, window_bounds = array<i64: 1, 128>}, {pipeline_mode = #tpu.pipeline_mode<synchronous>, transform_indices = @transform_3, window_bounds = array<i64: 1152, 128>}, {pipeline_mode = #tpu.pipeline_mode<synchronous>, transform_indices = @transform_4, window_bounds = array<i64: 1, 128>}, {transform_indices = @transform_5, window_bounds = array<i64: 1, 8, 16, 128>}]} {
    %c0 = arith.constant 0 : index
    %c0_0 = arith.constant 0 : index
    %c0_1 = arith.constant 0 : index
    %c0_2 = arith.constant 0 : index
    %0 = vector.load %arg2[%c0, %c0_0, %c0_1, %c0_2] : memref<1x12x26x128xbf16, #tpu.memory_space<vmem>>, vector<1x10x24x128xbf16>
    %1 = vector.shape_cast %0 : vector<1x10x24x128xbf16> to vector<10x24x128xbf16>
    %c0_3 = arith.constant 0 : index
    %c0_4 = arith.constant 0 : index
    %c1 = arith.constant 1 : index
    %c0_5 = arith.constant 0 : index
    %2 = vector.load %arg2[%c0_3, %c0_4, %c1, %c0_5] : memref<1x12x26x128xbf16, #tpu.memory_space<vmem>>, vector<1x10x24x128xbf16>
    %3 = vector.shape_cast %2 : vector<1x10x24x128xbf16> to vector<10x24x128xbf16>
    %c0_6 = arith.constant 0 : index
    %c0_7 = arith.constant 0 : index
    %c2 = arith.constant 2 : index
    %c0_8 = arith.constant 0 : index
    %4 = vector.load %arg2[%c0_6, %c0_7, %c2, %c0_8] : memref<1x12x26x128xbf16, #tpu.memory_space<vmem>>, vector<1x10x24x128xbf16>
    %5 = vector.shape_cast %4 : vector<1x10x24x128xbf16> to vector<10x24x128xbf16>
    %c0_9 = arith.constant 0 : index
    %c1_10 = arith.constant 1 : index
    %c0_11 = arith.constant 0 : index
    %c0_12 = arith.constant 0 : index
    %6 = vector.load %arg2[%c0_9, %c1_10, %c0_11, %c0_12] : memref<1x12x26x128xbf16, #tpu.memory_space<vmem>>, vector<1x10x24x128xbf16>
    %7 = vector.shape_cast %6 : vector<1x10x24x128xbf16> to vector<10x24x128xbf16>
    %c0_13 = arith.constant 0 : index
    %c1_14 = arith.constant 1 : index
    %c1_15 = arith.constant 1 : index
    %c0_16 = arith.constant 0 : index
    %8 = vector.load %arg2[%c0_13, %c1_14, %c1_15, %c0_16] : memref<1x12x26x128xbf16, #tpu.memory_space<vmem>>, vector<1x10x24x128xbf16>
    %9 = vector.shape_cast %8 : vector<1x10x24x128xbf16> to vector<10x24x128xbf16>
    %c0_17 = arith.constant 0 : index
    %c1_18 = arith.constant 1 : index
    %c2_19 = arith.constant 2 : index
    %c0_20 = arith.constant 0 : index
    %10 = vector.load %arg2[%c0_17, %c1_18, %c2_19, %c0_20] : memref<1x12x26x128xbf16, #tpu.memory_space<vmem>>, vector<1x10x24x128xbf16>
    %11 = vector.shape_cast %10 : vector<1x10x24x128xbf16> to vector<10x24x128xbf16>
    %c0_21 = arith.constant 0 : index
    %c2_22 = arith.constant 2 : index
    %c0_23 = arith.constant 0 : index
    %c0_24 = arith.constant 0 : index
    %12 = vector.load %arg2[%c0_21, %c2_22, %c0_23, %c0_24] : memref<1x12x26x128xbf16, #tpu.memory_space<vmem>>, vector<1x10x24x128xbf16>
    %13 = vector.shape_cast %12 : vector<1x10x24x128xbf16> to vector<10x24x128xbf16>
    %c0_25 = arith.constant 0 : index
    %c2_26 = arith.constant 2 : index
    %c1_27 = arith.constant 1 : index
    %c0_28 = arith.constant 0 : index
    %14 = vector.load %arg2[%c0_25, %c2_26, %c1_27, %c0_28] : memref<1x12x26x128xbf16, #tpu.memory_space<vmem>>, vector<1x10x24x128xbf16>
    %15 = vector.shape_cast %14 : vector<1x10x24x128xbf16> to vector<10x24x128xbf16>
    %c0_29 = arith.constant 0 : index
    %c2_30 = arith.constant 2 : index
    %c2_31 = arith.constant 2 : index
    %c0_32 = arith.constant 0 : index
    %16 = vector.load %arg2[%c0_29, %c2_30, %c2_31, %c0_32] : memref<1x12x26x128xbf16, #tpu.memory_space<vmem>>, vector<1x10x24x128xbf16>
    %17 = vector.shape_cast %16 : vector<1x10x24x128xbf16> to vector<10x24x128xbf16>
    %18 = tpu.concatenate %1, %3, %5, %7, %9, %11, %13, %15, %17 in 2 : vector<10x24x128xbf16>, vector<10x24x128xbf16>, vector<10x24x128xbf16>, vector<10x24x128xbf16>, vector<10x24x128xbf16>, vector<10x24x128xbf16>, vector<10x24x128xbf16>, vector<10x24x128xbf16>, vector<10x24x128xbf16> -> vector<10x24x1152xbf16>
    %19 = vector.shape_cast %18 : vector<10x24x1152xbf16> to vector<240x1152xbf16>
    %c0_33 = arith.constant 0 : index
    %c0_34 = arith.constant 0 : index
    %20 = vector.load %arg3[%c0_33, %c0_34] : memref<1152x128xbf16, #tpu.memory_space<vmem>>, vector<1152x128xbf16>
    %cst = arith.constant dense<0.000000e+00> : vector<240x128xf32>
    %21 = tpu.matmul %19, %20, %cst {dimension_numbers = #tpu.dot_dimension_numbers<[1], [0], [0], [1], [0, 0, 1, 1], [], []>} : vector<240x1152xbf16>, vector<1152x128xbf16>, vector<240x128xf32> -> vector<240x128xf32>
    %c0_35 = arith.constant 0 : index
    %c0_36 = arith.constant 0 : index
    %22 = vector.load %arg4[%c0_35, %c0_36] : memref<1x128xf32, #tpu.memory_space<vmem>>, vector<1x128xf32>
    %23 = vector.broadcast %22 : vector<1x128xf32> to vector<240x128xf32>
    %24 = arith.addf %21, %23 : vector<240x128xf32>
    %cst_37 = arith.constant 0.000000e+00 : f32
    %25 = vector.broadcast %cst_37 : f32 to vector<240x128xf32>
    %26 = arith.maximumf %24, %25 : vector<240x128xf32>
    %27 = vector.shape_cast %26 : vector<240x128xf32> to vector<10x24x128xf32>
    %c8_i32 = arith.constant 8 : i32
    %28 = arith.muli %arg1, %c8_i32 : i32
    %c1_i32 = arith.constant 1 : i32
    %29 = arith.subi %28, %c1_i32 : i32
    %30 = tpu.iota {dimensions = array<i32: 0>} : vector<10x24x128xi32>
    %31 = vector.broadcast %29 : i32 to vector<10x24x128xi32>
    %32 = arith.addi %31, %30 : vector<10x24x128xi32>
    %33 = tpu.iota {dimensions = array<i32: 1>} : vector<10x24x128xi32>
    %c0_i32 = arith.constant 0 : i32
    %34 = vector.broadcast %c0_i32 : i32 to vector<10x24x128xi32>
    %35 = arith.cmpi sge, %32, %34 : vector<10x24x128xi32>
    %c16_i32 = arith.constant 16 : i32
    %36 = vector.broadcast %c16_i32 : i32 to vector<10x24x128xi32>
    %37 = arith.cmpi slt, %32, %36 : vector<10x24x128xi32>
    %38 = arith.andi %35, %37 : vector<10x24x128xi1>
    %c1_i32_38 = arith.constant 1 : i32
    %39 = vector.broadcast %c1_i32_38 : i32 to vector<10x24x128xi32>
    %40 = arith.cmpi sge, %33, %39 : vector<10x24x128xi32>
    %41 = arith.andi %38, %40 : vector<10x24x128xi1>
    %c16_i32_39 = arith.constant 16 : i32
    %42 = vector.broadcast %c16_i32_39 : i32 to vector<10x24x128xi32>
    %43 = arith.cmpi sle, %33, %42 : vector<10x24x128xi32>
    %44 = arith.andi %41, %43 : vector<10x24x128xi1>
    %cst_40 = arith.constant 0.000000e+00 : f32
    %45 = vector.broadcast %cst_40 : f32 to vector<10x24x128xf32>
    %46 = arith.select %44, %27, %45 : vector<10x24x128xi1>, vector<10x24x128xf32>
    %47 = arith.truncf %46 : vector<10x24x128xf32> to vector<10x24x128xbf16>
    %48 = vector.extract_strided_slice %47 {offsets = [0, 0, 0], sizes = [8, 16, 128], strides = [1, 1, 1]} : vector<10x24x128xbf16> to vector<8x16x128xbf16>
    %49 = vector.extract_strided_slice %47 {offsets = [0, 1, 0], sizes = [8, 16, 128], strides = [1, 1, 1]} : vector<10x24x128xbf16> to vector<8x16x128xbf16>
    %50 = vector.extract_strided_slice %47 {offsets = [0, 2, 0], sizes = [8, 16, 128], strides = [1, 1, 1]} : vector<10x24x128xbf16> to vector<8x16x128xbf16>
    %51 = vector.extract_strided_slice %47 {offsets = [1, 0, 0], sizes = [8, 16, 128], strides = [1, 1, 1]} : vector<10x24x128xbf16> to vector<8x16x128xbf16>
    %52 = vector.extract_strided_slice %47 {offsets = [1, 1, 0], sizes = [8, 16, 128], strides = [1, 1, 1]} : vector<10x24x128xbf16> to vector<8x16x128xbf16>
    %53 = vector.extract_strided_slice %47 {offsets = [1, 2, 0], sizes = [8, 16, 128], strides = [1, 1, 1]} : vector<10x24x128xbf16> to vector<8x16x128xbf16>
    %54 = vector.extract_strided_slice %47 {offsets = [2, 0, 0], sizes = [8, 16, 128], strides = [1, 1, 1]} : vector<10x24x128xbf16> to vector<8x16x128xbf16>
    %55 = vector.extract_strided_slice %47 {offsets = [2, 1, 0], sizes = [8, 16, 128], strides = [1, 1, 1]} : vector<10x24x128xbf16> to vector<8x16x128xbf16>
    %56 = vector.extract_strided_slice %47 {offsets = [2, 2, 0], sizes = [8, 16, 128], strides = [1, 1, 1]} : vector<10x24x128xbf16> to vector<8x16x128xbf16>
    %57 = tpu.concatenate %48, %49, %50, %51, %52, %53, %54, %55, %56 in 2 : vector<8x16x128xbf16>, vector<8x16x128xbf16>, vector<8x16x128xbf16>, vector<8x16x128xbf16>, vector<8x16x128xbf16>, vector<8x16x128xbf16>, vector<8x16x128xbf16>, vector<8x16x128xbf16>, vector<8x16x128xbf16> -> vector<8x16x1152xbf16>
    %58 = vector.shape_cast %57 : vector<8x16x1152xbf16> to vector<128x1152xbf16>
    %c0_41 = arith.constant 0 : index
    %c0_42 = arith.constant 0 : index
    %59 = vector.load %arg5[%c0_41, %c0_42] : memref<1152x128xbf16, #tpu.memory_space<vmem>>, vector<1152x128xbf16>
    %cst_43 = arith.constant dense<0.000000e+00> : vector<128x128xf32>
    %60 = tpu.matmul %58, %59, %cst_43 {dimension_numbers = #tpu.dot_dimension_numbers<[1], [0], [0], [1], [0, 0, 1, 1], [], []>} : vector<128x1152xbf16>, vector<1152x128xbf16>, vector<128x128xf32> -> vector<128x128xf32>
    %c0_44 = arith.constant 0 : index
    %c0_45 = arith.constant 0 : index
    %61 = vector.load %arg6[%c0_44, %c0_45] : memref<1x128xf32, #tpu.memory_space<vmem>>, vector<1x128xf32>
    %62 = vector.broadcast %61 : vector<1x128xf32> to vector<128x128xf32>
    %63 = arith.addf %60, %62 : vector<128x128xf32>
    %cst_46 = arith.constant 0.000000e+00 : f32
    %64 = vector.broadcast %cst_46 : f32 to vector<128x128xf32>
    %65 = arith.maximumf %63, %64 : vector<128x128xf32>
    %66 = vector.shape_cast %65 : vector<128x128xf32> to vector<1x8x16x128xf32>
    %c0_47 = arith.constant 0 : index
    %c0_48 = arith.constant 0 : index
    %c0_49 = arith.constant 0 : index
    %c0_50 = arith.constant 0 : index
    %67 = vector.load %arg7[%c0_47, %c0_48, %c0_49, %c0_50] : memref<1x8x16x128xf32, #tpu.memory_space<vmem>>, vector<1x8x16x128xf32>
    tpu.vector_store %arg7[%c0_47, %c0_48, %c0_49, %c0_50], %66 {strides = array<i32>} : memref<1x8x16x128xf32, #tpu.memory_space<vmem>>, vector<1x8x16x128xf32>,
    return
  }
  func.func @transform_0(%arg0: i32, %arg1: i32) -> (i32, i32, i32, i32) {
    %c2_i32 = arith.constant 2 : i32
    %0 = arith.muli %arg0, %c2_i32 : i32
    %1 = arith.addi %0, %arg1 : i32
    %c0_i32 = arith.constant 0 : i32
    %c0_i32_0 = arith.constant 0 : i32
    %c0_i32_1 = arith.constant 0 : i32
    %c0_i32_2 = arith.constant 0 : i32
    return %1, %c0_i32, %c0_i32_0, %c0_i32_1 : i32, i32, i32, i32
  }
  func.func @transform_1(%arg0: i32, %arg1: i32) -> (i32, i32) {
    %c0_i32 = arith.constant 0 : i32
    %c0_i32_0 = arith.constant 0 : i32
    %c0_i32_1 = arith.constant 0 : i32
    return %c0_i32, %c0_i32_0 : i32, i32
  }
  func.func @transform_2(%arg0: i32, %arg1: i32) -> (i32, i32) {
    %c0_i32 = arith.constant 0 : i32
    %c0_i32_0 = arith.constant 0 : i32
    %c0_i32_1 = arith.constant 0 : i32
    return %c0_i32, %c0_i32_0 : i32, i32
  }
  func.func @transform_3(%arg0: i32, %arg1: i32) -> (i32, i32) {
    %c0_i32 = arith.constant 0 : i32
    %c0_i32_0 = arith.constant 0 : i32
    %c0_i32_1 = arith.constant 0 : i32
    return %c0_i32, %c0_i32_0 : i32, i32
  }
  func.func @transform_4(%arg0: i32, %arg1: i32) -> (i32, i32) {
    %c0_i32 = arith.constant 0 : i32
    %c0_i32_0 = arith.constant 0 : i32
    %c0_i32_1 = arith.constant 0 : i32
    return %c0_i32, %c0_i32_0 : i32, i32
  }
  func.func @transform_5(%arg0: i32, %arg1: i32) -> (i32, i32, i32, i32) {
    %c0_i32 = arith.constant 0 : i32
    %c0_i32_0 = arith.constant 0 : i32
    %c0_i32_1 = arith.constant 0 : i32
    return %arg0, %arg1, %c0_i32, %c0_i32_0 : i32, i32, i32, i32
  }
}

</mosaic_0001>

<bundles_post_ra>
// kernel: up_forward.1
= control target key start
LH: loop header
LB: loop body
LE: loop exit
PB: predicated region body
PF: predicated region fallthrough
CT: control target
= control target key end

     0   :  { %s9299_s0 = inlined_call_operand.hbm [shape: bf16[4,12,26,128], index: 0, kind: input, shape index: {}]   ;;  %s9300_s1 = inlined_call_operand.hbm [shape: bf16[1152,128], index: 1, kind: input, shape index: {}]   ;;  %s9301_s2 = inlined_call_operand.hbm [shape: f32[1,128], index: 2, kind: input, shape index: {}]   ;;  %s9302_s3 = inlined_call_operand.hbm [shape: bf16[1152,128], index: 3, kind: input, shape index: {}]   ;;  %s9303_s4 = inlined_call_operand.hbm [shape: f32[1,128], index: 4, kind: input, shape index: {}]   ;;  %s9304_s5 = inlined_call_operand.hbm [shape: f32[2,16,16,128], index: 5, kind: output, shape index: {}]  }
   0x1   :  { %9345 = sst [smem:[#allocation42_spill]] %s9300_s1 }
   0x2   :  { %9346 = sst [smem:[#allocation43_spill]] %s9301_s2 }
   0x3   :  { %9347 = sst [smem:[#allocation44_spill]] %s9302_s3 }
   0x4   :  { %9348 = sst [smem:[#allocation45_spill]] %s9303_s4 }
   0x5   :  { %9349 = sst [smem:[#allocation46_spill]] %s9304_s5 }
   0x6   :  { %10 = vsyncpa [#allocation3], 0 }
   0x7   :  { %12 = vsyncpa [#allocation3 + $0x1], 0 }
   0x8   :  { %13 = vsyncpa [#allocation6], 0 }
   0x9   :  { %14 = vsyncpa [#allocation9], 0 }
   0xa   :  { %15 = vsyncpa [#allocation4], 0 }
   0xb   :  { %17 = vsyncpa [#allocation4 + $0x1], 0  ;;  %s6887_s18 = smov 0   ;;  %s6889_s19 = smov 0  }
   0xc   :  { %s6891_s20 = smov 0   ;;  %s6893_s21 = smov 0  }
   0xd   :  { %s6895_s22 = smov 0   ;;  %s6897_s23 = smov 0  }
   0xe   :  { %s6899_s24 = smov 0   ;;  %s6901_s25 = smov 0  }
   0xf   :  { %s6903_s26 = smov 0   ;;  %s6905_s27 = smov 0  }
  0x10   :  { %s6907_s28 = smov 0  }
  0x11 LB: > { %9350 = sst [smem:[#allocation16_spill]] %s6803_s18  ;;  %s4814_s29 = sadd.s32 4294967295, %s6843_s28   ;;  %s6843_s28 = sphi %s6907_s28, %s23_s28   ;;  %s6839_s27 = sphi %s6905_s27, %s9524_s27   ;;  %s6835_s26 = sphi %s6903_s26, %s9523_s26   ;;  %s6831_s25 = sphi %s6901_s25, %s9522_s25   ;;  %s6827_s24 = sphi %s6899_s24, %s9521_s24   ;;  %s6823_s23 = sphi %s6897_s23, %s9520_s23   ;;  %s6819_s22 = sphi %s6895_s22, %s9519_s22   ;;  %s6815_s21 = sphi %s6893_s21, %s9518_s21   ;;  %s6811_s20 = sphi %s6891_s20, %s9517_s20   ;;  %s6807_s19 = sphi %s6889_s19, %s9516_s19   ;;  %s6803_s18 = sphi %s6887_s18, %s9515_s18  }
  0x12   : > { %9351 = sst [smem:[#allocation17_spill]] %s6807_s19  ;;  %s4815_s30 = sadd.s32 4294967294, %s6843_s28  }
  0x13   : > { %9352 = sst [smem:[#allocation18_spill]] %s6831_s25  ;;  %p59_p0 = scmp.ne.s32.totalorder %s6819_s22, %s6815_s21 }
  0x14   : > { %p6943_p1 = scmp.eq.s32.totalorder %s4814_s29, 0  ;;  %p168_p2 = scmp.ne.s32.totalorder %s6811_s20, %s6807_s19 }
  0x15   : > { %p169_p3 = scmp.eq.s32.totalorder %s4814_s29, 3  ;;  %p174_p5 = scmp.ne.s32.totalorder %s6807_s19, %s6803_s18 }
  0x16   : > { %s9353_s6 = scalar_select %p6943_p1, 1, 0 }
  0x17   : > { %p6951_p4 = por %p6943_p1, %p59_p0  ;;  %p6957_p6 = por %p169_p3, %p168_p2 }
  0x18   : > { %p175_p7 = scmp.eq.s32.totalorder %s4815_s30, 3  ;;  %p4818_p8 = scmp.ge.s32.totalorder %s6843_s28, 1 }
  0x19   : > { %s9354_s7 = scalar_select %p6951_p4, 1, 0 }
  0x1a   : > { %s9355_s8 = scalar_select %p6957_p6, 1, 0 }
  0x1b   : > { %p182_p9 = scmp.lt.s32.totalorder %s6843_s28, 5  ;;  %p6963_p10 = por %p175_p7, %p174_p5 }
  0x1c   : > { %9356 = sst [smem:[#allocation19_spill]] %s9355_s8  ;;  %s6845_s11 = smov [#allocation5]  }
  0x1d   : > { %s9357_s9 = scalar_select %p6963_p10, 1, 0 }
  0x1e   : > { %p6967_p11 = pnand %p4818_p8, %p182_p9  ;;  %s194_s12 = sshll.u32 %s6845_s11, 4  ;;  %s195_s12 = int_to_ptr.vmem [resolvable:$true] %s194_s12 }
  0x1f   : > { %9358 = sst [smem:[#allocation20_spill]] %s9357_s9  ;;  %s6846_s14 = smov [#allocation8]  }
  0x20   : > { %s9359_s10 = scalar_select %p6967_p11, 1, 0 }
  0x21   : > { %p6176_p12 = pneg %p6967_p11  ;;  %s218_s15 = sshll.u32 %s6846_s14, 4  ;;  %s6979_s15 = int_to_ptr.vmem [resolvable:$true] %s218_s15 }
  0x22   : > { %s9361_s1 = sld [smem:[#allocation42_spill]] }
  0x23   : > { %p6975_p13 = pnand %p6176_p12, %p6943_p1 }
  0x25   : > { %p6989_p2 = pneg %p6975_p13 }
  0x28   : > { %s6571_s21 = scalar_lea.hbm %s9361_s1, 9216 }
  0x29   : > { %p6572_p0 = scmp.ne.s32.totalorder %s9361_s1, %s6571_s21  ;;  %p6578_p7 = scmp.lt.u32.totalorder %s6571_s21, %s9361_s1 }
  0x2b   : > { %p6574_p3 = pnand %p6989_p2, %p6572_p0 }
  0x2d   : > { %p6575_p5 = pneg %p6574_p3 }
  0x2f   : > { %p6580_p8 = pnand %p6578_p7, %p6575_p5 }
  0x31   : > { %6583 = shalt.err (!%p6580_p8)
}
  0x32   : > { %s6584_s16 = scalar_lea.vmem %s195_s12, 9216  ;;  %p6592_p6 = scmp.lt.s32.totalorder %s195_s12, %s195_s12 }
  0x33   : > { %p6585_p9 = scmp.ne.s32.totalorder %s195_s12, %s6584_s16  ;;  %p6593_p1 = scmp.lt.s32.totalorder %s6584_s16, %s6584_s16 }
  0x35   : > { %p6587_p12 = pnand %p6585_p9, %p6989_p2  ;;  %p6594_p4 = por %p6593_p1, %p6592_p6 }
  0x37   : > { %p6588_p10 = pneg %p6587_p12 }
  0x39   : > { %p6595_p11 = pnand %p6594_p4, %p6588_p10 }
  0x3b   : > { %6598 = shalt.err (!%p6595_p11)
}
  0x3c   : > { %s9317_s17 = smov 64   ;;  %s9318_s29 = smov 4  }
  0x3d   : > { %6179 = dma.hbm_to_vmem [thread:$0]  (!%p6975_p13), %s9361_s1, 9216, %s195_s12, [#allocation6], %s9317_s17, %s9317_s17, %s9318_s29  }
  0x3e   : > { %s9363_s3 = sld [smem:[#allocation44_spill]] }
  0x44   : > { %s6599_s18 = scalar_lea.hbm %s9363_s3, 9216 }
  0x45   : > { %p6600_p1 = scmp.ne.s32.totalorder %s9363_s3, %s6599_s18  ;;  %p6606_p10 = scmp.lt.u32.totalorder %s6599_s18, %s9363_s3 }
  0x47   : > { %p6602_p4 = pnand %p6600_p1, %p6989_p2 }
  0x49   : > { %p6603_p6 = pneg %p6602_p4 }
  0x4b   : > { %p6608_p11 = pnand %p6606_p10, %p6603_p6 }
  0x4d   : > { %6611 = shalt.err (!%p6608_p11)
}
  0x4e   : > { %s6612_s12 = scalar_lea.vmem %s6979_s15, 9216  ;;  %p6620_p7 = scmp.lt.s32.totalorder %s6979_s15, %s6979_s15 }
  0x4f   : > { %p6613_p0 = scmp.ne.s32.totalorder %s6979_s15, %s6612_s12  ;;  %p6621_p8 = scmp.lt.s32.totalorder %s6612_s12, %s6612_s12 }
  0x51   : > { %p6615_p3 = pnand %p6613_p0, %p6989_p2  ;;  %p6622_p9 = por %p6621_p8, %p6620_p7 }
  0x53   : > { %p6616_p5 = pneg %p6615_p3 }
  0x55   : > { %p6623_p12 = pnand %p6622_p9, %p6616_p5 }
  0x57   : > { %6626 = shalt.err (!%p6623_p12)
}
  0x58   : > { %6185 = dma.hbm_to_vmem [thread:$0]  (!%p6975_p13), %s9363_s3, 9216, %s6979_s15, [#allocation9], %s9317_s17, %s9317_s17, %s9318_s29  }
  0x59   : > { %s6849_s25 = smov [#allocation7]   ;;  %s6850_s9 = smov [#allocation10]  }
  0x5a   : > { %s208_s8 = sshll.u32 %s6849_s25, 4  ;;  %s232_s21 = sshll.u32 %s6850_s9, 4  ;;  %s209_s8 = int_to_ptr.vmem [resolvable:$true] %s208_s8  ;;  %s233_s21 = int_to_ptr.vmem [resolvable:$true] %s232_s21 }
  0x5b   : > { %s9364_s2 = sld [smem:[#allocation43_spill]] }
  0x61   : > { %s6627_s16 = scalar_lea.hbm %s9364_s2, 16 }
  0x62   : > { %p6628_p1 = scmp.ne.s32.totalorder %s9364_s2, %s6627_s16  ;;  %p6634_p10 = scmp.lt.u32.totalorder %s6627_s16, %s9364_s2 }
  0x64   : > { %p6630_p4 = pnand %p6628_p1, %p6989_p2 }
  0x66   : > { %p6631_p6 = pneg %p6630_p4 }
  0x68   : > { %p6636_p11 = pnand %p6634_p10, %p6631_p6 }
  0x6a   : > { %6639 = shalt.err (!%p6636_p11)
}
  0x6b   : > { %s6640_s15 = scalar_lea.vmem %s209_s8, 16  ;;  %s6647_s18 = scalar_lea.vmem %s209_s8, 32 }
  0x6c   : > { %p6641_p0 = scmp.ne.s32.totalorder %s209_s8, %s6640_s15  ;;  %p6648_p7 = scmp.lt.s32.totalorder %s209_s8, %s209_s8 }
  0x6d   : > { %p6649_p8 = scmp.lt.s32.totalorder %s6647_s18, %s6640_s15 }
  0x6e   : > { %p6643_p3 = pnand %p6641_p0, %p6989_p2 }
  0x6f   : > { %p6650_p9 = por %p6649_p8, %p6648_p7 }
  0x70   : > { %p6644_p5 = pneg %p6643_p3 }
  0x72   : > { %p6651_p12 = pnand %p6650_p9, %p6644_p5 }
  0x74   : > { %6654 = shalt.err (!%p6651_p12)
}
  0x75   : > { %6182 = dma.hbm_to_vmem [thread:$0]  (!%p6975_p13), %s9364_s2, 16, %s209_s8, [#allocation6]  }
  0x76   : > { %s9365_s4 = sld [smem:[#allocation45_spill]] }
  0x7c   : > { %s6655_s30 = scalar_lea.hbm %s9365_s4, 16 }
  0x7d   : > { %p6656_p1 = scmp.ne.s32.totalorder %s9365_s4, %s6655_s30  ;;  %p6662_p10 = scmp.lt.u32.totalorder %s6655_s30, %s9365_s4 }
  0x7f   : > { %p6658_p4 = pnand %p6656_p1, %p6989_p2 }
  0x81   : > { %p6659_p6 = pneg %p6658_p4 }
  0x83   : > { %p6664_p11 = pnand %p6662_p10, %p6659_p6 }
  0x85   : > { %6667 = shalt.err (!%p6664_p11)
}
  0x86   : > { %s6668_s15 = scalar_lea.vmem %s233_s21, 16  ;;  %s6675_s8 = scalar_lea.vmem %s233_s21, 32 }
  0x87   : > { %p6669_p0 = scmp.ne.s32.totalorder %s233_s21, %s6668_s15  ;;  %p6676_p7 = scmp.lt.s32.totalorder %s233_s21, %s233_s21 }
  0x88   : > { %p6677_p8 = scmp.lt.s32.totalorder %s6675_s8, %s6668_s15 }
  0x89   : > { %p6671_p3 = pnand %p6669_p0, %p6989_p2 }
  0x8a   : > { %p6678_p9 = por %p6677_p8, %p6676_p7 }
  0x8b   : > { %p6672_p5 = pneg %p6671_p3 }
  0x8d   : > { %p6679_p12 = pnand %p6678_p9, %p6672_p5 }
  0x8f   : > { %6682 = shalt.err (!%p6679_p12)
}
  0x90   : > { %6188 = dma.hbm_to_vmem [thread:$0]  (!%p6975_p13), %s9365_s4, 16, %s233_s21, [#allocation9]  }
  0x91   : > { %s32_s11 = sadd.s32 1, %s6835_s26  ;;  %s35_s13 = sadd.s32 1, %s6839_s27 }
  0x92   : > { %p33_p2 = scmp.ge.s32.totalorder %s32_s11, 2  ;;  %s4816_s25 = sshll.u32 %s6839_s27, 1 }
  0x93   : > { %s46_s19 = sadd.s32 1, %s6823_s23  ;;  %s40_s9 = sadd.s32 %s6835_s26, %s4816_s25 }
  0x94   : > { %s9526_s11 = smov (%p33_p2, %s32_s11), 0  ;;  %s9528_s13 = smov (!%p33_p2, %s35_s13), %s6839_s27 }
  0x95   : > { %p53_p1 = scmp.ne.s32.totalorder %s6823_s23, %s6819_s22  ;;  %p37_p4 = scmp.ge.s32.totalorder %s9528_s13, 2 }
  0x96   : > { %p54_p6 = scmp.eq.s32.totalorder %s6843_s28, 0  ;;  %s154_s21 = ssub.s32 %s6835_s26, %s9526_s11 }
  0x97   : > { %s158_s30 = sadd.s32 1, %s6811_s20  ;;  %s9530_s13 = smov (%p37_p4, %s9528_s13), 0 }
  0x98   : > { %p7086_p13 = por %p54_p6, %p53_p1  ;;  %p6201_p10 = scmp.lt.s32.totalorder %s6843_s28, 4 }
  0x99   : > { %s4817_s16 = sshll.u32 %s9530_s13, 1  ;;  %s153_s12 = ssub.s32 %s6839_s27, %s9530_s13 }
  0x9a   : > { %s42_s5 = sadd.s32 %s4817_s16, %s9526_s11  ;;  %s155_s15 = sor.u32 %s154_s21, %s153_s12 }
  0x9b   : > { %s43_s8 = ssub.s32 %s40_s9, %s42_s5  ;;  %p156_p11 = scmp.eq.s32.totalorder %s155_s15, 0 }
  0x9c   : > { %p44_p0 = scmp.eq.s32.totalorder %s43_s8, 0  ;;  %s243_s18 = sand.u32 1, %s6823_s23  }
  0x9d   : > { %s7097_s1 = scalar_select %p156_p11, %s6811_s20, %s158_s30  }
  0x9e   : > { %s7100_s25 = scalar_select %p44_p0, %s6823_s23, %s46_s19  }
  0x9f   : > { %s6153_s17 = smul.u32 192, %s243_s18  ;;  %p7106_p3 = pnand %p6201_p10, %p7086_p13 }
  0xa0   : > { %s6154_s29 = smul.u32 3072, %s40_s9  ;;  %s7117_s9 = scalar_lea.sflag [#allocation3], %s243_s18 }
  0xa1   : > { %s247_s19 = scalar_lea.vmem [#allocation2], %s6153_s17  ;;  %p6685_p7 = pneg %p7106_p3 }
  0xa2   : > { %s7113_s21 = scalar_lea.hbm %s9299_s0, %s6154_s29  ;;  %s256_s30 = sshll.u32 %s247_s19, 4  ;;  %s7115_s30 = int_to_ptr.vmem [resolvable:$true] %s256_s30 }
  0xa3   : > { %s6683_s14 = scalar_lea.hbm %s7113_s21, 3072  ;;  %s6688_s29 = scalar_lea.hbm %s9299_s0, 12288 }
  0xa4   : > { %p6684_p5 = scmp.ne.s32.totalorder %s7113_s21, %s6683_s14  ;;  %p6689_p12 = scmp.lt.u32.totalorder %s7113_s21, %s9299_s0 }
  0xa5   : > { %p6690_p2 = scmp.lt.u32.totalorder %s6688_s29, %s6683_s14  ;;  %p6692_p4 = scmp.lt.u32.totalorder %s6683_s14, %s7113_s21 }
  0xa6   : > { %p6686_p8 = pnand %p6685_p7, %p6684_p5 }
  0xa7   : > { %p6691_p1 = por %p6690_p2, %p6689_p12 }
  0xa8   : > { %p6687_p9 = pneg %p6686_p8 }
  0xa9   : > { %p6693_p6 = por %p6692_p4, %p6691_p1 }
  0xab   : > { %p6694_p13 = pnand %p6693_p6, %p6687_p9 }
  0xad   : > { %6697 = shalt.err (!%p6694_p13)
}
  0xae   : > { %s6698_s17 = scalar_lea.vmem %s7115_s30, 3072  ;;  %s6851_s5 = smov [#allocation2]  }
  0xaf   : > { %p6699_p10 = scmp.ne.s32.totalorder %s7115_s30, %s6698_s17  ;;  %s6703_s15 = sshll.u32 %s6851_s5, 4  ;;  %s6704_s15 = int_to_ptr.vmem [resolvable:$false] %s6703_s15 }
  0xb0   : > { %s6705_s8 = scalar_lea.vmem %s6704_s15, 6144  ;;  %p6706_p5 = scmp.lt.s32.totalorder %s7115_s30, %s6704_s15 }
  0xb1   : > { %p6701_p11 = pnand %p6699_p10, %p6685_p7  ;;  %p6707_p8 = scmp.lt.s32.totalorder %s6705_s8, %s6698_s17 }
  0xb3   : > { %p6702_p0 = pneg %p6701_p11  ;;  %p6708_p12 = por %p6707_p8, %p6706_p5 }
  0xb5   : > { %p6709_p2 = pnand %p6708_p12, %p6702_p0 }
  0xb7   : > { %6712 = shalt.err (!%p6709_p2)
}
  0xb8   : > { %s9368_s18 = smov 4   ;;  %s9369_s19 = smov 64  }
  0xb9   : > { %6192 = dma.hbm_to_vmem [thread:$0]  (!%p7106_p3), %s7113_s21, 3072, %s7115_s30, %s7117_s9, %s9369_s19, %s9369_s19, %s9368_s18  }
  0xba   : > { %p9370_p7 = scmp.ne.s32.totalorder %s9359_s10, 0 }
  0xbc   : > { %268 = sbr.rel (%p9370_p7) target bundleno = 1163 (0x48b), region = 40 }
  0xc3   : > { %s270_s14 = sand.u32 1, %s6819_s22   ;;  %p9371_p9 = scmp.ne.s32.totalorder %s9354_s7, 0 }
  0xc4   : > { %s6155_s3 = smul.u32 192, %s270_s14  ;;  %s271_s4 = scalar_lea.sflag [#allocation3], %s270_s14 }
  0xc6   : > { %s7151_s29 = scalar_lea.vmem [#allocation2], %s6155_s3 }
  0xc7   : > { %6786 = dma.done.wait (%p9371_p9), %s271_s4, 3072  }
  0xc8   : > { %6788 = vsyncadd (%p9371_p9), %s271_s4, 4294964224  ;;  %p9372_p1 = scmp.ne.s32.totalorder %s9353_s6, 0 }
  0xca   : > { %6790 = dma.done.wait (%p9372_p1), [#allocation6], 9232  }
  0xcb   : > { %6792 = vsyncadd (%p9372_p1), [#allocation6], 4294958064 }
  0xcc   : > { %6794 = dma.done.wait (%p9372_p1), [#allocation9], 9232  }
  0xcd   : > { %6796 = vsyncadd (%p9372_p1), [#allocation9], 4294958064  ;;  %v6305_v0 = vld [vmem:[#allocation5 + $0x40] sm:$0xff]   ;;  %v6309_v4 = vld [vmem:[#allocation5 + $0x48] sm:$0xff]   ;;  %vm9343_vm0 = vsmask.f32 7424 }
  0xce   : > { %v6306_v1 = vld [vmem:[#allocation5] sm:$0xff]   ;;  %5310 = vmatprep.subr.bf16.mxu0 %v6305_v0  ;;  %v6310_v5 = vld [vmem:[#allocation5 + $0x8] sm:$0xff]   ;;  %v6313_v8 = vld [vmem:[#allocation5 + $0x50] sm:$0xff]   ;;  %vm9344_vm1 = vcmask 1046528   ;;  %vm6853_vm2 = vmmov 0   ;;  %s5155_s2 = sshll.u32 %s6827_s24, 3 }
  0xcf   : > { %v6307_v2 = vld [vmem:[#allocation5 + $0xc0] sm:$0xff]   ;;  %5311 = vmatpush3.bf16.msra.mxu0 %v6306_v1  ;;  %v6311_v6 = vld [vmem:[#allocation5 + $0xc8] sm:$0xff]   ;;  %v6314_v9 = vld [vmem:[#allocation5 + $0x10] sm:$0xff]   ;;  %s5156_s6 = sadd.s32 4294967295, %s5155_s2  ;;  %s9506_s7 = sld [smem:[#allocation17_spill]] }
  0xd0   : > { %v6308_v3 = vld [vmem:[#allocation5 + $0x80] sm:$0xff]   ;;  %5416 = vmatprep.subr.bf16.mxu1 %v6307_v2  ;;  %5312 = vmatprep.subr.bf16.mxu0 %v6309_v4  ;;  %v6312_v7 = vld [vmem:[#allocation5 + $0x88] sm:$0xff]   ;;  %v6315_v10 = vld [vmem:[#allocation5 + $0xd0] sm:$0xff]   ;;  %s9507_s9 = sld [smem:[#allocation18_spill]]  ;;  %s5309_s16 = sshll.u32 %s6827_s24, 4 }
  0xd1   : > { %5417 = vmatpush3.bf16.msra.mxu1 %v6308_v3  ;;  %v6316_v11 = vld [vmem:[#allocation5 + $0x90] sm:$0xff]   ;;  %v6317_v12 = vld [vmem:[#allocation5 + $0x58] sm:$0xff]   ;;  %v6321_v16 = vld [vmem:[#allocation5 + $0x60] sm:$0xff]   ;;  %s9508_s8 = sld [smem:[#allocation19_spill]]  ;;  %s9509_s19 = sld [smem:[#allocation46_spill]] }
  0xd2   : > { %5418 = vmatprep.subr.bf16.mxu1 %v6311_v6  ;;  %v6318_v13 = vld [vmem:[#allocation5 + $0x18] sm:$0xff]   ;;  %v6322_v17 = vld [vmem:[#allocation5 + $0x20] sm:$0xff]   ;;  %v6325_v20 = vld [vmem:[#allocation5 + $0x68] sm:$0xff]   ;;  %s6854_s2 = smov [#allocation11]  }
  0xd3   : > { %5313 = vmatpush3.bf16.msra.mxu0 %v6310_v5  ;;  %v6319_v14 = vld [vmem:[#allocation5 + $0xd8] sm:$0xff]   ;;  %v6323_v18 = vld [vmem:[#allocation5 + $0xe0] sm:$0xff]   ;;  %v6326_v21 = vld [vmem:[#allocation5 + $0x28] sm:$0xff]  }
  0xd4   : > { %5314 = vmatprep.subr.bf16.mxu0 %v6313_v8  ;;  %v6320_v15 = vld [vmem:[#allocation5 + $0x98] sm:$0xff]   ;;  %v6324_v19 = vld [vmem:[#allocation5 + $0xa0] sm:$0xff]   ;;  %v6327_v22 = vld [vmem:[#allocation5 + $0xe8] sm:$0xff]  }
  0xd5   : > { %5419 = vmatpush3.bf16.msra.mxu1 %v6312_v7  ;;  %v6328_v23 = vld [vmem:[#allocation5 + $0xa8] sm:$0xff]   ;;  %v6329_v24 = vld [vmem:[#allocation5 + $0x70] sm:$0xff]   ;;  %v6333_v28 = vld [vmem:[#allocation5 + $0x78] sm:$0xff]   ;;  %s314_s10 = sand.u32 1, %s9506_s7  }
  0xd6   : > { %5420 = vmatprep.subr.bf16.mxu1 %v6315_v10  ;;  %v6330_v25 = vld [vmem:[#allocation5 + $0x30] sm:$0xff]   ;;  %v6334_v29 = vld [vmem:[#allocation5 + $0x38] sm:$0xff]   ;;  %v321_v31 = vld [vmem:[%s7151_s29] sm:$0xf]  ;;  %s4831_s21 = sshll.u32 %s314_s10, 7  ;;  %s5305_s12 = sshll.u32 %s9507_s9, 5 }
  0xd7   : > { %5315 = vmatpush3.bf16.msra.mxu0 %v6314_v9  ;;  %v6331_v26 = vld [vmem:[#allocation5 + $0xf0] sm:$0xff]   ;;  %v6335_v30 = vld [vmem:[#allocation5 + $0xf8] sm:$0xff]   ;;  %v322_v32 = vld [vmem:[%s7151_s29 + $0x4] sm:$0xf]  ;;  %s9184_s30 = scalar_lea.vmem [#allocation11], %s4831_s21  ;;  %s4684_s17 = sadd.s32 %s5309_s16, %s5305_s12 }
  0xd8   : > { %5316 = vmatprep.subr.bf16.mxu0 %v6317_v12  ;;  %v6332_v27 = vld [vmem:[#allocation5 + $0xb0] sm:$0xff]   ;;  %v7168_v33 = vld [vmem:[%s7151_s29 + $0x8] sm:$0xf]  ;;  %v351_v34 = vld [vmem:[%s7151_s29 + $0xc] sm:$0x1]  ;;  %v4932_v35 = vcombine.low %v321_v31, %v322_v32  ;;  %s5306_s5 = sshll.u32 %s4684_s17, 7  ;;  %s9510_s14 = smov %s9509_s19 }
  0xd9   : > { %5421 = vmatpush3.bf16.msra.mxu1 %v6316_v11  ;;  %v7172_v36 = vcombine.low %v7168_v33, %v351_v34  ;;  %v6338_v37 = vld [vmem:[#allocation5 + $0xb8] sm:$0xff]   ;;  %v6339_v40 = vld [vmem:[#allocation5 + $0x140] sm:$0xff]   ;;  %v4832_v41 = vld [vmem:[%s7151_s29 + $0x10] sm:$0xf]  ;;  %s4687_s15 = sshll.u32 %s9184_s30, 4  ;;  %s9229_s3 = scalar_lea.hbm %s9509_s19, %s5306_s5  ;;  %s9231_s15 = int_to_ptr.vmem [resolvable:$true] %s4687_s15 }
  0xda   : > { %5422 = vmatprep.subr.bf16.mxu1 %v6319_v14  ;;  %v575_v38 = vshrl.u32 %v4932_v35, 16  ;;  %v577_v39 = vshll.u32 %v4932_v35, 16  ;;  %v7177_v43 = vld [vmem:[%s7151_s29 + $0x14] sm:$0xf]  ;;  %v6342_v47 = vld [vmem:[#allocation5 + $0x100] sm:$0xff]   ;;  %v6351_v63 = vld [vmem:[#allocation5 + $0x148] sm:$0xff]  }
  0xdb   : > { %5317 = vmatpush3.bf16.msra.mxu0 %v6318_v13  ;;  %v582_v42 = vshll.u32 %v7172_v36, 16  ;;  %v7180_v45 = vcombine.low %v4832_v41, %v7177_v43  ;;  %v361_v48 = vld [vmem:[%s7151_s29] sm:$0xe]  ;;  %v7184_v49 = vld [vmem:[%s7151_s29 + $0x10] sm:$0xf]  ;;  %v756_v52 = vrot.slane %v7172_v36, 1 }
  0xdc   : > { %5318 = vmatprep.subr.bf16.mxu0 %v6321_v16  ;;  %v579_v44 = vrot.slane %v577_v39, 1  ;;  %v4952_v51 = vcombine.low %v361_v48, %v322_v32  ;;  %v7189_v53 = vld [vmem:[%s7151_s29 + $0x14] sm:$0xf]  ;;  %v7192_v54 = vld [vmem:[%s7151_s29 + $0x18] sm:$0xf]  ;;  %v586_v55 = vshrl.u32 %v7172_v36, 16 }
  0xdd   : > { %5423 = vmatpush3.bf16.msra.mxu1 %v6320_v15  ;;  %v584_v46 = vrot.slane %v582_v42, 1  ;;  %2608 = vmatprep.mubr.bf16.mxu1 %v7180_v45  ;;  %v352_v56 = vld [vmem:[%s7151_s29 + $0x1c] sm:$0x1]  ;;  %v4934_v57 = vcombine.low %v7184_v49, %v7189_v53  ;;  %v7199_v58 = vld [vmem:[%s7151_s29 + $0x18] sm:$0xf]  ;;  %v6353_v10 = vld [vmem:[#allocation5 + $0x108] sm:$0xff]  }
  0xde   : > { %5424 = vmatprep.subr.bf16.mxu1 %v6323_v18  ;;  %v580_v50 = vor.u32 %v579_v44, %v575_v38  ;;  %v7202_v59 = vld [vmem:[%s7151_s29 + $0x20] sm:$0xf]  ;;  %v755_v61 = vrot.slane %v4952_v51, 1  ;;  %v4935_v62 = vcombine.low %v7192_v54, %v352_v56  ;;  %v362_v2 = vld [vmem:[%s7151_s29 + $0x10] sm:$0xe]  ;;  %v6373_v48 = vld [vmem:[#allocation5 + $0x158] sm:$0xff]  }
  0xdf   : > { %5319 = vmatpush3.bf16.msra.mxu0 %v6322_v17  ;;  %v590_v0 = vshrl.u32 %v4934_v57, 16  ;;  %v592_v1 = vshll.u32 %v4934_v57, 16  ;;  %v5026_v5 = vcombine.low %v7199_v58, %v7202_v59  ;;  %v4953_v6 = vcombine.low %v362_v2, %v7189_v53  ;;  %v7212_v9 = vld [vmem:[%s7151_s29 + $0x24] sm:$0xf]  ;;  %v7215_v15 = vld [vmem:[%s7151_s29 + $0x28] sm:$0xf] }
  0xe0   : > { %5320 = vmatprep.subr.bf16.mxu0 %v6325_v20  ;;  %v585_v60 = vsel %vm9343_vm0, %v580_v50, %v584_v46  ;;  %v757_v3 = vsel %vm9344_vm1, %v755_v61, %v756_v52  ;;  %v597_v4 = vshll.u32 %v4935_v62, 16  ;;  %v588_v7 = vor.u32 %v586_v55, %v584_v46  ;;  %v327_v17 = vld [vmem:[%s7151_s29 + $0x20] sm:$0xf]  ;;  %v6361_v18 = vld [vmem:[#allocation5 + $0x150] sm:$0xff]   ;;  %v7244_v39 = vld [vmem:[%s7151_s29 + $0x38] sm:$0xf] }
  0xe1   : > { %5425 = vmatpush3.bf16.msra.mxu1 %v6324_v19  ;;  %2455 = vmatprep.mubr.bf16.mxu0 %v585_v60  ;;  %v594_v8 = vrot.slane %v592_v1, 1  ;;  %v758_v12 = vrot.slane %v4953_v6, 1  ;;  %v759_v13 = vrot.slane %v4935_v62, 1  ;;  %v601_v14 = vshrl.u32 %v4935_v62, 16  ;;  %v7240_v36 = vld [vmem:[%s7151_s29 + $0x34] sm:$0xf] }
  0xe2   : > { %5426 = vmatprep.subr.bf16.mxu1 %v6327_v22  ;;  %v599_v11 = vrot.slane %v597_v4, 1  ;;  %v5023_v19 = vcombine.low %v7168_v33, %v7184_v49  ;;  %v328_v22 = vld [vmem:[%s7151_s29 + $0x24] sm:$0xf]  ;;  %v6364_v41 = vld [vmem:[#allocation5 + $0x110] sm:$0xff]   ;;  %v363_v50 = vld [vmem:[%s7151_s29 + $0x20] sm:$0xe] }
  0xe3   : > { %5321 = vmatpush3.bf16.msra.mxu0 %v6326_v21  ;;  %v595_v16 = vor.u32 %v594_v8, %v590_v0  ;;  %v760_v20 = vsel %vm9344_vm1, %v758_v12, %v759_v13  ;;  %v1436_v44 = vunpack.c.l.b16 %v759_v13  ;;  %v4838_v49 = vld [vmem:[%s7151_s29 + $0x30] sm:$0xf]  ;;  %v7255_v56 = vld [vmem:[%s7151_s29 + $0x34] sm:$0xf]  ;;  %v6374_v61 = vld [vmem:[#allocation5 + $0x118] sm:$0xff]   ;;  %v5032_v0 = vcombine.low %v7189_v53, %v7192_v54  ;;  %s9238_s4 = scalar_lea.sflag [#allocation4], %s314_s10 }
  0xe4   : > { %5322 = vmatprep.subr.bf16.mxu0 %v6329_v24  ;;  %v603_v21 = vor.u32 %v601_v14, %v599_v11  ;;  %v353_v24 = vld [vmem:[%s7151_s29 + $0x2c] sm:$0x1]  ;;  %v1430_v42 = vunpack.c.h.b16 %v760_v20  ;;  %v4954_v2 = vcombine.low %v363_v50, %v328_v22  ;;  %v7261_v4 = vcombine.low %v4838_v49, %v7255_v56  ;;  %v364_v6 = vld [vmem:[%s7151_s29 + $0x30] sm:$0xe]  ;;  %v7269_v14 = vld [vmem:[%s7151_s29 + $0x38] sm:$0xf] }
  0xe5   : > { %5427 = vmatpush3.bf16.msra.mxu1 %v6328_v23  ;;  %v7223_v23 = vld [vmem:[%s7151_s29 + $0x28] sm:$0xf]  ;;  %p9511_p4 = scmp.ne.s32.totalorder %s9508_s8, 0 }
  0xe6   : > { %5428 = vmatprep.subr.bf16.mxu1 %v6331_v26  ;;  %v5025_v26 = vcombine.low %v756_v52, %v760_v20  ;;  %v1435_v31 = vunpack.c.l.b16 %v603_v21  ;;  %v7232_v32 = vcombine.low %v7223_v23, %v353_v24  ;;  %v1753_v1 = vpack.c.b16 %v1436_v44, %v1430_v42  ;;  %v6397_v53 = vld [vmem:[#allocation5 + $0x168] sm:$0xff]   ;;  %v333_v21 = vld [vmem:[%s7151_s29 + $0x40] sm:$0xf]  ;;  %v6409_v24 = vld [vmem:[#allocation5 + $0x170] sm:$0xff]  }
  0xe7   : > { %5323 = vmatpush3.bf16.msra.mxu0 %v6330_v25  ;;  %v600_v25 = vsel %vm9343_vm0, %v595_v16, %v599_v11  ;;  %v6388_v11 = vld [vmem:[#allocation5 + $0x120] sm:$0xff]   ;;  %v761_v54 = vrot.slane %v4954_v2, 1  ;;  %v6398_v20 = vld [vmem:[#allocation5 + $0x128] sm:$0xff]   ;;  %v7296_v42 = vld [vmem:[%s7151_s29 + $0x54] sm:$0xf] }
  0xe8   : > { %5324 = vmatprep.subr.bf16.mxu0 %v6333_v28  ;;  %v7229_v28 = vcombine.low %v327_v17, %v328_v22  ;;  %v612_v38 = vshll.u32 %v7232_v32, 16  ;;  %v762_v12 = vrot.slane %v7232_v32, 1  ;;  %v7272_v16 = vld [vmem:[%s7151_s29 + $0x40] sm:$0xf]  ;;  %v4955_v17 = vcombine.low %v364_v6, %v7240_v36  ;;  %v7279_v22 = vld [vmem:[%s7151_s29 + $0x44] sm:$0xf] }
  0xe9   : > { %5429 = vmatpush3.bf16.msra.mxu1 %v6332_v27  ;;  %v5033_v27 = vcombine.low %v7212_v9, %v7215_v15  ;;  %v6413_v44 = vld [vmem:[#allocation5 + $0x1c8] sm:$0xff]  }
  0xea   : > { %5430 = vmatprep.subr.bf16.mxu1 %v6335_v30  ;;  %v1429_v30 = vunpack.c.h.b16 %v600_v25  ;;  %v605_v33 = vshrl.u32 %v7229_v28, 16  ;;  %v607_v34 = vshll.u32 %v7229_v28, 16  ;;  %v614_v55 = vrot.slane %v612_v38, 1  ;;  %v6411_v38 = vld [vmem:[#allocation5 + $0x130] sm:$0xff]  }
  0xeb   : > { %5325 = vmatpush3.bf16.msra.mxu0 %v6334_v29  ;;  %v5024_v29 = vcombine.low %v588_v7, %v600_v25  ;;  %v763_v25 = vsel %vm9344_vm1, %v761_v54, %v762_v12  ;;  %v4844_v54 = vld [vmem:[%s7151_s29 + $0x50] sm:$0xf] }
  0xec   : > { %5522 = vmatprep.subr.bf16.mxu0 %v6339_v40  ;;  %v354_v40 = vld [vmem:[%s7151_s29 + $0x3c] sm:$0x1]  ;;  %v609_v46 = vrot.slane %v607_v34, 1  ;;  %v355_v34 = vld [vmem:[%s7151_s29 + $0x4c] sm:$0x1] }
  0xed   : > { %5431 = vmatpush3.bf16.msra.mxu1 %v6338_v37  ;;  %v1752_v37 = vpack.c.b16 %v1435_v31, %v1429_v30  ;;  %v7252_v51 = vcombine.low %v7244_v39, %v354_v40  ;;  %v764_v30 = vrot.slane %v4955_v17, 1  ;;  %v6412_v40 = vld [vmem:[#allocation5 + $0x180] sm:$0xff]  }
  0xee   : > { %2456 = vmatmul.mubr.bf16.vlgmr.msra.gmra.mrb[0].mxu0 %v4932_v35  ;;  %v7237_v35 = vld [vmem:[%s7151_s29 + $0x30] sm:$0xf]  ;;  %v610_v52 = vor.u32 %v609_v46, %v605_v33  ;;  %v7286_v33 = vld [vmem:[%s7151_s29 + $0x48] sm:$0xf]  ;;  %v7300_v46 = vld [vmem:[%s7151_s29 + $0x44] sm:$0xf] }
  0xef   : > { %5523 = vmatpush3.bf16.msra.mxu0 %v6342_v47  ;;  %2463 = vmatprep.mubr.bf16.mxu0 %v5024_v29  ;;  %v4938_v47 = vcombine.low %v7237_v35, %v7240_v36  ;;  %v627_v62 = vshll.u32 %v7252_v51, 16  ;;  %v765_v31 = vrot.slane %v7252_v51, 1  ;;  %v7304_v50 = vcombine.low %v7286_v33, %v355_v34 }
  0xf0   : > { %2609 = vmatmul.mubr.bf16.vlgmr.msra.gmra.mrb[0].mxu1 %v757_v3  ;;  %5524 = vmatprep.subr.bf16.mxu0 %v6351_v63  ;;  %v6387_v63 = vld [vmem:[#allocation5 + $0x160] sm:$0xff]   ;;  %v615_v7 = vsel %vm9343_vm0, %v610_v52, %v614_v55 }
  0xf1   : > { %2616 = vmatprep.mubr.bf16.mxu1 %v5026_v5  ;;  %v620_v57 = vshrl.u32 %v4938_v47, 16  ;;  %v622_v60 = vshll.u32 %v4938_v47, 16  ;;  %v616_v5 = vshrl.u32 %v7232_v32, 16  ;;  %v766_v47 = vsel %vm9344_vm1, %v764_v30, %v765_v31 }
  0xf2   : > { %v642_v2 = vshll.u32 %v7304_v50, 16  ;;  %v646_v30 = vshrl.u32 %v7304_v50, 16 }
  0xf3   : > { %5525 = vmatpush3.bf16.msra.mxu0 %v6353_v10  ;;  %v624_v3 = vrot.slane %v622_v60, 1  ;;  %v629_v10 = vrot.slane %v627_v62, 1  ;;  %v618_v13 = vor.u32 %v616_v5, %v614_v55  ;;  %v6416_v55 = vld [vmem:[#allocation5 + $0x188] sm:$0xff]   ;;  %v356_v60 = vld [vmem:[%s7151_s29 + $0x5c] sm:$0x1]  ;;  %v5035_v62 = vcombine.low %v7223_v23, %v7237_v35 }
  0xf4   : > { %5526 = vmatprep.subr.bf16.mxu0 %v6361_v18  ;;  %v631_v18 = vshrl.u32 %v7252_v51, 16  ;;  %v7307_v51 = vld [vmem:[%s7151_s29 + $0x48] sm:$0xf]  ;;  %v6422_v23 = vld [vmem:[#allocation5 + $0x1d8] sm:$0xff]   ;;  %v1466_v35 = vunpack.c.h.b16 %v766_v47 }
  0xf5   : > { %v625_v8 = vor.u32 %v624_v3, %v620_v57  ;;  %v7313_v57 = vld [vmem:[%s7151_s29 + $0x58] sm:$0xf] }
  0xf6   : > { %2464 = vmatmul.mubr.bf16.gmra.mrb[4].mxu0 %v5023_v19  ;;  %v633_v32 = vor.u32 %v631_v18, %v629_v10  ;;  %v7323_v6 = vcombine.low %v7313_v57, %v356_v60  ;;  %v6434_v60 = vld [vmem:[#allocation5 + $0x1a0] sm:$0xff]  }
  0xf7   : > { %2471 = vmatprep.mubr.bf16.mxu0 %v1752_v37  ;;  %5527 = vmatpush3.bf16.msra.mxu0 %v6364_v41  ;;  %v630_v19 = vsel %vm9343_vm0, %v625_v8, %v629_v10  ;;  %v7290_v37 = vcombine.low %v333_v21, %v7279_v22  ;;  %v7293_v41 = vld [vmem:[%s7151_s29 + $0x50] sm:$0xf]  ;;  %v1472_v10 = vunpack.c.l.b16 %v765_v31  ;;  %v6430_v21 = vld [vmem:[#allocation5 + $0x178] sm:$0xff]  }
  0xf8   : > { %2617 = vmatmul.mubr.bf16.gmra.mrb[4].mxu1 %v5025_v26  ;;  %5528 = vmatprep.subr.bf16.mxu0 %v6373_v48  ;;  %v5038_v26 = vcombine.low %v7269_v14, %v7272_v16  ;;  %v5036_v29 = vcombine.low %v618_v13, %v630_v19  ;;  %v1465_v48 = vunpack.c.h.b16 %v630_v19  ;;  %v1471_v49 = vunpack.c.l.b16 %v633_v32  ;;  %v6421_v8 = vld [vmem:[#allocation5 + $0x190] sm:$0xff]  }
  0xf9   : > { %2624 = vmatprep.mubr.bf16.mxu1 %v5033_v27  ;;  %v6410_v27 = vld [vmem:[#allocation5 + $0x1c0] sm:$0xff]   ;;  %v637_v52 = vshll.u32 %v7290_v37, 16  ;;  %v635_v3 = vshrl.u32 %v7290_v37, 16  ;;  %v657_v19 = vshll.u32 %v7323_v6, 16  ;;  %v366_v31 = vld [vmem:[%s7151_s29 + $0x50] sm:$0xe] }
  0xfa   : > { %5628 = vmatprep.subr.bf16.mxu1 %v6410_v27  ;;  %v1777_v27 = vpack.c.b16 %v1472_v10, %v1466_v35 }
  0xfb   : > { %5529 = vmatpush3.bf16.msra.mxu0 %v6374_v61  ;;  %5629 = vmatpush3.bf16.msra.mxu1 %v6412_v40  ;;  %v6420_v61 = vld [vmem:[#allocation5 + $0x1d0] sm:$0xff]   ;;  %v639_v5 = vrot.slane %v637_v52, 1  ;;  %v659_v34 = vrot.slane %v657_v19, 1  ;;  %v7343_v40 = vld [vmem:[%s7151_s29 + $0x58] sm:$0xf]  ;;  %v6433_v52 = vld [vmem:[#allocation5 + $0x1e0] sm:$0xff]  }
  0xfc   : > { %5530 = vmatprep.subr.bf16.mxu0 %v6387_v63  ;;  %5630 = vmatprep.subr.bf16.mxu1 %v6413_v44  ;;  %v5037_v63 = vcombine.low %v762_v12, %v766_v47  ;;  %v7328_v12 = vld [vmem:[%s7151_s29 + $0x54] sm:$0xf]  ;;  %v7346_v44 = vld [vmem:[%s7151_s29 + $0x60] sm:$0xf]  ;;  %v4957_v47 = vcombine.low %v366_v31, %v7296_v42  ;;  %v7396_v19 = vld [vmem:[%s7151_s29 + $0x68] sm:$0xf] }
  0xfd   : > { %v640_v13 = vor.u32 %v639_v5, %v635_v3  ;;  %v771_v5 = vrot.slane %v7323_v6, 1 }
  0xfe   : > { %2472 = vmatmul.mubr.bf16.gmra.mrb[8].mxu0 %v5032_v0  ;;  %v1776_v0 = vpack.c.b16 %v1471_v49, %v1465_v48  ;;  %v339_v48 = vld [vmem:[%s7151_s29 + $0x60] sm:$0xf]  ;;  %v7351_v49 = vld [vmem:[%s7151_s29 + $0x64] sm:$0xf] }
  0xff   : > { %2479 = vmatprep.mubr.bf16.mxu0 %v615_v7  ;;  %5531 = vmatpush3.bf16.msra.mxu0 %v6388_v11  ;;  %v365_v11 = vld [vmem:[%s7151_s29 + $0x40] sm:$0xe] }
 0x100   : > { %2625 = vmatmul.mubr.bf16.gmra.mrb[8].mxu1 %v1753_v1  ;;  %5532 = vmatprep.subr.bf16.mxu0 %v6397_v53  ;;  %v5045_v1 = vcombine.low %v7300_v46, %v7307_v51  ;;  %v644_v53 = vrot.slane %v642_v2, 1  ;;  %v4862_v2 = vld [vmem:[%s7151_s29 + $0x1c] sm:$0x1] }
 0x101   : > { %2632 = vmatprep.mubr.bf16.mxu1 %v7261_v4  ;;  %5631 = vmatpush3.bf16.msra.mxu1 %v6416_v55  ;;  %v661_v55 = vshrl.u32 %v7323_v6, 16  ;;  %v7382_v6 = vcombine.low %v7199_v58, %v4862_v2 }
 0x102   : > { %5632 = vmatprep.subr.bf16.mxu1 %v6420_v61  ;;  %v7358_v61 = vcombine.low %v7202_v59, %v7212_v9  ;;  %v770_v59 = vrot.slane %v4957_v47, 1  ;;  %v6436_v47 = vld [vmem:[#allocation5 + $0x1a8] sm:$0xff]  }
 0x103   : > { %5533 = vmatpush3.bf16.msra.mxu0 %v6398_v20  ;;  %v6425_v20 = vld [vmem:[#allocation5 + $0x198] sm:$0xff]  }
 0x104   : > { %5534 = vmatprep.subr.bf16.mxu0 %v6409_v24  ;;  %v4956_v24 = vcombine.low %v365_v11, %v7279_v22  ;;  %v645_v22 = vsel %vm9343_vm0, %v640_v13, %v644_v53  ;;  %v903_v35 = vshll.u32 %v7358_v61, 16  ;;  %v7378_v11 = vld [vmem:[%s7151_s29 + $0x68] sm:$0xf]  ;;  %v7388_v13 = vld [vmem:[%s7151_s29 + $0x74] sm:$0xf] }
 0x105   : > { %5633 = vmatpush3.bf16.msra.mxu1 %v6421_v8  ;;  %v663_v8 = vor.u32 %v661_v55, %v659_v34 }
 0x106   : > { %2480 = vmatmul.mubr.bf16.gmra.mrb[12].mxu0 %v7229_v28  ;;  %v4942_v28 = vcombine.low %v7293_v41, %v7296_v42  ;;  %5634 = vmatprep.subr.bf16.mxu1 %v6422_v23  ;;  %v7373_v23 = vcombine.low %v339_v48, %v7351_v49  ;;  %v7410_v31 = vrot.slane %v903_v35, 1  ;;  %v6441_v35 = vld [vmem:[#allocation5 + $0x1b0] sm:$0xff]  }
 0x107   : > { %2487 = vmatprep.mubr.bf16.mxu0 %v5036_v29  ;;  %5535 = vmatpush3.bf16.msra.mxu0 %v6411_v38  ;;  %v7335_v29 = vcombine.low %v4844_v54, %v7328_v12  ;;  %v768_v38 = vrot.slane %v7304_v50, 1  ;;  %v886_v50 = vshrl.u32 %v7180_v45, 16  ;;  %v7385_v54 = vld [vmem:[%s7151_s29 + $0x70] sm:$0xf] }
 0x108   : > { %2633 = vmatmul.mubr.bf16.gmra.mrb[12].mxu1 %v763_v25  ;;  %v652_v7 = vshll.u32 %v4942_v28, 16  ;;  %v650_v17 = vshrl.u32 %v4942_v28, 16  ;;  %v6432_v25 = vld [vmem:[#allocation5 + $0x138] sm:$0xff]   ;;  %5536 = vmatprep.subr.bf16.mxu0 %v6430_v21  ;;  %v648_v28 = vor.u32 %v646_v30, %v644_v53  ;;  %v357_v53 = vld [vmem:[%s7151_s29 + $0x6c] sm:$0x1]  ;;  %v1507_v21 = vunpack.c.l.b16 %v663_v8 }
 0x109   : > { %2640 = vmatprep.mubr.bf16.mxu1 %v5038_v26  ;;  %v5044_v26 = vcombine.low %v7240_v36, %v7244_v39  ;;  %5635 = vmatpush3.bf16.msra.mxu1 %v6425_v20  ;;  %v888_v36 = vshll.u32 %v7180_v45, 16  ;;  %v767_v39 = vrot.slane %v4956_v24, 1  ;;  %v7399_v58 = vcombine.low %v7378_v11, %v357_v53  ;;  %v7431_v8 = vld [vmem:[%s7151_s29 + $0x74] sm:$0xf]  ;;  %v4864_v45 = vld [vmem:[%s7151_s29 + $0x3c] sm:$0x1] }
 0x10a   : > { %v654_v18 = vrot.slane %v652_v7, 1  ;;  %5636 = vmatprep.subr.bf16.mxu1 %v6433_v52  ;;  %v5050_v7 = vcombine.low %v7343_v40, %v7346_v44  ;;  %v667_v24 = vshll.u32 %v7373_v23, 16  ;;  %v901_v30 = vshrl.u32 %v7358_v61, 16 }
 0x10b   : > { %5537 = vmatpush3.bf16.msra.mxu0 %v6432_v25  ;;  %v769_v3 = vsel %vm9344_vm1, %v767_v39, %v768_v38  ;;  %v7403_v25 = vld [vmem:[%s7151_s29 + $0x78] sm:$0xf] }
 0x10c   : > { %v655_v32 = vor.u32 %v654_v18, %v650_v17  ;;  %v7392_v17 = vld [vmem:[%s7151_s29 + $0x64] sm:$0xf]  ;;  %v772_v18 = vsel %vm9344_vm1, %v770_v59, %v771_v5  ;;  %v669_v2 = vrot.slane %v667_v24, 1 }
 0x10d   : > { %5637 = vmatpush3.bf16.msra.mxu1 %v6434_v60  ;;  %v5049_v39 = vcombine.low %v768_v38, %v772_v18  ;;  %v5057_v52 = vcombine.low %v7392_v17, %v7396_v19  ;;  %v4872_v60 = vld [vmem:[%s7151_s29 + $0x10] sm:$0xe] }
 0x10e   : > { %2488 = vmatmul.mubr.bf16.gmra.mrb[16].mxu0 %v5035_v62  ;;  %v7362_v62 = vcombine.low %v7272_v16, %v7300_v46 }
 0x10f   : > { %2495 = vmatprep.mubr.bf16.mxu0 %v1776_v0  ;;  %v6435_v0 = vld [vmem:[#allocation5 + $0x1e8] sm:$0xff]  }
 0x110   : > { %2641 = vmatmul.mubr.bf16.gmra.mrb[16].mxu1 %v5037_v63  ;;  %v660_v63 = vsel %vm9343_vm0, %v655_v32, %v659_v34  ;;  %5638 = vmatprep.subr.bf16.mxu1 %v6435_v0  ;;  %v933_v10 = vshll.u32 %v7362_v62, 16  ;;  %v367_v32 = vld [vmem:[%s7151_s29 + $0x60] sm:$0xe]  ;;  %v931_v34 = vshrl.u32 %v7362_v62, 16  ;;  %v665_v0 = vshrl.u32 %v7373_v23, 16 }
 0x111   : > { %2648 = vmatprep.mubr.bf16.mxu1 %v5045_v1  ;;  %v7365_v1 = vrot.slane %v888_v36, 1  ;;  %v5048_v16 = vcombine.low %v648_v28, %v660_v63  ;;  %v1501_v20 = vunpack.c.h.b16 %v660_v63  ;;  %v5047_v36 = vcombine.low %v7286_v33, %v7293_v41  ;;  %5639 = vmatpush3.bf16.msra.mxu1 %v6436_v47  ;;  %v6440_v33 = vld [vmem:[#allocation5 + $0x1f0] sm:$0xff]  }
 0x112   : > { %v672_v28 = vshll.u32 %v7399_v58, 16  ;;  %v7424_v63 = vrot.slane %v933_v10, 1  ;;  %v4850_v41 = vld [vmem:[%s7151_s29 + $0x70] sm:$0xf]  ;;  %v4958_v38 = vcombine.low %v367_v32, %v7351_v49  ;;  %5640 = vmatprep.subr.bf16.mxu1 %v6440_v33  ;;  %v4982_v49 = vcombine.low %v4872_v60, %v7177_v43  ;;  %v4863_v32 = vld [vmem:[%s7151_s29 + $0x2c] sm:$0x1] }
 0x113   : > { %v1800_v48 = vpack.c.b16 %v1507_v21, %v1501_v20  ;;  %v670_v20 = vor.u32 %v669_v2, %v665_v0  ;;  %v7440_v47 = vcombine.low %v4850_v41, %v7431_v8  ;;  %v1066_v2 = vrot.slane %v7382_v6, 1  ;;  %v6443_v33 = vld [vmem:[#allocation5 + $0x1b8] sm:$0xff]  }
 0x114   : > { %v674_v10 = vrot.slane %v672_v28, 1  ;;  %v1065_v0 = vrot.slane %v4982_v49, 1 }
 0x115   : > { %5641 = vmatpush3.bf16.msra.mxu1 %v6441_v35  ;;  %9373 = vst [vmem:[#allocation21_spill] sm:$0xff] %v7440_v47 }
 0x116   : > { %2496 = vmatmul.mubr.bf16.gmra.mrb[20].mxu0 %v5044_v26  ;;  %v4946_v26 = vcombine.low %v7385_v54, %v7388_v13  ;;  %v675_v28 = vsel %vm9343_vm0, %v670_v20, %v674_v10 }
 0x117   : > { %2503 = vmatprep.mubr.bf16.mxu0 %v645_v22 }
 0x118   : > { %2649 = vmatmul.mubr.bf16.gmra.mrb[20].mxu1 %v1777_v27  ;;  %v893_v27 = vshll.u32 %v7382_v6, 16  ;;  %v680_v21 = vshrl.u32 %v4946_v26, 16 }
 0x119   : > { %2656 = vmatprep.mubr.bf16.mxu1 %v7335_v29 }
 0x11a   : > { %v895_v41 = vrot.slane %v893_v27, 1  ;;  %v7470_v27 = vld [vmem:[%s7151_s29 + $0x84] sm:$0xf] }
 0x11e   : > { %2504 = vmatmul.mubr.bf16.gmra.mrb[24].mxu0 %v7290_v37  ;;  %v358_v37 = vld [vmem:[%s7151_s29 + $0x7c] sm:$0x1] }
 0x11f   : > { %2511 = vmatprep.mubr.bf16.mxu0 %v5048_v16  ;;  %v7421_v55 = vcombine.low %v7403_v25, %v358_v37  ;;  %v1502_v16 = vunpack.c.h.b16 %v772_v18  ;;  %v368_v37 = vld [vmem:[%s7151_s29 + $0x70] sm:$0xe]  ;;  %v6442_v18 = vld [vmem:[#allocation5 + $0x1f8] sm:$0xff]  }
 0x120   : > { %2657 = vmatmul.mubr.bf16.gmra.mrb[24].mxu1 %v769_v3  ;;  %v682_v3 = vshll.u32 %v4946_v26, 16  ;;  %v676_v26 = vshrl.u32 %v7399_v58, 16  ;;  %5642 = vmatprep.subr.bf16.mxu1 %v6442_v18  ;;  %v897_v18 = vshrl.u32 %v7382_v6, 16 }
 0x121   : > { %2664 = vmatprep.mubr.bf16.mxu1 %v5050_v7  ;;  %v1508_v7 = vunpack.c.l.b16 %v771_v5  ;;  %v687_v53 = vshll.u32 %v7421_v55, 16  ;;  %v5056_v5 = vcombine.low %v7296_v42, %v7313_v57  ;;  %v691_v43 = vshrl.u32 %v7421_v55, 16  ;;  %5643 = vmatpush3.bf16.msra.mxu1 %v6443_v33  ;;  %v4856_v33 = vld [vmem:[%s7151_s29 + $0x90] sm:$0xf] }
 0x122   : > { %v684_v24 = vrot.slane %v682_v3, 1  ;;  %v891_v42 = vor.u32 %v7365_v1, %v886_v50  ;;  %v4959_v57 = vcombine.low %v368_v37, %v7388_v13  ;;  %v7452_v3 = vcombine.low %v7215_v15, %v4863_v32  ;;  %v7460_v1 = vld [vmem:[%s7151_s29 + $0x78] sm:$0xf]  ;;  %v4873_v32 = vld [vmem:[%s7151_s29 + $0x20] sm:$0xe] }
 0x123   : > { %v678_v50 = vor.u32 %v676_v26, %v674_v10  ;;  %v7465_v15 = vsel %vm9344_vm1, %v1065_v0, %v1066_v2  ;;  %v9319_v10 = vmov 0.0   ;;  %v7500_v6 = vor.u32 %v897_v18, %v895_v41 }
 0x124   : > { %v685_v60 = vor.u32 %v684_v24, %v680_v21  ;;  %v7473_v20 = vsel %vm9343_vm0, %v891_v42, %v895_v41  ;;  %6029 = vmatprep.subr.bf16.mxu0 %v9319_v10  ;;  %v906_v21 = vor.u32 %v7410_v31, %v901_v30  ;;  %v7481_v24 = vcombine.low %v7346_v44, %v7392_v17  ;;  %v4865_v31 = vld [vmem:[%s7151_s29 + $0x4c] sm:$0x1]  ;;  %v7511_v42 = vld [vmem:[%s7151_s29 + $0x94] sm:$0xf] }
 0x125   : > { %v776_v49 = vrot.slane %v4959_v57, 1  ;;  %v9321_v61 = vrot.slane %v7452_v3, 1  ;;  %v908_v30 = vshll.u32 %v7452_v3, 16 }
 0x126   : > { %2512 = vmatmul.mubr.bf16.gmra.mrb[28].mxu0 %v5047_v36  ;;  %v773_v36 = vrot.slane %v4958_v38, 1  ;;  %v7455_v38 = vld [vmem:[%s7151_s29 + $0x30] sm:$0xe] }
 0x127   : > { %2519 = vmatprep.mubr.bf16.mxu0 %v1800_v48  ;;  %v774_v48 = vrot.slane %v7399_v58, 1  ;;  %v910_v0 = vrot.slane %v908_v30, 1  ;;  %v360_v30 = vld [vmem:[%s7151_s29 + $0x9c] sm:$0x1]  ;;  %v4875_v58 = vld [vmem:[%s7151_s29 + $0x40] sm:$0xe] }
 0x128   : > { %2665 = vmatmul.mubr.bf16.gmra.mrb[28].mxu1 %v5049_v39  ;;  %v1801_v39 = vpack.c.b16 %v1508_v7, %v1502_v16  ;;  %v4853_v16 = vld [vmem:[%s7151_s29 + $0x80] sm:$0xf]  ;;  %v777_v7 = vrot.slane %v7421_v55, 1 }
 0x129   : > { %2672 = vmatprep.mubr.bf16.mxu1 %v5057_v52  ;;  %v689_v52 = vrot.slane %v687_v53, 1  ;;  %v345_v53 = vld [vmem:[%s7151_s29 + $0x80] sm:$0xf]  ;;  %v775_v37 = vsel %vm9344_vm1, %v773_v36, %v774_v48  ;;  %v5062_v26 = vcombine.low %v7460_v1, %v4853_v16  ;;  %v359_v36 = vld [vmem:[%s7151_s29 + $0x8c] sm:$0x1] }
 0x12b   : > { %v690_v35 = vsel %vm9343_vm0, %v685_v60, %v689_v52  ;;  %v7498_v60 = vcombine.low %v345_v53, %v7470_v27  ;;  %v912_v53 = vshrl.u32 %v7452_v3, 16 }
 0x12c   : > { %v5060_v44 = vcombine.low %v678_v50, %v690_v35  ;;  %v7517_v50 = vsel %vm9344_vm1, %v776_v49, %v777_v7  ;;  %v1537_v41 = vunpack.c.h.b16 %v690_v35  ;;  %v7536_v49 = vsel %vm9343_vm0, %v906_v21, %v910_v0  ;;  %v7551_v21 = vld [vmem:[%s7151_s29 + $0x98] sm:$0xf] }
 0x12e   : > { %2520 = vmatmul.mubr.bf16.gmra.mrb[32].mxu0 %v5056_v5  ;;  %v693_v5 = vor.u32 %v691_v43, %v689_v52  ;;  %v7505_v52 = vcombine.low %v7269_v14, %v4864_v45  ;;  %v7508_v43 = vld [vmem:[%s7151_s29 + $0x90] sm:$0xf] }
 0x12f   : > { %2527 = vmatprep.mubr.bf16.mxu0 %v675_v28  ;;  %v7494_v28 = vld [vmem:[%s7151_s29 + $0x88] sm:$0xf] }
 0x130   : > { %2673 = vmatmul.mubr.bf16.gmra.mrb[32].mxu1 %v1801_v39  ;;  %v4983_v39 = vcombine.low %v4873_v32, %v7212_v9  ;;  %v4984_v9 = vcombine.low %v7455_v38, %v7255_v56  ;;  %v7522_v56 = vld [vmem:[%s7151_s29 + $0x84] sm:$0xf]  ;;  %v1543_v14 = vunpack.c.l.b16 %v693_v5  ;;  %v7525_v38 = vld [vmem:[%s7151_s29 + $0x88] sm:$0xf]  ;;  %v7528_v45 = vcombine.low %v7494_v28, %v359_v36  ;;  %v7557_v36 = vld [vmem:[%s7151_s29 + $0x50] sm:$0xe] }
 0x131   : > { %2680 = vmatprep.mubr.bf16.mxu1 %v7440_v47  ;;  %v7546_v5 = vcombine.low %v7307_v51, %v4865_v31  ;;  %v5061_v51 = vcombine.low %v774_v48, %v7517_v50  ;;  %v1072_v10 = vrot.slane %v7505_v52, 1 }
 0x132   : > { %v1068_v57 = vrot.slane %v4983_v39, 1  ;;  %v5059_v39 = vcombine.low %v7378_v11, %v7385_v54  ;;  %v5069_v11 = vcombine.low %v7522_v56, %v7525_v38  ;;  %v1431_v54 = vunpack.c.h.b16 %v7536_v49 }
 0x133   : > { %9374 = vst [vmem:[#allocation22_spill] sm:$0xff] %v7546_v5  ;;  %v1824_v31 = vpack.c.b16 %v1543_v14, %v1537_v41  ;;  %v1071_v59 = vrot.slane %v4984_v9, 1  ;;  %v923_v41 = vshll.u32 %v7505_v52, 16 }
 0x134   : > { %v7533_v35 = vsel %vm9344_vm1, %v1068_v57, %v9321_v61  ;;  %v702_v57 = vshll.u32 %v7528_v45, 16 }
 0x135   : > { %v7541_v32 = vcombine.low %v1066_v2, %v7533_v35  ;;  %v7560_v2 = vcombine.low %v4853_v16, %v7522_v56  ;;  %v7571_v16 = vcombine.low %v7551_v21, %v360_v30  ;;  %v7586_v30 = vsel %vm9344_vm1, %v1071_v59, %v1072_v10 }
 0x136   : > { %2528 = vmatmul.mubr.bf16.gmra.mrb[36].mxu0 %v7373_v23  ;;  %v963_v23 = vshll.u32 %v7481_v24, 16  ;;  %v7600_v55 = vrot.slane %v923_v41, 1 }
 0x137   : > { %2535 = vmatprep.mubr.bf16.mxu0 %v5060_v44  ;;  %v4950_v44 = vcombine.low %v7508_v43, %v7511_v42  ;;  %v993_v14 = vshll.u32 %v7560_v2, 16 }
 0x138   : > { %2681 = vmatmul.mubr.bf16.gmra.mrb[36].mxu1 %v775_v37  ;;  %v697_v37 = vshll.u32 %v7498_v60, 16  ;;  %v7580_v9 = vrot.slane %v963_v23, 1  ;;  %v704_v23 = vrot.slane %v702_v57, 1  ;;  %9375 = vst [vmem:[#allocation23_spill] sm:$0xff] %v7600_v55 }
 0x139   : > { %2688 = vmatprep.mubr.bf16.mxu1 %v5062_v26  ;;  %v914_v26 = vor.u32 %v912_v53, %v910_v0  ;;  %v695_v0 = vshrl.u32 %v7498_v60, 16  ;;  %v712_v61 = vshll.u32 %v4950_v44, 16  ;;  %v710_v59 = vshrl.u32 %v4950_v44, 16 }
 0x13a   : > { %v699_v53 = vrot.slane %v697_v37, 1  ;;  %v5068_v37 = vcombine.low %v7388_v13, %v7403_v25  ;;  %v7594_v13 = vld [vmem:[%s7151_s29 + $0x94] sm:$0xf]  ;;  %v369_v25 = vld [vmem:[%s7151_s29 + $0x80] sm:$0xe]  ;;  %v7605_v57 = vrot.slane %v993_v14, 1  ;;  %v936_v44 = vor.u32 %v7424_v63, %v931_v34 }
 0x13b   : > { %v1437_v18 = vunpack.c.l.b16 %v914_v26  ;;  %v714_v26 = vrot.slane %v712_v61, 1  ;;  %v7612_v61 = vcombine.low %v4856_v33, %v7594_v13  ;;  %v7620_v14 = vld [vmem:[%s7151_s29 + $0x70] sm:$0xe]  ;;  %v706_v34 = vshrl.u32 %v7528_v45, 16 }
 0x13c   : > { %v700_v48 = vor.u32 %v699_v53, %v695_v0 }
 0x13d   : > { %v7577_v22 = vpack.c.b16 %v1437_v18, %v1431_v54  ;;  %v1538_v18 = vunpack.c.h.b16 %v7517_v50  ;;  %v1544_v54 = vunpack.c.l.b16 %v777_v7  ;;  %v4866_v50 = vld [vmem:[%s7151_s29 + $0x5c] sm:$0x1]  ;;  %v9324_v7 = vrot.slane %v7546_v5, 1  ;;  %9376 = vst [vmem:[#allocation24_spill] sm:$0xff] %v7612_v61 }
 0x13e   : > { %2536 = vmatmul.mubr.bf16.gmra.mrb[40].mxu0 %v5059_v39  ;;  %v717_v39 = vshll.u32 %v7571_v16, 16  ;;  %v7636_v62 = vcombine.low %v7343_v40, %v4866_v50  ;;  %v4882_v40 = vld [vmem:[%s7151_s29 + $0x20] sm:$0xf]  ;;  %v7657_v50 = vld [vmem:[%s7151_s29 + $0x98] sm:$0xf] }
 0x13f   : > { %2543 = vmatprep.mubr.bf16.mxu0 %v1824_v31  ;;  %v927_v31 = vshrl.u32 %v7505_v52, 16  ;;  %v1825_v53 = vpack.c.b16 %v1544_v54, %v1538_v18  ;;  %v370_v52 = vld [vmem:[%s7151_s29 + $0x90] sm:$0xe]  ;;  %v4868_v18 = vld [vmem:[%s7151_s29 + $0x7c] sm:$0x1]  ;;  %v715_v54 = vor.u32 %v714_v26, %v710_v59  ;;  %v942_v59 = vshrl.u32 %v7546_v5, 16 }
 0x140   : > { %2689 = vmatmul.mubr.bf16.gmra.mrb[40].mxu1 %v5061_v51  ;;  %v4985_v51 = vcombine.low %v4875_v58, %v7300_v46  ;;  %v938_v46 = vshll.u32 %v7546_v5, 16  ;;  %v4960_v58 = vcombine.low %v369_v25, %v7470_v27  ;;  %v705_v27 = vsel %vm9343_vm0, %v700_v48, %v704_v23  ;;  %v4883_v26 = vld [vmem:[%s7151_s29 + $0x24] sm:$0xf] }
 0x141   : > { %2696 = vmatprep.mubr.bf16.mxu1 %v5069_v11  ;;  %v4867_v11 = vld [vmem:[%s7151_s29 + $0x6c] sm:$0x1]  ;;  %v7617_v41 = vor.u32 %v927_v31, %v7600_v55  ;;  %v719_v25 = vrot.slane %v717_v39, 1  ;;  %v708_v39 = vor.u32 %v706_v34, %v704_v23  ;;  %v9381_v23 = vcombine.low %v7557_v36, %v7328_v12  ;;  %v4877_v12 = vld [vmem:[%s7151_s29 + $0x60] sm:$0xe] }
 0x142   : > { %v1074_v0 = vrot.slane %v4985_v51, 1  ;;  %v940_v33 = vrot.slane %v938_v46, 1  ;;  %v4859_v51 = vld [vmem:[%s7151_s29 + $0xa0] sm:$0xf]  ;;  %v7639_v47 = vcombine.low %v7396_v19, %v4867_v11  ;;  %v4961_v46 = vcombine.low %v370_v52, %v7511_v42 }
 0x143   : > { %9377 = vst [vmem:[#allocation25_spill] sm:$0xff] %v7617_v41  ;;  %v1077_v34 = vrot.slane %v9381_v23, 1  ;;  %v7673_v19 = vcombine.low %v7460_v1, %v4868_v18  ;;  %v9382_v41 = vrot.slane %v7528_v45, 1  ;;  %v9383_v36 = vshrl.u32 %v7481_v24, 16  ;;  %v7692_v23 = vld [vmem:[%s7151_s29 + $0x34] sm:$0xf] }
 0x144   : > { %v7627_v63 = vsel %vm9344_vm1, %v1074_v0, %v9324_v7  ;;  %v7642_v0 = vld [vmem:[%s7151_s29 + $0xa4] sm:$0xf]  ;;  %v7646_v7 = vsel %vm9343_vm0, %v936_v44, %v940_v33  ;;  %v721_v44 = vshrl.u32 %v7571_v16, 16  ;;  %v944_v52 = vor.u32 %v942_v59, %v940_v33 }
 0x145   : > { %9378 = vst [vmem:[#allocation26_spill] sm:$0xff] %v7627_v63  ;;  %v7633_v31 = vcombine.low %v1072_v10, %v7627_v63  ;;  %9380 = vst [vmem:[#allocation28_spill] sm:$0xff] %v7646_v7  ;;  %v779_v10 = vrot.slane %v4960_v58, 1  ;;  %v7660_v11 = vcombine.low %v4859_v51, %v7642_v0  ;;  %v7666_v58 = vld [vmem:[%s7151_s29 + $0x28] sm:$0xf]  ;;  %v782_v48 = vrot.slane %v4961_v46, 1 }
 0x146   : > { %2544 = vmatmul.mubr.bf16.gmra.mrb[44].mxu0 %v5068_v37  ;;  %v4912_v37 = vld [vmem:[%s7151_s29 + $0x2c] sm:$0x1]  ;;  %v1473_v59 = vunpack.c.l.b16 %v944_v52  ;;  %v966_v1 = vor.u32 %v7580_v9, %v9383_v36  ;;  %v5074_v46 = vcombine.low %v7657_v50, %v4859_v51  ;;  %v7727_v51 = vld [vmem:[%s7151_s29 + $0xa8] sm:$0xf]  ;;  %v972_v55 = vshrl.u32 %v7639_v47, 16 }
 0x147   : > { %9379 = vst [vmem:[#allocation27_spill] sm:$0xff] %v7633_v31  ;;  %2551 = vmatprep.mubr.bf16.mxu0 %v705_v27  ;;  %v1467_v27 = vunpack.c.h.b16 %v7646_v7  ;;  %v781_v33 = vsel %vm9344_vm1, %v779_v10, %v9382_v41  ;;  %v953_v7 = vshll.u32 %v7636_v62, 16  ;;  %v5071_v10 = vcombine.low %v7494_v28, %v7508_v43  ;;  %v4913_v28 = vld [vmem:[%s7151_s29 + $0x3c] sm:$0x1]  ;;  %v7777_v31 = vld [vmem:[%s7151_s29 + $0x48] sm:$0xf] }
 0x148   : > { %2697 = vmatmul.mubr.bf16.gmra.mrb[44].mxu1 %v1825_v53  ;;  %v720_v53 = vsel %vm9343_vm0, %v715_v54, %v719_v25  ;;  %v1078_v54 = vrot.slane %v7636_v62, 1  ;;  %v1023_v52 = vshll.u32 %v7660_v11, 16  ;;  %v7701_v24 = vcombine.low %v7666_v58, %v4912_v37 }
 0x149   : > { %2704 = vmatprep.mubr.bf16.mxu1 %v7612_v61  ;;  %v7676_v61 = vcombine.low %v4882_v40, %v4883_v26  ;;  %v5072_v18 = vcombine.low %v708_v39, %v720_v53  ;;  %v723_v40 = vor.u32 %v721_v44, %v719_v25  ;;  %v7689_v26 = vld [vmem:[%s7151_s29 + $0x30] sm:$0xf]  ;;  %v7703_v9 = vpack.c.b16 %v1473_v59, %v1467_v27 }
 0x14a   : > { %v7695_v41 = vsel %vm9344_vm1, %v1077_v34, %v1078_v54  ;;  %v9386_v25 = vrot.slane %v7571_v16, 1  ;;  %v7713_v34 = vld [vmem:[%s7151_s29 + $0x38] sm:$0xf]  ;;  %v4987_v43 = vcombine.low %v4877_v12, %v7392_v17  ;;  %v7720_v37 = vcombine.low %v7689_v26, %v7692_v23 }
 0x14b   : > { %9384 = vst [vmem:[#allocation29_spill] sm:$0xff] %v7695_v41  ;;  %9385 = vst [vmem:[#allocation30_spill] sm:$0xff] %v7703_v9  ;;  %v1198_v44 = vshll.u32 %v7676_v61, 16  ;;  %v7722_v27 = vrot.slane %v953_v7, 1  ;;  %v957_v59 = vshrl.u32 %v7636_v62, 16  ;;  %v1573_v36 = vunpack.c.h.b16 %v720_v53 }
 0x14c   : > { %v7709_v39 = vsel %vm9344_vm1, %v782_v48, %v9386_v25  ;;  %v1579_v25 = vunpack.c.l.b16 %v723_v40  ;;  %v1080_v17 = vrot.slane %v4987_v43, 1  ;;  %v7731_v12 = vrot.slane %v1023_v52, 1 }
 0x14d   : > { %9387 = vst [vmem:[#allocation31_spill] sm:$0xff] %v7722_v27  ;;  %v1203_v7 = vshll.u32 %v7701_v24, 16  ;;  %v7735_v48 = vcombine.low %v7713_v34, %v4913_v28  ;;  %v7738_v62 = vor.u32 %v957_v59, %v7722_v27  ;;  %v1196_v53 = vshrl.u32 %v7676_v61, 16 }
 0x14e   : > { %2552 = vmatmul.mubr.bf16.gmra.mrb[48].mxu0 %v7498_v60  ;;  %v968_v60 = vshll.u32 %v7639_v47, 16  ;;  %v9391_v43 = vrot.slane %v7528_v45, 1  ;;  %v1200_v28 = vrot.slane %v1198_v44, 1  ;;  %v1213_v59 = vshll.u32 %v7720_v37, 16  ;;  %v7764_v45 = vld [vmem:[%s7151_s29 + $0x90] sm:$0xe] }
 0x14f   : > { %2559 = vmatprep.mubr.bf16.mxu0 %v5072_v18  ;;  %9388 = vst [vmem:[#allocation32_spill] sm:$0xff] %v7738_v62  ;;  %v1207_v18 = vshrl.u32 %v7701_v24, 16  ;;  %v1848_v9 = vpack.c.b16 %v1579_v25, %v1573_v36  ;;  %v5081_v5 = vcombine.low %v7642_v0, %v7727_v51  ;;  %v1205_v44 = vrot.slane %v1203_v7, 1  ;;  %v4870_v36 = vld [vmem:[%s7151_s29 + $0x9c] sm:$0x1] }
 0x150   : > { %2705 = vmatmul.mubr.bf16.gmra.mrb[48].mxu1 %v781_v33  ;;  %v4869_v33 = vld [vmem:[%s7151_s29 + $0x8c] sm:$0x1]  ;;  %v970_v52 = vrot.slane %v968_v60, 1  ;;  %v5073_v41 = vcombine.low %v9391_v43, %v7709_v39  ;;  %v1218_v43 = vshll.u32 %v7735_v48, 16  ;;  %v9393_v25 = vrot.slane %v7571_v16, 1 }
 0x151   : > { %2712 = vmatprep.mubr.bf16.mxu1 %v5074_v46  ;;  %v9389_v46 = vrot.slane %v7639_v47, 1  ;;  %v1574_v7 = vunpack.c.h.b16 %v7709_v39  ;;  %v1201_v63 = vor.u32 %v1200_v28, %v1196_v53  ;;  %v1084_v16 = vrot.slane %v7673_v19, 1  ;;  %v4879_v53 = vld [vmem:[%s7151_s29 + $0x80] sm:$0xe] }
 0x152   : > { %v7761_v60 = vsel %vm9343_vm0, %v966_v1, %v970_v52  ;;  %v4914_v1 = vld [vmem:[%s7151_s29 + $0x4c] sm:$0x1]  ;;  %v1220_v62 = vrot.slane %v1218_v43, 1 }
 0x153   : > { %v7745_v40 = vsel %vm9344_vm1, %v1080_v17, %v9389_v46  ;;  %v4888_v17 = vld [vmem:[%s7151_s29 + $0x40] sm:$0xf]  ;;  %v7758_v46 = vld [vmem:[%s7151_s29 + $0x44] sm:$0xf]  ;;  %v7810_v43 = vcombine.low %v7777_v31, %v4914_v1  ;;  %v987_v1 = vshrl.u32 %v7673_v19, 16 }
 0x154   : > { %9390 = vst [vmem:[#allocation33_spill] sm:$0xff] %v7745_v40  ;;  %v7752_v27 = vcombine.low %v1078_v54, %v7745_v40  ;;  %v7770_v54 = vcombine.low %v7525_v38, %v4869_v33  ;;  %v1211_v40 = vshrl.u32 %v7720_v37, 16  ;;  %v9394_v38 = vcombine.low %v7620_v14, %v7431_v8 }
 0x155   : > { %v1215_v37 = vrot.slane %v1213_v59, 1  ;;  %v7789_v39 = vcombine.low %v4888_v17, %v7758_v46  ;;  %v983_v14 = vshll.u32 %v7673_v19, 16  ;;  %v7807_v59 = vcombine.low %v7657_v50, %v4870_v36 }
 0x156   : > { %9392 = vst [vmem:[#allocation34_spill] sm:$0xff] %v7752_v27  ;;  %v1580_v27 = vunpack.c.l.b16 %v9393_v25  ;;  %2560 = vmatmul.mubr.bf16.gmra.mrb[52].mxu0 %v5071_v10  ;;  %v1083_v33 = vrot.slane %v9394_v38, 1  ;;  %v1222_v25 = vshrl.u32 %v7735_v48, 16  ;;  %v974_v10 = vor.u32 %v972_v55, %v970_v52  ;;  %v7801_v55 = vld [vmem:[%s7151_s29 + $0x50] sm:$0xf] }
 0x157   : > { %2567 = vmatprep.mubr.bf16.mxu0 %v1848_v9  ;;  %v5080_v9 = vcombine.low %v7511_v42, %v7551_v21  ;;  %v7804_v52 = vld [vmem:[%s7151_s29 + $0x54] sm:$0xf]  ;;  %v7813_v38 = vld [vmem:[%s7151_s29 + $0x58] sm:$0xf]  ;;  %v1206_v42 = vsel %vm9343_vm0, %v1201_v63, %v1205_v44  ;;  %v1216_v21 = vor.u32 %v1215_v37, %v1211_v40  ;;  %v1228_v50 = vshll.u32 %v7789_v39, 16 }
 0x158   : > { %2713 = vmatmul.mubr.bf16.gmra.mrb[52].mxu1 %v5073_v41  ;;  %v1503_v41 = vunpack.c.h.b16 %v7761_v60  ;;  %v7792_v8 = vsel %vm9344_vm1, %v1083_v33, %v1084_v16  ;;  %v1509_v28 = vunpack.c.l.b16 %v974_v10  ;;  %v1849_v17 = vpack.c.b16 %v1580_v27, %v1574_v7 }
 0x159   : > { %2720 = vmatprep.mubr.bf16.mxu1 %v5081_v5  ;;  %9395 = vst [vmem:[#allocation35_spill] sm:$0xff] %v7792_v8  ;;  %v4990_v5 = vcombine.low %v7764_v45, %v7594_v13  ;;  %v9396_v33 = vshrl.u32 %v7560_v2, 16  ;;  %v4915_v45 = vld [vmem:[%s7151_s29 + $0x5c] sm:$0x1]  ;;  %v4989_v10 = vcombine.low %v4879_v53, %v7522_v56  ;;  %v7824_v27 = vrot.slane %v983_v14, 1 }
 0x15a   : > { %v7820_v8 = vpack.c.b16 %v1509_v28, %v1503_v41  ;;  %v9335_v36 = vrot.slane %v7770_v54, 1  ;;  %v1209_v7 = vor.u32 %v1207_v18, %v1205_v44  ;;  %v998_v63 = vshll.u32 %v7770_v54, 16 }
 0x15b   : > { %v996_v13 = vor.u32 %v7605_v57, %v9396_v33  ;;  %9397 = vst [vmem:[#allocation36_spill] sm:$0xff] %v7824_v27  ;;  %v1086_v57 = vrot.slane %v4989_v10, 1  ;;  %v9398_v56 = vshll.u32 %v7261_v4, 16  ;;  %v1233_v37 = vshll.u32 %v7810_v43, 16  ;;  %v7857_v33 = vld [vmem:[%s7151_s29 + $0x64] sm:$0xf] }
 0x15c   : > { %v7837_v19 = vcombine.low %v7801_v55, %v7804_v52  ;;  %v7840_v18 = vor.u32 %v987_v1, %v7824_v27  ;;  %v1224_v44 = vor.u32 %v1222_v25, %v1220_v62  ;;  %v7844_v41 = vcombine.low %v7813_v38, %v4915_v45  ;;  %v6446_v45 = vld [vmem:[#allocation5 + $0x200] sm:$0xff]  }
 0x15d   : > { %v7832_v40 = vrot.slane %v9398_v56, 1  ;;  %v7849_v14 = vsel %vm9344_vm1, %v1086_v57, %v9335_v36  ;;  %v1000_v53 = vrot.slane %v998_v63, 1  ;;  %v9403_v1 = vrot.slane %v7452_v3, 1  ;;  %v4916_v36 = vld [vmem:[%s7151_s29 + $0x6c] sm:$0x1] }
 0x15e   : > { %2568 = vmatmul.mubr.bf16.gmra.mrb[56].mxu0 %v5080_v9  ;;  %9399 = vst [vmem:[#allocation37_spill] sm:$0xff] %v7840_v18  ;;  %9400 = vst [vmem:[#allocation38_spill] sm:$0xff] %v7849_v14  ;;  %v1221_v9 = vsel %vm9343_vm0, %v1216_v21, %v1220_v62  ;;  %v7860_v25 = vcombine.low %v1084_v16, %v7849_v14  ;;  %v7868_v21 = vrot.slane %v1233_v37, 1  ;;  %v1432_v16 = vunpack.c.h.b16 %v7533_v35  ;;  %v7888_v35 = vld [vmem:[%s7151_s29 + $0x74] sm:$0xf] }
 0x15f   : > { %2761 = vmatprep.mubr.bf16.mxu0 %v7465_v15  ;;  %v4894_v15 = vld [vmem:[%s7151_s29 + $0x60] sm:$0xf]  ;;  %v7864_v10 = vsel %vm9343_vm0, %v996_v13, %v1000_v53  ;;  %v1438_v62 = vunpack.c.l.b16 %v9403_v1  ;;  %v5030_v63 = vcombine.low %v1209_v7, %v1221_v9  ;;  %v1248_v56 = vshll.u32 %v7844_v41, 16  ;;  %v7876_v13 = vld [vmem:[%s7151_s29 + $0x68] sm:$0xf] }
 0x160   : > { %2721 = vmatmul.mubr.bf16.gmra.mrb[56].mxu1 %v1849_v17  ;;  %v7853_v17 = vrot.slane %v1228_v50, 1  ;;  %9401 = vst [vmem:[#allocation39_spill] sm:$0xff] %v7860_v25  ;;  %9402 = vst [vmem:[#allocation40_spill] sm:$0xff] %v7864_v10  ;;  %v1243_v50 = vshll.u32 %v7837_v19, 16  ;;  %v1002_v3 = vshrl.u32 %v7770_v54, 16  ;;  %v1433_v1 = vunpack.c.h.b16 %v1221_v9  ;;  %v6451_v25 = vld [vmem:[#allocation5 + $0x208] sm:$0xff]  }
 0x161   : > { %2914 = vmatprep.mubr.bf16.mxu1 %v1206_v42  ;;  %v4871_v42 = vld [vmem:[%s7151_s29 + $0xac] sm:$0x1]  ;;  %v1439_v37 = vunpack.c.l.b16 %v1224_v44  ;;  %v1089_v2 = vrot.slane %v4990_v5, 1  ;;  %v1090_v28 = vrot.slane %v7807_v59, 1  ;;  %v7882_v14 = vcombine.low %v4894_v15, %v7857_v33  ;;  %v7885_v7 = vld [vmem:[%s7151_s29 + $0x70] sm:$0xf] }
 0x162   : > { %v1004_v57 = vor.u32 %v1002_v3, %v1000_v53  ;;  %v1539_v18 = vunpack.c.h.b16 %v7864_v10  ;;  %v4881_v27 = vld [vmem:[%s7151_s29 + $0xa0] sm:$0xe]  ;;  %v7893_v9 = vcombine.low %v7727_v51, %v4871_v42  ;;  %v1013_v15 = vshll.u32 %v7807_v59, 16  ;;  %v7906_v51 = vld [vmem:[%s7151_s29 + $0x78] sm:$0xf] }
 0x163   : > { %v7899_v44 = vsel %vm9344_vm1, %v1089_v2, %v1090_v28  ;;  %v5029_v53 = vcombine.low %v7666_v58, %v7689_v26  ;;  %v1756_v3 = vpack.c.b16 %v1438_v62, %v1432_v16  ;;  %v4917_v42 = vld [vmem:[%s7151_s29 + $0x7c] sm:$0x1]  ;;  %v1758_v5 = vpack.c.b16 %v1439_v37, %v1433_v1 }
 0x164   : > { %9404 = vst [vmem:[#allocation41_spill] sm:$0xff] %v7899_v44  ;;  %v1241_v2 = vshrl.u32 %v7837_v19, 16  ;;  %v1245_v44 = vrot.slane %v1243_v50, 1  ;;  %v7912_v10 = vcombine.low %v7876_v13, %v4916_v36  ;;  %v4991_v26 = vcombine.low %v4881_v27, %v7642_v0  ;;  %v6456_v36 = vld [vmem:[#allocation5 + $0x210] sm:$0xff]  }
 0x165   : > { %v7922_v62 = vcombine.low %v7885_v7, %v7888_v35  ;;  %v9340_v19 = vrot.slane %v7893_v9, 1  ;;  %v1017_v50 = vshrl.u32 %v7807_v59, 16  ;;  %v1028_v0 = vshll.u32 %v7893_v9, 16 }
 0x166   : > { %2762 = vmatmul.mubr.bf16.vlgmr.msra.gmra.mrb[60].mxu0 %v7473_v20  ;;  %v1545_v20 = vunpack.c.l.b16 %v1004_v57  ;;  %v7924_v57 = vrot.slane %v1013_v15, 1  ;;  %v1092_v16 = vrot.slane %v4991_v26, 1  ;;  %v1263_v1 = vshll.u32 %v7912_v10, 16 }
 0x167   : > { %6030 = vmatpush3.bf16.msra.mxu0 %v6446_v45  ;;  %2769 = vmatprep.mubr.bf16.mxu0 %v7541_v32  ;;  %v7914_v45 = vrot.slane %v1248_v56, 1  ;;  %v1258_v32 = vshll.u32 %v7882_v14, 16  ;;  %v7937_v37 = vcombine.low %v7906_v51, %v4917_v42  ;;  %v6461_v42 = vld [vmem:[#allocation5 + $0x218] sm:$0xff]   ;;  %v1246_v27 = vor.u32 %v1245_v44, %v1241_v2 }
 0x168   : > { %2915 = vmatmul.mubr.bf16.vlgmr.msra.gmra.mrb[60].mxu1 %v7676_v61  ;;  %v9405_v61 = vmov 0.0   ;;  %v7917_v58 = vpack.c.b16 %v1545_v20, %v1539_v18  ;;  %v9406_v18 = vshrl.u32 %v7660_v11, 16  ;;  %v7940_v59 = vor.u32 %v1017_v50, %v7924_v57 }
 0x169   : > { %2922 = vmatprep.mubr.bf16.mxu1 %v5030_v63  ;;  %6031 = vmatprep.subr.bf16.mxu0 %v9405_v61  ;;  %v1252_v63 = vshrl.u32 %v7844_v41, 16  ;;  %v7949_v11 = vsel %vm9344_vm1, %v1092_v16, %v9340_v19  ;;  %v9408_v20 = vcombine.low %v7500_v6, %v7536_v49  ;;  %v7955_v50 = vrot.slane %v1258_v32, 1  ;;  %v4924_v19 = vld [vmem:[%s7151_s29 + $0x40] sm:$0xe] }
 0x16a   : > { %v1026_v56 = vor.u32 %v7731_v12, %v9406_v18  ;;  %v1030_v12 = vrot.slane %v1028_v0, 1  ;;  %v1273_v18 = vshll.u32 %v7922_v62, 16  ;;  %v9409_v16 = vshrl.u32 %v7789_v39, 16 }
 0x16b   : > { %6032 = vmatpush3.bf16.msra.mxu0 %v6451_v25  ;;  %v9407_v25 = vshll.u32 %v7335_v29, 16  ;;  %v7967_v49 = vrot.slane %v1263_v1, 1  ;;  %v6468_v1 = vld [vmem:[#allocation5 + $0x220] sm:$0xff]   ;;  %v9411_v44 = vshrl.u32 %v7810_v43, 16 }
 0x16c   : > { %6033 = vmatprep.subr.bf16.mxu0 %v9405_v61  ;;  %v1231_v0 = vor.u32 %v7853_v17, %v9409_v16  ;;  %v7965_v6 = vsel %vm9343_vm0, %v1026_v56, %v1030_v12  ;;  %v5034_v17 = vcombine.low %v7692_v23, %v7713_v34  ;;  %v1379_v34 = vrot.slane %v7735_v48, 1  ;;  %v4925_v48 = vld [vmem:[%s7151_s29 + $0x50] sm:$0xe] }
 0x16d   : > { %v7944_v15 = vrot.slane %v9407_v25, 1  ;;  %v7959_v25 = vcombine.low %v1090_v28, %v7949_v11  ;;  %v4923_v28 = vld [vmem:[%s7151_s29 + $0x30] sm:$0xe]  ;;  %v1575_v32 = vunpack.c.h.b16 %v7965_v6  ;;  %v1239_v2 = vor.u32 %v9411_v44, %v7868_v21 }
 0x16e   : > { %2770 = vmatmul.mubr.bf16.gmra.mrb[64].mxu0 %v9408_v20  ;;  %v1236_v20 = vsel %vm9343_vm0, %v1231_v0, %v7868_v21  ;;  %v5013_v26 = vcombine.low %v4923_v28, %v7692_v23  ;;  %v5014_v23 = vcombine.low %v4924_v19, %v7758_v46  ;;  %v5015_v28 = vcombine.low %v4925_v48, %v7804_v52 }
 0x16f   : > { %2777 = vmatprep.mubr.bf16.mxu0 %v1756_v3  ;;  %6034 = vmatpush3.bf16.msra.mxu0 %v6456_v36  ;;  %v1032_v3 = vshrl.u32 %v7893_v9, 16  ;;  %v7979_v36 = vrot.slane %v1273_v18, 1  ;;  %v9410_v18 = vshrl.u32 %v7261_v4, 16  ;;  %v6472_v4 = vld [vmem:[#allocation5 + $0x228] sm:$0xff]   ;;  %v1251_v21 = vsel %vm9343_vm0, %v1246_v27, %v7914_v45  ;;  %v6478_v27 = vld [vmem:[#allocation5 + $0x230] sm:$0xff]  }
 0x170   : > { %2923 = vmatmul.mubr.bf16.gmra.mrb[64].mxu1 %v5029_v53  ;;  %v1278_v53 = vshll.u32 %v7937_v37, 16  ;;  %6035 = vmatprep.subr.bf16.mxu0 %v9405_v61  ;;  %v1381_v19 = vrot.slane %v5014_v23, 1  ;;  %v1469_v48 = vunpack.c.h.b16 %v1251_v21 }
 0x171   : > { %2930 = vmatprep.mubr.bf16.mxu1 %v1758_v5  ;;  %v1034_v16 = vor.u32 %v1032_v3, %v1030_v12  ;;  %v921_v56 = vor.u32 %v7832_v40, %v9410_v18  ;;  %v1376_v12 = vrot.slane %v7701_v24, 1  ;;  %v1384_v3 = vrot.slane %v5015_v28, 1 }
 0x172   : > { %v7985_v5 = vrot.slane %v1278_v53, 1  ;;  %v1440_v53 = vunpack.c.l.b16 %v1379_v34 }
 0x173   : > { %6036 = vmatpush3.bf16.msra.mxu0 %v6461_v42  ;;  %v1581_v0 = vunpack.c.l.b16 %v1034_v16  ;;  %v1378_v42 = vrot.slane %v5013_v26, 1  ;;  %v1282_v26 = vshrl.u32 %v7937_v37, 16  ;;  %v5042_v16 = vcombine.low %v1239_v2, %v1251_v21  ;;  %v9414_v2 = vld [vmem:[#allocation26_spill] sm:$0xff] }
 0x174   : > { %6037 = vmatprep.subr.bf16.mxu0 %v9405_v61  ;;  %v1468_v23 = vunpack.c.h.b16 %v9414_v2  ;;  %v9420_v21 = vshrl.u32 %v7882_v14, 16 }
 0x175   : > { %v8001_v40 = vpack.c.b16 %v1581_v0, %v1575_v32  ;;  %v1380_v46 = vsel %vm9344_vm1, %v1378_v42, %v1379_v34  ;;  %v1254_v34 = vor.u32 %v1252_v63, %v7914_v45  ;;  %v9413_v42 = vld [vmem:[#allocation27_spill] sm:$0xff] }
 0x176   : > { %2778 = vmatmul.mubr.bf16.gmra.mrb[68].mxu0 %v7577_v22  ;;  %v1382_v22 = vrot.slane %v7810_v43, 1  ;;  %v1434_v32 = vunpack.c.h.b16 %v1380_v46  ;;  %v1385_v43 = vrot.slane %v7844_v41, 1  ;;  %v9415_v41 = vld [vmem:[#allocation22_spill] sm:$0xff] }
 0x177   : > { %2785 = vmatprep.mubr.bf16.mxu0 %v7586_v30  ;;  %6038 = vmatpush3.bf16.msra.mxu0 %v6468_v1  ;;  %v8012_v30 = vcombine.low %v1376_v12, %v1380_v46  ;;  %v9416_v45 = vrot.slane %v9415_v41, 1 }
 0x178   : > { %2931 = vmatmul.mubr.bf16.gmra.mrb[68].mxu1 %v5034_v17  ;;  %6039 = vmatprep.subr.bf16.mxu0 %v9405_v61  ;;  %v9412_v17 = vld [vmem:[#allocation23_spill] sm:$0xff]  ;;  %v8018_v1 = vsel %vm9344_vm1, %v1381_v19, %v1382_v22  ;;  %v8023_v18 = vpack.c.b16 %v1440_v53, %v1434_v32  ;;  %v1386_v0 = vsel %vm9344_vm1, %v1384_v3, %v1385_v43  ;;  %v1475_v53 = vunpack.c.l.b16 %v1254_v34  ;;  %v9417_v32 = vld [vmem:[#allocation25_spill] sm:$0xff]  ;;  %v9418_v3 = vld [vmem:[#allocation28_spill] sm:$0xff] }
 0x179   : > { %2938 = vmatprep.mubr.bf16.mxu1 %v1236_v20  ;;  %v926_v20 = vsel %vm9343_vm0, %v921_v56, %v9412_v17  ;;  %v8026_v44 = vcombine.low %v1382_v22, %v1386_v0  ;;  %v6485_v56 = vld [vmem:[#allocation5 + $0x238] sm:$0xff]   ;;  %v1474_v63 = vunpack.c.l.b16 %v9416_v45  ;;  %v1470_v22 = vunpack.c.h.b16 %v1386_v0  ;;  %v4900_v45 = vld [vmem:[%s7151_s29 + $0x80] sm:$0xf] }
 0x17a   : > { %v1782_v46 = vpack.c.b16 %v1475_v53, %v1469_v48  ;;  %v9419_v17 = vcombine.low %v9417_v32, %v9418_v3  ;;  %v9421_v0 = vshrl.u32 %v7922_v62, 16  ;;  %v9425_v62 = vshrl.u32 %v7912_v10, 16  ;;  %v9426_v53 = vld [vmem:[#allocation31_spill] sm:$0xff]  ;;  %v8091_v32 = vld [vmem:[%s7151_s29 + $0x90] sm:$0xf] }
 0x17b   : > { %6040 = vmatpush3.bf16.msra.mxu0 %v6472_v4  ;;  %v5041_v4 = vcombine.low %v7777_v31, %v7801_v55  ;;  %v1780_v28 = vpack.c.b16 %v1474_v63, %v1468_v23  ;;  %v4926_v31 = vld [vmem:[%s7151_s29 + $0x60] sm:$0xe]  ;;  %v8072_v63 = vld [vmem:[%s7151_s29 + $0x84] sm:$0xf]  ;;  %v8094_v3 = vld [vmem:[%s7151_s29 + $0x94] sm:$0xf] }
 0x17c   : > { %6041 = vmatprep.subr.bf16.mxu0 %v9405_v61  ;;  %v5016_v55 = vcombine.low %v4926_v31, %v7857_v33  ;;  %v4927_v33 = vld [vmem:[%s7151_s29 + $0x70] sm:$0xe] }
 0x17d   : > { %v5017_v23 = vcombine.low %v4927_v33, %v7888_v35 }
 0x17e   : > { %2786 = vmatmul.mubr.bf16.gmra.mrb[72].mxu0 %v926_v20  ;;  %v1261_v20 = vor.u32 %v7955_v50, %v9420_v21 }
 0x17f   : > { %2793 = vmatprep.mubr.bf16.mxu0 %v9413_v42  ;;  %6042 = vmatpush3.bf16.msra.mxu0 %v6478_v27  ;;  %v1387_v27 = vrot.slane %v5016_v55, 1  ;;  %v9422_v42 = vld [vmem:[#allocation30_spill] sm:$0xff]  ;;  %v1390_v48 = vrot.slane %v5017_v23, 1  ;;  %v9430_v23 = vld [vmem:[#allocation32_spill] sm:$0xff] }
 0x180   : > { %2939 = vmatmul.mubr.bf16.gmra.mrb[72].mxu1 %v7789_v39  ;;  %6043 = vmatprep.subr.bf16.mxu0 %v9405_v61  ;;  %v1476_v39 = vunpack.c.l.b16 %v1385_v43  ;;  %v5046_v43 = vcombine.low %v7804_v52, %v7813_v38  ;;  %v1266_v34 = vsel %vm9343_vm0, %v1261_v20, %v7967_v49  ;;  %v9423_v52 = vld [vmem:[#allocation29_spill] sm:$0xff]  ;;  %v9424_v38 = vshrl.u32 %v7335_v29, 16 }
 0x181   : > { %2946 = vmatprep.mubr.bf16.mxu1 %v5042_v16  ;;  %v1388_v16 = vrot.slane %v7912_v10, 1  ;;  %v1391_v29 = vrot.slane %v7937_v37, 1  ;;  %v1284_v10 = vor.u32 %v1282_v26, %v7985_v5  ;;  %v9427_v37 = vld [vmem:[#allocation33_spill] sm:$0xff]  ;;  %v9428_v26 = vld [vmem:[#allocation34_spill] sm:$0xff] }
 0x182   : > { %v8037_v19 = vpack.c.b16 %v1476_v39, %v1470_v22  ;;  %v951_v2 = vor.u32 %v7944_v15, %v9424_v38  ;;  %v8082_v22 = vld [vmem:[%s7151_s29 + $0x88] sm:$0xf]  ;;  %v4918_v39 = vld [vmem:[%s7151_s29 + $0x8c] sm:$0x1] }
 0x183   : > { %6044 = vmatpush3.bf16.msra.mxu0 %v6485_v56  ;;  %v1276_v56 = vor.u32 %v7979_v36, %v9421_v0  ;;  %v8056_v50 = vsel %vm9344_vm1, %v1387_v27, %v1388_v16  ;;  %v1269_v36 = vor.u32 %v9425_v62, %v7967_v49  ;;  %v1392_v49 = vsel %vm9344_vm1, %v1390_v48, %v1391_v29 }
 0x184   : > { %v956_v15 = vsel %vm9343_vm0, %v951_v2, %v9426_v53  ;;  %v1511_v31 = vunpack.c.l.b16 %v1284_v10  ;;  %v8102_v55 = vcombine.low %v8082_v22, %v4918_v39  ;;  %v5006_v27 = vcombine.low %v8091_v32, %v8094_v3 }
 0x185   : > { %v1281_v41 = vsel %vm9343_vm0, %v1276_v56, %v7985_v5  ;;  %v1504_v5 = vunpack.c.h.b16 %v9427_v37  ;;  %v1506_v0 = vunpack.c.h.b16 %v1392_v49  ;;  %v1512_v56 = vunpack.c.l.b16 %v1391_v29 }
 0x186   : > { %2794 = vmatmul.mubr.bf16.gmra.mrb[76].mxu0 %v9419_v17  ;;  %v9429_v17 = vrot.slane %v7639_v47, 1  ;;  %v1505_v20 = vunpack.c.h.b16 %v1281_v41  ;;  %v1303_v62 = vshll.u32 %v5006_v27, 16  ;;  %v1301_v29 = vshrl.u32 %v5006_v27, 16 }
 0x187   : > { %2801 = vmatprep.mubr.bf16.mxu0 %v1780_v28  ;;  %v8086_v28 = vcombine.low %v4900_v45, %v8072_v63 }
 0x188   : > { %2947 = vmatmul.mubr.bf16.gmra.mrb[76].mxu1 %v5041_v4  ;;  %v5054_v4 = vcombine.low %v1269_v36, %v1281_v41  ;;  %v1510_v21 = vunpack.c.l.b16 %v9429_v17  ;;  %v8118_v36 = vpack.c.b16 %v1512_v56, %v1506_v0  ;;  %v9431_v41 = vcombine.low %v9430_v23, %v7761_v60  ;;  %v4920_v0 = vld [vmem:[%s7151_s29 + $0xac] sm:$0x1] }
 0x189   : > { %2954 = vmatprep.mubr.bf16.mxu1 %v1782_v46  ;;  %v8088_v46 = vcombine.low %v1388_v16, %v1392_v49  ;;  %v8108_v16 = vld [vmem:[%s7151_s29 + $0x98] sm:$0xf]  ;;  %v1286_v33 = vshrl.u32 %v8086_v28, 16  ;;  %v1305_v53 = vrot.slane %v1303_v62, 1  ;;  %v1297_v49 = vshrl.u32 %v8102_v55, 16 }
 0x18a   : > { %v1804_v47 = vpack.c.b16 %v1510_v21, %v1504_v5  ;;  %v9437_v62 = vrot.slane %v7770_v54, 1 }
 0x18b   : > { %v1306_v37 = vor.u32 %v1305_v53, %v1301_v29  ;;  %v8165_v29 = vld [vmem:[%s7151_s29 + $0xb8] sm:$0xf]  ;;  %v5065_v53 = vcombine.low %v8082_v22, %v8091_v32 }
 0x18c   : > { %v1546_v23 = vunpack.c.l.b16 %v9437_v62 }
 0x18e   : > { %2802 = vmatmul.mubr.bf16.gmra.mrb[80].mxu0 %v9422_v42  ;;  %v1806_v42 = vpack.c.b16 %v1511_v31, %v1505_v20  ;;  %v4906_v20 = vld [vmem:[%s7151_s29 + $0xa0] sm:$0xf]  ;;  %v8136_v31 = vld [vmem:[%s7151_s29 + $0xa4] sm:$0xf] }
 0x18f   : > { %2809 = vmatprep.mubr.bf16.mxu0 %v9423_v52  ;;  %v1293_v52 = vshll.u32 %v8102_v55, 16  ;;  %v8145_v56 = vcombine.low %v4906_v20, %v8136_v31 }
 0x190   : > { %2955 = vmatmul.mubr.bf16.gmra.mrb[80].mxu1 %v5046_v43  ;;  %v1288_v43 = vshll.u32 %v8086_v28, 16 }
 0x191   : > { %2962 = vmatprep.mubr.bf16.mxu1 %v1266_v34  ;;  %v5053_v34 = vcombine.low %v7876_v13, %v7885_v7  ;;  %v9432_v13 = vld [vmem:[#allocation21_spill] sm:$0xff]  ;;  %v1295_v45 = vrot.slane %v1293_v52, 1 }
 0x192   : > { %v1290_v38 = vrot.slane %v1288_v43, 1  ;;  %v978_v7 = vshll.u32 %v9432_v13, 16  ;;  %v976_v10 = vshrl.u32 %v9432_v13, 16  ;;  %v9434_v43 = vld [vmem:[#allocation36_spill] sm:$0xff] }
 0x194   : > { %v1291_v48 = vor.u32 %v1290_v38, %v1286_v33  ;;  %v980_v60 = vrot.slane %v978_v7, 1  ;;  %v9435_v33 = vld [vmem:[#allocation38_spill] sm:$0xff]  ;;  %v9436_v38 = vld [vmem:[#allocation39_spill] sm:$0xff] }
 0x195   : > { %v1540_v52 = vunpack.c.h.b16 %v9435_v33 }
 0x196   : > { %2810 = vmatmul.mubr.bf16.gmra.mrb[84].mxu0 %v956_v15  ;;  %v1296_v39 = vsel %vm9343_vm0, %v1291_v48, %v1295_v45 }
 0x197   : > { %2817 = vmatprep.mubr.bf16.mxu0 %v9428_v26  ;;  %v9433_v26 = vld [vmem:[#allocation35_spill] sm:$0xff] }
 0x198   : > { %2963 = vmatmul.mubr.bf16.gmra.mrb[84].mxu1 %v7882_v14  ;;  %v4919_v14 = vld [vmem:[%s7151_s29 + $0x9c] sm:$0x1] }
 0x199   : > { %2970 = vmatprep.mubr.bf16.mxu1 %v5054_v4  ;;  %v8116_v2 = vcombine.low %v8108_v16, %v4919_v14  ;;  %v5058_v4 = vcombine.low %v7888_v35, %v7906_v51  ;;  %v981_v35 = vor.u32 %v980_v60, %v976_v10  ;;  %v1299_v51 = vor.u32 %v1297_v49, %v1295_v45 }
 0x19a   : > { %v1318_v45 = vshll.u32 %v8145_v56, 16  ;;  %v1316_v10 = vshrl.u32 %v8145_v56, 16 }
 0x19b   : > { %v1308_v15 = vshll.u32 %v8116_v2, 16  ;;  %v1312_v17 = vshrl.u32 %v8116_v2, 16  ;;  %v986_v27 = vsel %vm9343_vm0, %v981_v35, %v9434_v43  ;;  %v9441_v35 = vld [vmem:[#allocation24_spill] sm:$0xff]  ;;  %v5070_v43 = vcombine.low %v8094_v3, %v8108_v16 }
 0x19c   : > { %v1320_v60 = vrot.slane %v1318_v45, 1  ;;  %v8189_v45 = vld [vmem:[#allocation7] ss:$0 sm:$0xff] }
 0x19d   : > { %v1310_v5 = vrot.slane %v1308_v15, 1  ;;  %v1828_v15 = vpack.c.b16 %v1546_v23, %v1540_v52 }
 0x19e   : > { %2818 = vmatmul.mubr.bf16.gmra.mrb[88].mxu0 %v9431_v41  ;;  %v1321_v32 = vor.u32 %v1320_v60, %v1316_v10 }
 0x19f   : > { %2825 = vmatprep.mubr.bf16.mxu0 %v1804_v47  ;;  %v1311_v21 = vsel %vm9343_vm0, %v1306_v37, %v1310_v5  ;;  %v8148_v47 = vld [vmem:[%s7151_s29 + $0xb0] sm:$0xf]  ;;  %v9438_v37 = vld [vmem:[#allocation37_spill] sm:$0xff] }
 0x1a0   : > { %2971 = vmatmul.mubr.bf16.gmra.mrb[88].mxu1 %v5053_v34  ;;  %v5066_v14 = vcombine.low %v1299_v51, %v1311_v21  ;;  %v8141_v34 = vld [vmem:[%s7151_s29 + $0xa8] sm:$0xf]  ;;  %v1541_v41 = vunpack.c.h.b16 %v1311_v21  ;;  %v1008_v51 = vshll.u32 %v9441_v35, 16 }
 0x1a1   : > { %2978 = vmatprep.mubr.bf16.mxu1 %v1806_v42  ;;  %v8151_v42 = vld [vmem:[%s7151_s29 + $0xb4] sm:$0xf]  ;;  %v8159_v7 = vcombine.low %v8141_v34, %v4920_v0 }
 0x1a2   : > { %v5010_v48 = vcombine.low %v8148_v47, %v8151_v42 }
 0x1a3   : > { %v1323_v54 = vshll.u32 %v8159_v7, 16 }
 0x1a5   : > { %v1325_v22 = vrot.slane %v1323_v54, 1 }
 0x1a6   : > { %2826 = vmatmul.mubr.bf16.gmra.mrb[92].mxu0 %v7820_v8  ;;  %v1314_v8 = vor.u32 %v1312_v17, %v1310_v5  ;;  %v9439_v5 = vld [vmem:[#allocation40_spill] sm:$0xff]  ;;  %v1331_v17 = vshrl.u32 %v5010_v48, 16 }
 0x1a7   : > { %2833 = vmatprep.mubr.bf16.mxu0 %v9433_v26  ;;  %v9440_v26 = vcombine.low %v9438_v37, %v9439_v5  ;;  %v1326_v0 = vsel %vm9343_vm0, %v1321_v32, %v1325_v22 }
 0x1a8   : > { %2979 = vmatmul.mubr.bf16.gmra.mrb[92].mxu1 %v5058_v4  ;;  %v1547_v13 = vunpack.c.l.b16 %v1314_v8  ;;  %v1327_v8 = vshrl.u32 %v8159_v7, 16 }
 0x1a9   : > { %2986 = vmatprep.mubr.bf16.mxu1 %v1296_v39  ;;  %v1333_v39 = vshll.u32 %v5010_v48, 16 }
 0x1aa   : > { %v1830_v4 = vpack.c.b16 %v1547_v13, %v1541_v41  ;;  %v1329_v23 = vor.u32 %v1327_v8, %v1325_v22 }
 0x1ab   : > { %v1335_v21 = vrot.slane %v1333_v39, 1 }
 0x1ad   : > { %v1336_v33 = vor.u32 %v1335_v21, %v1331_v17  ;;  %v1576_v17 = vunpack.c.h.b16 %v7949_v11 }
 0x1ae   : > { %2834 = vmatmul.mubr.bf16.gmra.mrb[96].mxu0 %v986_v27  ;;  %v1006_v27 = vshrl.u32 %v9441_v35, 16 }
 0x1af   : > { %2841 = vmatprep.mubr.bf16.mxu0 %v9436_v38  ;;  %v9442_v38 = vld [vmem:[#allocation41_spill] sm:$0xff] }
 0x1b0   : > { %2987 = vmatmul.mubr.bf16.gmra.mrb[96].mxu1 %v8086_v28  ;;  %v4921_v28 = vld [vmem:[%s7151_s29 + $0xbc] sm:$0x1] }
 0x1b1   : > { %2994 = vmatprep.mubr.bf16.mxu1 %v5066_v14  ;;  %v8173_v49 = vcombine.low %v8165_v29, %v4921_v28  ;;  %v1010_v14 = vrot.slane %v1008_v51, 1 }
 0x1b3   : > { %v1338_v20 = vshll.u32 %v8173_v49, 16  ;;  %v1011_v62 = vor.u32 %v1010_v14, %v1006_v27  ;;  %v1342_v41 = vshrl.u32 %v8173_v49, 16 }
 0x1b5   : > { %v1340_v52 = vrot.slane %v1338_v20, 1  ;;  %v1016_v60 = vsel %vm9343_vm0, %v1011_v62, %v7924_v57  ;;  %v9443_v57 = vrot.slane %v7893_v9, 1 }
 0x1b6   : > { %2842 = vmatmul.mubr.bf16.gmra.mrb[100].mxu0 %v9440_v26 }
 0x1b7   : > { %2849 = vmatprep.mubr.bf16.mxu0 %v1828_v15  ;;  %v1341_v13 = vsel %vm9343_vm0, %v1336_v33, %v1340_v52  ;;  %v1344_v37 = vor.u32 %v1342_v41, %v1340_v52  ;;  %v1582_v21 = vunpack.c.l.b16 %v9443_v57  ;;  %v5077_v52 = vcombine.low %v8141_v34, %v8148_v47 }
 0x1b8   : > { %2995 = vmatmul.mubr.bf16.gmra.mrb[100].mxu1 %v5065_v53  ;;  %v5078_v39 = vcombine.low %v1329_v23, %v1341_v13  ;;  %v1577_v20 = vunpack.c.h.b16 %v1341_v13 }
 0x1b9   : > { %3002 = vmatprep.mubr.bf16.mxu1 %v1830_v4  ;;  %v1852_v11 = vpack.c.b16 %v1582_v21, %v1576_v17 }
 0x1be   : > { %2850 = vmatmul.mubr.bf16.gmra.mrb[104].mxu0 %v7917_v58 }
 0x1bf   : > { %2857 = vmatprep.mubr.bf16.mxu0 %v9442_v38 }
 0x1c0   : > { %3003 = vmatmul.mubr.bf16.gmra.mrb[104].mxu1 %v5070_v43  ;;  %v1583_v43 = vunpack.c.l.b16 %v1344_v37 }
 0x1c1   : > { %3010 = vmatprep.mubr.bf16.mxu1 %v1326_v0  ;;  %v5326_v16 = vpop.f32.mrb[0].mxu0 }
 0x1c2   : > { %v5327_v48 = vpop.f32.mrb[1].mxu0  ;;  %v1854_v23 = vpack.c.b16 %v1583_v43, %v1577_v20 }
 0x1c3   : > { %v5432_v28 = vpop.f32.mrb[0].mxu1  ;;  %v5328_v53 = vadd.f32 %v5327_v48, %v5326_v16  ;;  %v5329_v15 = vpop.f32.mrb[2].mxu0 }
 0x1c4   : > { %v5433_v4 = vpop.f32.mrb[1].mxu1  ;;  %v5330_v54 = vpop.f32.mrb[3].mxu0 }
 0x1c5   : > { %v5434_v58 = vadd.f32 %v5433_v4, %v5432_v28  ;;  %v5435_v10 = vpop.f32.mrb[2].mxu1  ;;  %v2458_v5 = vadd.f32 %v5328_v53, %v8189_v45  ;;  %v5331_v26 = vadd.f32 %v5330_v54, %v5329_v15  ;;  %v9444_v28 = vcombine.low %v7940_v59, %v7965_v6  ;;  %v4922_v53 = vld [vmem:[%s7151_s29 + $0x20] sm:$0xe] }
 0x1c6   : > { %v5436_v35 = vpop.f32.mrb[3].mxu1  ;;  %2858 = vmatmul.mubr.bf16.gmra.mrb[108].mxu0 %v1016_v60  ;;  %v5082_v60 = vcombine.low %v8151_v42, %v8165_v29 }
 0x1c7   : > { %v5437_v51 = vadd.f32 %v5436_v35, %v5435_v10  ;;  %v2461_v22 = vadd.f32 %v5331_v26, %v8189_v45  ;;  %v8195_v32 = vadd.f32 %v5434_v58, %v2458_v5  ;;  %2865 = vmatprep.mubr.bf16.mxu0 %v7959_v25  ;;  %v6569_v5 = vld [vmem:[%s7151_s29 + $0x24] sm:$0xf] }
 0x1c8   : > { %3011 = vmatmul.mubr.bf16.gmra.mrb[108].mxu1 %v8145_v56  ;;  %v5012_v26 = vcombine.low %v4922_v53, %v6569_v5 }
 0x1c9   : > { %3018 = vmatprep.mubr.bf16.mxu1 %v5078_v39  ;;  %v8202_v27 = vadd.f32 %v5437_v51, %v2461_v22  ;;  %v5332_v14 = vpop.f32.mrb[4].mxu0 }
 0x1ca   : > { %v5333_v0 = vpop.f32.mrb[5].mxu0  ;;  %v1375_v29 = vrot.slane %v5012_v26, 1 }
 0x1cb   : > { %v5438_v8 = vpop.f32.mrb[4].mxu1  ;;  %v5334_v56 = vadd.f32 %v5333_v0, %v5332_v14  ;;  %v5335_v38 = vpop.f32.mrb[6].mxu0 }
 0x1cc   : > { %v5439_v33 = vpop.f32.mrb[5].mxu1  ;;  %v5336_v9 = vpop.f32.mrb[7].mxu0 }
 0x1cd   : > { %v5440_v25 = vadd.f32 %v5439_v33, %v5438_v8  ;;  %v5441_v62 = vpop.f32.mrb[6].mxu1  ;;  %v2466_v16 = vadd.f32 %v5334_v56, %v8189_v45  ;;  %v5337_v13 = vadd.f32 %v5336_v9, %v5335_v38 }
 0x1ce   : > { %v5442_v41 = vpop.f32.mrb[7].mxu1  ;;  %2866 = vmatmul.mubr.bf16.gmra.mrb[112].mxu0 %v9444_v28 }
 0x1cf   : > { %v5443_v48 = vadd.f32 %v5442_v41, %v5441_v62  ;;  %v2469_v34 = vadd.f32 %v5337_v13, %v8189_v45  ;;  %v8211_v47 = vadd.f32 %v5440_v25, %v2466_v16  ;;  %2873 = vmatprep.mubr.bf16.mxu0 %v1852_v11  ;;  %v1377_v25 = vsel %vm9344_vm1, %v1375_v29, %v1376_v12 }
 0x1d0   : > { %3019 = vmatmul.mubr.bf16.gmra.mrb[112].mxu1 %v5077_v52 }
 0x1d1   : > { %3026 = vmatprep.mubr.bf16.mxu1 %v1854_v23  ;;  %v8214_v15 = vadd.f32 %v5443_v48, %v2469_v34  ;;  %v5338_v4 = vpop.f32.mrb[8].mxu0 }
 0x1d2   : > { %v5339_v58 = vpop.f32.mrb[9].mxu0 }
 0x1d3   : > { %v5444_v54 = vpop.f32.mrb[8].mxu1  ;;  %v5340_v59 = vadd.f32 %v5339_v58, %v5338_v4  ;;  %v5341_v6 = vpop.f32.mrb[10].mxu0 }
 0x1d4   : > { %v5445_v10 = vpop.f32.mrb[9].mxu1  ;;  %v5342_v35 = vpop.f32.mrb[11].mxu0 }
 0x1d5   : > { %v5446_v39 = vadd.f32 %v5445_v10, %v5444_v54  ;;  %v5447_v37 = vpop.f32.mrb[10].mxu1  ;;  %v2474_v22 = vadd.f32 %v5340_v59, %v8189_v45  ;;  %v5343_v17 = vadd.f32 %v5342_v35, %v5341_v6 }
 0x1d6   : > { %v5448_v51 = vpop.f32.mrb[11].mxu1  ;;  %2874 = vmatmul.mubr.bf16.gmra.mrb[116].mxu0 %v8001_v40 }
 0x1d7   : > { %v5449_v57 = vadd.f32 %v5448_v51, %v5447_v37  ;;  %v2477_v21 = vadd.f32 %v5343_v17, %v8189_v45  ;;  %v8222_v20 = vadd.f32 %v5446_v39, %v2474_v22  ;;  %6045 = vmatprep.mubr.msk.bf16.mxu0 %vm6853_vm2, %v9405_v61  ;;  %v6497_v22 = vld [vmem:[#allocation8 + $0x40] sm:$0xff]  }
 0x1d8   : > { %3027 = vmatmul.mubr.bf16.gmra.mrb[116].mxu1 %v5082_v60  ;;  %5757 = vmatprep.subr.bf16.mxu1 %v6497_v22 }
 0x1d9   : > { %v8226_v43 = vadd.f32 %v5449_v57, %v2477_v21  ;;  %v5344_v14 = vpop.f32.mrb[12].mxu0 }
 0x1da   : > { %v5345_v0 = vpop.f32.mrb[13].mxu0 }
 0x1db   : > { %v5450_v8 = vpop.f32.mrb[12].mxu1  ;;  %v5346_v52 = vadd.f32 %v5345_v0, %v5344_v14  ;;  %v5347_v56 = vpop.f32.mrb[14].mxu0 }
 0x1dc   : > { %v5451_v33 = vpop.f32.mrb[13].mxu1  ;;  %v5348_v62 = vpop.f32.mrb[15].mxu0 }
 0x1dd   : > { %v5452_v38 = vadd.f32 %v5451_v33, %v5450_v8  ;;  %v5453_v40 = vpop.f32.mrb[14].mxu1  ;;  %v2482_v23 = vadd.f32 %v5346_v52, %v8189_v45  ;;  %v5349_v9 = vadd.f32 %v5348_v62, %v5347_v56 }
 0x1de   : > { %v5454_v11 = vpop.f32.mrb[15].mxu1  ;;  %6046 = vmatmul.mubr.bf16.vlgmr.msra.gmra.mrb[120].mxu0 %v1377_v25 }
 0x1df   : > { %v5455_v41 = vadd.f32 %v5454_v11, %v5453_v40  ;;  %v2485_v16 = vadd.f32 %v5349_v9, %v8189_v45  ;;  %v8233_v13 = vadd.f32 %v5452_v38, %v2482_v23  ;;  %6049 = vmatprep.mubr.msk.bf16.mxu0 %vm6853_vm2, %v9405_v61  ;;  %v6498_v38 = vld [vmem:[#allocation8] sm:$0xff]  }
 0x1e0   : > { %5758 = vmatpush3.bf16.msra.mxu1 %v6498_v38 }
 0x1e1   : > { %v8237_v48 = vadd.f32 %v5455_v41, %v2485_v16  ;;  %v5350_v28 = vpop.f32.mrb[16].mxu0 }
 0x1e2   : > { %v5351_v34 = vpop.f32.mrb[17].mxu0 }
 0x1e3   : > { %v5456_v24 = vpop.f32.mrb[16].mxu1  ;;  %v5352_v53 = vadd.f32 %v5351_v34, %v5350_v28  ;;  %v5353_v4 = vpop.f32.mrb[18].mxu0 }
 0x1e4   : > { %v5457_v12 = vpop.f32.mrb[17].mxu1  ;;  %v5354_v10 = vpop.f32.mrb[19].mxu0 }
 0x1e5   : > { %v5458_v54 = vadd.f32 %v5457_v12, %v5456_v24  ;;  %v5459_v58 = vpop.f32.mrb[18].mxu1  ;;  %v2490_v59 = vadd.f32 %v5352_v53, %v8189_v45  ;;  %v5355_v6 = vadd.f32 %v5354_v10, %v5353_v4 }
 0x1e6   : > { %v5460_v60 = vpop.f32.mrb[19].mxu1  ;;  %6050 = vmatmul.mubr.bf16.gmra.mrb[124].mxu0 %v8012_v30 }
 0x1e7   : > { %v5461_v39 = vadd.f32 %v5460_v60, %v5459_v58  ;;  %v2493_v37 = vadd.f32 %v5355_v6, %v8189_v45  ;;  %v8242_v5 = vadd.f32 %v5458_v54, %v2490_v59  ;;  %6053 = vmatprep.mubr.msk.bf16.mxu0 %vm6853_vm2, %v9405_v61  ;;  %v6499_v60 = vld [vmem:[#allocation8 + $0x48] sm:$0xff]  }
 0x1e8   : > { %5759 = vmatprep.subr.bf16.mxu1 %v6499_v60 }
 0x1e9   : > { %v8246_v26 = vadd.f32 %v5461_v39, %v2493_v37  ;;  %v5356_v35 = vpop.f32.mrb[20].mxu0  ;;  %v6500_v37 = vld [vmem:[#allocation8 + $0x8] sm:$0xff]  }
 0x1ea   : > { %v5357_v17 = vpop.f32.mrb[21].mxu0  ;;  %5760 = vmatpush3.bf16.msra.mxu1 %v6500_v37 }
 0x1eb   : > { %v5462_v51 = vpop.f32.mrb[20].mxu1  ;;  %v5358_v21 = vadd.f32 %v5357_v17, %v5356_v35  ;;  %v5359_v29 = vpop.f32.mrb[22].mxu0 }
 0x1ec   : > { %v5463_v57 = vpop.f32.mrb[21].mxu1  ;;  %v5360_v30 = vpop.f32.mrb[23].mxu0 }
 0x1ed   : > { %v5464_v14 = vadd.f32 %v5463_v57, %v5462_v51  ;;  %v5465_v8 = vpop.f32.mrb[22].mxu1  ;;  %v2498_v33 = vadd.f32 %v5358_v21, %v8189_v45  ;;  %v5361_v52 = vadd.f32 %v5360_v30, %v5359_v29 }
 0x1ee   : > { %v5466_v0 = vpop.f32.mrb[23].mxu1  ;;  %6054 = vmatmul.mubr.bf16.gmra.mrb[128].mxu0 %v8023_v18 }
 0x1ef   : > { %v5467_v56 = vadd.f32 %v5466_v0, %v5465_v8  ;;  %v2501_v40 = vadd.f32 %v5361_v52, %v8189_v45  ;;  %v8251_v25 = vadd.f32 %v5464_v14, %v2498_v33  ;;  %6057 = vmatprep.mubr.msk.bf16.mxu0 %vm6853_vm2, %v9405_v61 }
 0x1f1   : > { %v8255_v62 = vadd.f32 %v5467_v56, %v2501_v40  ;;  %v5362_v11 = vpop.f32.mrb[24].mxu0 }
 0x1f2   : > { %v5363_v9 = vpop.f32.mrb[25].mxu0 }
 0x1f3   : > { %v5468_v23 = vpop.f32.mrb[24].mxu1  ;;  %v5364_v16 = vadd.f32 %v5363_v9, %v5362_v11  ;;  %v5365_v28 = vpop.f32.mrb[26].mxu0 }
 0x1f4   : > { %v5469_v41 = vpop.f32.mrb[25].mxu1  ;;  %v5366_v12 = vpop.f32.mrb[27].mxu0 }
 0x1f5   : > { %v5470_v24 = vadd.f32 %v5469_v41, %v5468_v23  ;;  %v5471_v34 = vpop.f32.mrb[26].mxu1  ;;  %v2506_v53 = vadd.f32 %v5364_v16, %v8189_v45  ;;  %v5367_v4 = vadd.f32 %v5366_v12, %v5365_v28 }
 0x1f6   : > { %v5472_v18 = vpop.f32.mrb[27].mxu1  ;;  %6058 = vmatmul.mubr.bf16.gmra.mrb[132].mxu0 %v8018_v1 }
 0x1f7   : > { %v5473_v54 = vadd.f32 %v5472_v18, %v5471_v34  ;;  %v2509_v58 = vadd.f32 %v5367_v4, %v8189_v45  ;;  %v8260_v10 = vadd.f32 %v5470_v24, %v2506_v53  ;;  %6061 = vmatprep.mubr.msk.bf16.mxu0 %vm6853_vm2, %v9405_v61  ;;  %v6501_v4 = vld [vmem:[#allocation8 + $0x50] sm:$0xff]  }
 0x1f8   : > { %5761 = vmatprep.subr.bf16.mxu1 %v6501_v4  ;;  %v6503_v4 = vld [vmem:[#allocation8 + $0x58] sm:$0xff]  }
 0x1f9   : > { %v8264_v59 = vadd.f32 %v5473_v54, %v2509_v58  ;;  %v5368_v6 = vpop.f32.mrb[28].mxu0  ;;  %v6502_v54 = vld [vmem:[#allocation8 + $0x10] sm:$0xff]  }
 0x1fa   : > { %v5369_v35 = vpop.f32.mrb[29].mxu0  ;;  %5762 = vmatpush3.bf16.msra.mxu1 %v6502_v54  ;;  %v6504_v54 = vld [vmem:[#allocation8 + $0x18] sm:$0xff]  }
 0x1fb   : > { %v5474_v39 = vpop.f32.mrb[28].mxu1  ;;  %v5370_v22 = vadd.f32 %v5369_v35, %v5368_v6  ;;  %v5371_v17 = vpop.f32.mrb[30].mxu0  ;;  %5763 = vmatprep.subr.bf16.mxu1 %v6503_v4 }
 0x1fc   : > { %v5475_v51 = vpop.f32.mrb[29].mxu1  ;;  %v5372_v21 = vpop.f32.mrb[31].mxu0 }
 0x1fd   : > { %v5476_v57 = vadd.f32 %v5475_v51, %v5474_v39  ;;  %v5477_v1 = vpop.f32.mrb[30].mxu1  ;;  %v2514_v14 = vadd.f32 %v5370_v22, %v8189_v45  ;;  %v5373_v8 = vadd.f32 %v5372_v21, %v5371_v17 }
 0x1fe   : > { %v5478_v29 = vpop.f32.mrb[31].mxu1  ;;  %6062 = vmatmul.mubr.bf16.gmra.mrb[136].mxu0 %v8026_v44  ;;  %5764 = vmatpush3.bf16.msra.mxu1 %v6504_v54 }
 0x1ff   : > { %v5479_v30 = vadd.f32 %v5478_v29, %v5477_v1  ;;  %v2517_v0 = vadd.f32 %v5373_v8, %v8189_v45  ;;  %v8269_v33 = vadd.f32 %v5476_v57, %v2514_v14  ;;  %6065 = vmatprep.mubr.msk.bf16.mxu0 %vm6853_vm2, %v9405_v61 }
 0x201   : > { %v8273_v52 = vadd.f32 %v5479_v30, %v2517_v0  ;;  %v5374_v56 = vpop.f32.mrb[32].mxu0 }
 0x202   : > { %v5375_v40 = vpop.f32.mrb[33].mxu0 }
 0x203   : > { %v5480_v38 = vpop.f32.mrb[32].mxu1  ;;  %v5376_v23 = vadd.f32 %v5375_v40, %v5374_v56  ;;  %v5377_v9 = vpop.f32.mrb[34].mxu0 }
 0x204   : > { %v5481_v11 = vpop.f32.mrb[33].mxu1  ;;  %v5378_v28 = vpop.f32.mrb[35].mxu0 }
 0x205   : > { %v5482_v41 = vadd.f32 %v5481_v11, %v5480_v38  ;;  %v5483_v16 = vpop.f32.mrb[34].mxu1  ;;  %v2522_v44 = vadd.f32 %v5376_v23, %v8189_v45  ;;  %v5379_v34 = vadd.f32 %v5378_v28, %v5377_v9 }
 0x206   : > { %v5484_v24 = vpop.f32.mrb[35].mxu1  ;;  %6066 = vmatmul.mubr.bf16.gmra.mrb[140].mxu0 %v8037_v19 }
 0x207   : > { %v5485_v12 = vadd.f32 %v5484_v24, %v5483_v16  ;;  %v2525_v18 = vadd.f32 %v5379_v34, %v8189_v45  ;;  %v8278_v53 = vadd.f32 %v5482_v41, %v2522_v44  ;;  %6069 = vmatprep.mubr.msk.bf16.mxu0 %vm6853_vm2, %v9405_v61 }
 0x209   : > { %v8282_v58 = vadd.f32 %v5485_v12, %v2525_v18  ;;  %v5380_v60 = vpop.f32.mrb[36].mxu0  ;;  %v4928_v18 = vld [vmem:[%s7151_s29 + $0x80] sm:$0xe] }
 0x20a   : > { %v5381_v39 = vpop.f32.mrb[37].mxu0 }
 0x20b   : > { %v5486_v6 = vpop.f32.mrb[36].mxu1  ;;  %v5382_v35 = vadd.f32 %v5381_v39, %v5380_v60  ;;  %v5383_v51 = vpop.f32.mrb[38].mxu0 }
 0x20c   : > { %v5487_v37 = vpop.f32.mrb[37].mxu1  ;;  %v5384_v17 = vpop.f32.mrb[39].mxu0 }
 0x20d   : > { %v5488_v19 = vadd.f32 %v5487_v37, %v5486_v6  ;;  %v5489_v22 = vpop.f32.mrb[38].mxu1  ;;  %v2530_v1 = vadd.f32 %v5382_v35, %v8189_v45  ;;  %v5385_v21 = vadd.f32 %v5384_v17, %v5383_v51 }
 0x20e   : > { %v5490_v57 = vpop.f32.mrb[39].mxu1  ;;  %6070 = vmatmul.mubr.bf16.gmra.mrb[144].mxu0 %v8056_v50 }
 0x20f   : > { %v5491_v29 = vadd.f32 %v5490_v57, %v5489_v22  ;;  %v2533_v14 = vadd.f32 %v5385_v21, %v8189_v45  ;;  %v8287_v8 = vadd.f32 %v5488_v19, %v2530_v1  ;;  %6073 = vmatprep.mubr.msk.bf16.mxu0 %vm6853_vm2, %v9405_v61  ;;  %v4929_v21 = vld [vmem:[%s7151_s29 + $0x90] sm:$0xe] }
 0x211   : > { %v8291_v30 = vadd.f32 %v5491_v29, %v2533_v14  ;;  %v5386_v0 = vpop.f32.mrb[40].mxu0 }
 0x212   : > { %v5387_v38 = vpop.f32.mrb[41].mxu0 }
 0x213   : > { %v5492_v56 = vpop.f32.mrb[40].mxu1  ;;  %v5388_v11 = vadd.f32 %v5387_v38, %v5386_v0  ;;  %v5389_v23 = vpop.f32.mrb[42].mxu0  ;;  %v1394_v38 = vrot.slane %v8102_v55, 1 }
 0x214   : > { %v5493_v40 = vpop.f32.mrb[41].mxu1  ;;  %v5390_v16 = vpop.f32.mrb[43].mxu0 }
 0x215   : > { %v5494_v9 = vadd.f32 %v5493_v40, %v5492_v56  ;;  %v5495_v41 = vpop.f32.mrb[42].mxu1  ;;  %v2538_v28 = vadd.f32 %v5388_v11, %v8189_v45  ;;  %v5391_v24 = vadd.f32 %v5390_v16, %v5389_v23  ;;  %v5019_v11 = vcombine.low %v4929_v21, %v8094_v3 }
 0x216   : > { %v5496_v50 = vpop.f32.mrb[43].mxu1  ;;  %6074 = vmatmul.mubr.bf16.gmra.mrb[148].mxu0 %v8088_v46  ;;  %v5018_v46 = vcombine.low %v4928_v18, %v8072_v63  ;;  %v1397_v18 = vrot.slane %v8116_v2, 1 }
 0x217   : > { %v5497_v44 = vadd.f32 %v5496_v50, %v5495_v41  ;;  %v2541_v34 = vadd.f32 %v5391_v24, %v8189_v45  ;;  %v8296_v12 = vadd.f32 %v5494_v9, %v2538_v28  ;;  %6077 = vmatprep.mubr.msk.bf16.mxu0 %vm6853_vm2, %v9405_v61 }
 0x218   : > { %v1393_v56 = vrot.slane %v5018_v46, 1 }
 0x219   : > { %v8301_v60 = vadd.f32 %v5497_v44, %v2541_v34  ;;  %v5392_v6 = vpop.f32.mrb[44].mxu0  ;;  %v1396_v34 = vrot.slane %v5019_v11, 1 }
 0x21a   : > { %v5393_v37 = vpop.f32.mrb[45].mxu0 }
 0x21b   : > { %v5498_v39 = vpop.f32.mrb[44].mxu1  ;;  %v5394_v51 = vadd.f32 %v5393_v37, %v5392_v6  ;;  %v5395_v19 = vpop.f32.mrb[46].mxu0  ;;  %v1398_v46 = vsel %vm9344_vm1, %v1396_v34, %v1397_v18 }
 0x21c   : > { %v5499_v35 = vpop.f32.mrb[45].mxu1  ;;  %v5396_v57 = vpop.f32.mrb[47].mxu0  ;;  %v5067_v21 = vcombine.low %v1394_v38, %v1398_v46 }
 0x21d   : > { %v5500_v22 = vadd.f32 %v5499_v35, %v5498_v39  ;;  %v5501_v17 = vpop.f32.mrb[46].mxu1  ;;  %v2546_v29 = vadd.f32 %v5394_v51, %v8189_v45  ;;  %v5397_v14 = vadd.f32 %v5396_v57, %v5395_v19  ;;  %v6505_v51 = vld [vmem:[#allocation8 + $0x60] sm:$0xff]  }
 0x21e   : > { %v5502_v1 = vpop.f32.mrb[47].mxu1  ;;  %6078 = vmatmul.mubr.bf16.gmra.mrb[152].mxu0 %v8118_v36  ;;  %v1395_v36 = vsel %vm9344_vm1, %v1393_v56, %v1394_v38  ;;  %v6506_v19 = vld [vmem:[#allocation8 + $0x20] sm:$0xff]   ;;  %5765 = vmatprep.subr.bf16.mxu1 %v6505_v51 }
 0x21f   : > { %v5503_v0 = vadd.f32 %v5502_v1, %v5501_v17  ;;  %v2549_v40 = vadd.f32 %v5397_v14, %v8189_v45  ;;  %v8309_v63 = vadd.f32 %v5500_v22, %v2546_v29  ;;  %6081 = vmatprep.mubr.msk.bf16.mxu0 %vm6853_vm2, %v9405_v61  ;;  %5766 = vmatpush3.bf16.msra.mxu1 %v6506_v19  ;;  %v4930_v38 = vld [vmem:[%s7151_s29 + $0xa0] sm:$0xe] }
 0x221   : > { %v8314_v23 = vadd.f32 %v5503_v0, %v2549_v40  ;;  %v5398_v9 = vpop.f32.mrb[48].mxu0 }
 0x222   : > { %v5399_v16 = vpop.f32.mrb[49].mxu0 }
 0x223   : > { %v5504_v41 = vpop.f32.mrb[48].mxu1  ;;  %v5400_v28 = vadd.f32 %v5399_v16, %v5398_v9  ;;  %v5401_v24 = vpop.f32.mrb[50].mxu0 }
 0x224   : > { %v5505_v50 = vpop.f32.mrb[49].mxu1  ;;  %v5402_v4 = vpop.f32.mrb[51].mxu0 }
 0x225   : > { %v5506_v55 = vadd.f32 %v5505_v50, %v5504_v41  ;;  %v5507_v44 = vpop.f32.mrb[50].mxu1  ;;  %v2554_v6 = vadd.f32 %v5400_v28, %v8189_v45  ;;  %v5403_v3 = vadd.f32 %v5402_v4, %v5401_v24  ;;  %v1542_v50 = vunpack.c.h.b16 %v1398_v46  ;;  %v6507_v28 = vld [vmem:[#allocation8 + $0x140] sm:$0xff]  }
 0x226   : > { %v5508_v54 = vpop.f32.mrb[51].mxu1  ;;  %6082 = vmatmul.mubr.bf16.gmra.mrb[156].mxu0 %v1395_v36  ;;  %v1548_v36 = vunpack.c.l.b16 %v1397_v18  ;;  %5885 = vmatprep.subr.bf16.mxu0 %v6507_v28 }
 0x227   : > { %v5509_v39 = vadd.f32 %v5508_v54, %v5507_v44  ;;  %v2557_v37 = vadd.f32 %v5403_v3, %v8189_v45  ;;  %v8320_v35 = vadd.f32 %v5506_v55, %v2554_v6  ;;  %6085 = vmatprep.mubr.msk.bf16.mxu0 %vm6853_vm2, %v9405_v61  ;;  %v6508_v44 = vld [vmem:[#allocation8 + $0x100] sm:$0xff]  }
 0x228   : > { %5886 = vmatpush3.bf16.msra.mxu0 %v6508_v44  ;;  %v1831_v18 = vpack.c.b16 %v1548_v36, %v1542_v50 }
 0x229   : > { %v8325_v22 = vadd.f32 %v5509_v39, %v2557_v37  ;;  %v5404_v2 = vpop.f32.mrb[52].mxu0  ;;  %v5020_v39 = vcombine.low %v4930_v38, %v8136_v31  ;;  %v6510_v37 = vld [vmem:[#allocation8 + $0x148] sm:$0xff]   ;;  %v6513_v31 = vld [vmem:[#allocation8 + $0x150] sm:$0xff]  }
 0x22a   : > { %v5405_v57 = vpop.f32.mrb[53].mxu0  ;;  %5887 = vmatprep.subr.bf16.mxu0 %v6510_v37  ;;  %v6516_v37 = vld [vmem:[#allocation8 + $0x118] sm:$0xff]  }
 0x22b   : > { %v5510_v17 = vpop.f32.mrb[52].mxu1  ;;  %v5406_v29 = vadd.f32 %v5405_v57, %v5404_v2  ;;  %v5407_v14 = vpop.f32.mrb[54].mxu0 }
 0x22c   : > { %v5511_v1 = vpop.f32.mrb[53].mxu1  ;;  %v5408_v40 = vpop.f32.mrb[55].mxu0 }
 0x22d   : > { %v5512_v0 = vadd.f32 %v5511_v1, %v5510_v17  ;;  %v5513_v56 = vpop.f32.mrb[54].mxu1  ;;  %v2562_v9 = vadd.f32 %v5406_v29, %v8189_v45  ;;  %v5409_v41 = vadd.f32 %v5408_v40, %v5407_v14  ;;  %v6512_v17 = vld [vmem:[#allocation8 + $0x108] sm:$0xff]   ;;  %v1400_v40 = vrot.slane %v8159_v7, 1 }
 0x22e   : > { %v5514_v11 = vpop.f32.mrb[55].mxu1  ;;  %6086 = vmatmul.mubr.bf16.gmra.mrb[160].mxu0 %v5067_v21  ;;  %v4931_v21 = vld [vmem:[%s7151_s29 + $0xb0] sm:$0xe]  ;;  %s6713_s29 = scalar_lea.vmem %s9231_s15, 2048 }
 0x22f   : > { %v5515_v16 = vadd.f32 %v5514_v11, %v5513_v56  ;;  %v2565_v24 = vadd.f32 %v5409_v41, %v8189_v45  ;;  %v8329_v55 = vadd.f32 %v5512_v0, %v2562_v9  ;;  %6089 = vmatprep.mubr.msk.bf16.mxu0 %vm6853_vm2, %v9405_v61  ;;  %5888 = vmatpush3.bf16.msra.mxu0 %v6512_v17  ;;  %v1399_v56 = vrot.slane %v5020_v39, 1  ;;  %p6714_p3 = scmp.ne.s32.totalorder %s9231_s15, %s6713_s29 }
 0x230   : > { %v5021_v41 = vcombine.low %v4931_v21, %v8151_v42  ;;  %5889 = vmatprep.subr.bf16.mxu0 %v6513_v31  ;;  %v1403_v42 = vrot.slane %v8173_v49, 1  ;;  %v6519_v21 = vld [vmem:[#allocation8 + $0x160] sm:$0xff]  }
 0x231   : > { %v8334_v34 = vadd.f32 %v5515_v16, %v2565_v24  ;;  %v5410_v4 = vpop.f32.mrb[56].mxu0  ;;  %v6514_v16 = vld [vmem:[#allocation8 + $0x110] sm:$0xff]   ;;  %v6509_v24 = vld [vmem:[#allocation8 + $0x68] sm:$0xff]   ;;  %v1401_v44 = vsel %vm9344_vm1, %v1399_v56, %v1400_v40  ;;  %p6715_p6 = pnand %p6714_p3, %p9511_p4 }
 0x232   : > { %v5411_v6 = vpop.f32.mrb[57].mxu0  ;;  %v1402_v39 = vrot.slane %v5021_v41, 1  ;;  %5767 = vmatprep.subr.bf16.mxu1 %v6509_v24 }
 0x233   : > { %v5516_v54 = vpop.f32.mrb[56].mxu1  ;;  %v5412_v46 = vadd.f32 %v5411_v6, %v5410_v4  ;;  %v5413_v51 = vpop.f32.mrb[58].mxu0  ;;  %5890 = vmatpush3.bf16.msra.mxu0 %v6514_v16  ;;  %v6515_v4 = vld [vmem:[#allocation8 + $0x158] sm:$0xff]   ;;  %p6716_p13 = pneg %p6715_p6 }
 0x234   : > { %v5517_v3 = vpop.f32.mrb[57].mxu1  ;;  %v5414_v57 = vpop.f32.mrb[59].mxu0  ;;  %5891 = vmatprep.subr.bf16.mxu0 %v6515_v4  ;;  %v1404_v49 = vsel %vm9344_vm1, %v1402_v39, %v1403_v42 }
 0x235   : > { %v5518_v19 = vadd.f32 %v5517_v3, %v5516_v54  ;;  %v5519_v2 = vpop.f32.mrb[58].mxu1  ;;  %v2570_v29 = vadd.f32 %v5412_v46, %v8189_v45  ;;  %v5415_v14 = vadd.f32 %v5414_v57, %v5413_v51  ;;  %v6517_v57 = vld [vmem:[#allocation8 + $0x70] sm:$0xff]   ;;  %v1578_v39 = vunpack.c.h.b16 %v1404_v49 }
 0x236   : > { %v5520_v1 = vpop.f32.mrb[59].mxu1  ;;  %6090 = vmatmul.mubr.bf16.gmra.mrb[164].mxu0 %v1831_v18 }
 0x237   : > { %v5521_v0 = vadd.f32 %v5520_v1, %v5519_v2  ;;  %v2573_v11 = vadd.f32 %v5415_v14, %v8189_v45  ;;  %v8341_v9 = vadd.f32 %v5518_v19, %v2570_v29  ;;  %6093 = vmatprep.mubr.msk.bf16.mxu0 %vm6853_vm2, %v9405_v61  ;;  %v6511_v45 = vld [vmem:[#allocation8 + $0x28] sm:$0xff]   ;;  %5892 = vmatpush3.bf16.msra.mxu0 %v6516_v37  ;;  %v6518_v1 = vld [vmem:[#allocation8 + $0x30] sm:$0xff]  }
 0x238   : > { %5768 = vmatpush3.bf16.msra.mxu1 %v6511_v45  ;;  %5893 = vmatprep.subr.bf16.mxu0 %v6519_v21  ;;  %v6524_v45 = vld [vmem:[#allocation8 + $0x128] sm:$0xff]   ;;  %v6525_v37 = vld [vmem:[#allocation8 + $0x170] sm:$0xff]  }
 0x239   : > { %v8346_v50 = vadd.f32 %v5521_v0, %v2573_v11  ;;  %v5538_v36 = vpop.f32.mrb[60].mxu0  ;;  %5769 = vmatprep.subr.bf16.mxu1 %v6517_v57  ;;  %v6520_v0 = vld [vmem:[#allocation8 + $0x120] sm:$0xff]   ;;  %v6521_v11 = vld [vmem:[#allocation8 + $0x78] sm:$0xff]  }
 0x23a   : > { %v5539_v38 = vpop.f32.mrb[61].mxu0 }
 0x23b   : > { %v5644_v28 = vpop.f32.mrb[60].mxu1  ;;  %v5540_v54 = vadd.f32 %v5539_v38, %v5538_v36  ;;  %v5541_v6 = vpop.f32.mrb[62].mxu0  ;;  %5894 = vmatpush3.bf16.msra.mxu0 %v6520_v0  ;;  %v6522_v36 = vld [vmem:[#allocation8 + $0x38] sm:$0xff]  }
 0x23c   : > { %v5645_v7 = vpop.f32.mrb[61].mxu1  ;;  %v5542_v46 = vpop.f32.mrb[63].mxu0  ;;  %5770 = vmatpush3.bf16.msra.mxu1 %v6518_v1 }
 0x23d   : > { %v5646_v3 = vadd.f32 %v5645_v7, %v5644_v28  ;;  %v5647_v18 = vpop.f32.mrb[62].mxu1  ;;  %v2764_v19 = vadd.f32 %v5540_v54, %v8195_v32  ;;  %v5543_v2 = vadd.f32 %v5542_v46, %v5541_v6  ;;  %v6523_v28 = vld [vmem:[#allocation8 + $0x168] sm:$0xff]   ;;  %5771 = vmatprep.subr.bf16.mxu1 %v6521_v11 }
 0x23e   : > { %v5648_v51 = vpop.f32.mrb[63].mxu1  ;;  %6094 = vmatmul.mubr.bf16.gmra.mrb[168].mxu0 %v1401_v44  ;;  %5895 = vmatprep.subr.bf16.mxu0 %v6523_v28 }
 0x23f   : > { %v5649_v17 = vadd.f32 %v5648_v51, %v5647_v18  ;;  %v2767_v29 = vadd.f32 %v5543_v2, %v8202_v27  ;;  %6097 = vmatprep.mubr.msk.bf16.mxu0 %vm6853_vm2, %v9405_v61  ;;  %v8355_v14 = vadd.f32 %v5646_v3, %v2764_v19  ;;  %v5079_v27 = vcombine.low %v1400_v40, %v1404_v49  ;;  %v6526_v19 = vld [vmem:[#allocation8 + $0x130] sm:$0xff]  }
 0x240   : > { %5772 = vmatpush3.bf16.msra.mxu1 %v6522_v36  ;;  %5896 = vmatpush3.bf16.msra.mxu0 %v6524_v45  ;;  %v1584_v40 = vunpack.c.l.b16 %v1403_v42 }
 0x241   : > { %v5544_v32 = vpop.f32.mrb[64].mxu0  ;;  %v8357_v31 = vadd.f32 %v5649_v17, %v2767_v29  ;;  %5897 = vmatprep.subr.bf16.mxu0 %v6525_v37  ;;  %v6527_v29 = vld [vmem:[#allocation8 + $0x178] sm:$0xff]  }
 0x242   : > { %v5545_v41 = vpop.f32.mrb[65].mxu0  ;;  %v1855_v21 = vpack.c.b16 %v1584_v40, %v1578_v39 }
 0x243   : > { %v5650_v56 = vpop.f32.mrb[64].mxu1  ;;  %v5546_v24 = vadd.f32 %v5545_v41, %v5544_v32  ;;  %v5547_v38 = vpop.f32.mrb[66].mxu0  ;;  %v6528_v32 = vld [vmem:[#allocation8 + $0x138] sm:$0xff]  }
 0x244   : > { %v5651_v16 = vpop.f32.mrb[65].mxu1  ;;  %v5548_v4 = vpop.f32.mrb[67].mxu0  ;;  %5898 = vmatpush3.bf16.msra.mxu0 %v6526_v19 }
 0x245   : > { %v5652_v7 = vadd.f32 %v5651_v16, %v5650_v56  ;;  %v5653_v44 = vpop.f32.mrb[66].mxu1  ;;  %v2772_v6 = vadd.f32 %v5546_v24, %v8211_v47  ;;  %v5549_v3 = vadd.f32 %v5548_v4, %v5547_v38  ;;  %5899 = vmatprep.subr.bf16.mxu0 %v6527_v29 }
 0x246   : > { %v5654_v54 = vpop.f32.mrb[67].mxu1  ;;  %6098 = vmatmul.mubr.bf16.gmra.mrb[172].mxu0 %v5079_v27 }
 0x247   : > { %v5655_v18 = vadd.f32 %v5654_v54, %v5653_v44  ;;  %v2775_v46 = vadd.f32 %v5549_v3, %v8214_v15  ;;  %6101 = vmatprep.mubr.msk.bf16.mxu0 %vm6853_vm2, %v9405_v61  ;;  %v8363_v51 = vadd.f32 %v5652_v7, %v2772_v6 }
 0x248   : > { %5900 = vmatpush3.bf16.msra.mxu0 %v6528_v32 }
 0x249   : > { %v5550_v2 = vpop.f32.mrb[68].mxu0  ;;  %v8365_v57 = vadd.f32 %v5655_v18, %v2775_v46 }
 0x24a   : > { %v5551_v47 = vpop.f32.mrb[69].mxu0 }
 0x24b   : > { %v5656_v17 = vpop.f32.mrb[68].mxu1  ;;  %v5552_v42 = vadd.f32 %v5551_v47, %v5550_v2  ;;  %v5553_v49 = vpop.f32.mrb[70].mxu0 }
 0x24c   : > { %v5657_v1 = vpop.f32.mrb[69].mxu1  ;;  %v5554_v56 = vpop.f32.mrb[71].mxu0 }
 0x24d   : > { %v5658_v0 = vadd.f32 %v5657_v1, %v5656_v17  ;;  %v5659_v15 = vpop.f32.mrb[70].mxu1  ;;  %v2780_v11 = vadd.f32 %v5552_v42, %v8222_v20  ;;  %v5555_v41 = vadd.f32 %v5554_v56, %v5553_v49 }
 0x24e   : > { %v5660_v61 = vpop.f32.mrb[71].mxu1  ;;  %6102 = vmatmul.mubr.bf16.gmra.mrb[176].mxu0 %v1855_v21 }
 0x24f   : > { %v5661_v16 = vadd.f32 %v5660_v61, %v5659_v15  ;;  %v2783_v27 = vadd.f32 %v5555_v41, %v8226_v43  ;;  %v8369_v36 = vadd.f32 %v5658_v0, %v2780_v11 }
 0x251   : > { %v5556_v28 = vpop.f32.mrb[72].mxu0  ;;  %v8371_v38 = vadd.f32 %v5661_v16, %v2783_v27 }
 0x252   : > { %v5557_v7 = vpop.f32.mrb[73].mxu0 }
 0x253   : > { %v5662_v24 = vpop.f32.mrb[72].mxu1  ;;  %v5558_v45 = vadd.f32 %v5557_v7, %v5556_v28  ;;  %v5559_v4 = vpop.f32.mrb[74].mxu0 }
 0x254   : > { %v5663_v44 = vpop.f32.mrb[73].mxu1  ;;  %v5560_v3 = vpop.f32.mrb[75].mxu0 }
 0x255   : > { %v5664_v54 = vadd.f32 %v5663_v44, %v5662_v24  ;;  %v5665_v6 = vpop.f32.mrb[74].mxu1  ;;  %v2788_v18 = vadd.f32 %v5558_v45, %v8233_v13  ;;  %v5561_v39 = vadd.f32 %v5560_v3, %v5559_v4  ;;  %v6529_v3 = vld [vmem:[#allocation8 + $0xc0] sm:$0xff]  }
 0x256   : > { %v5666_v20 = vpop.f32.mrb[75].mxu1  ;;  %5821 = vmatprep.subr.bf16.mxu1 %v6529_v3 }
 0x257   : > { %v5667_v40 = vadd.f32 %v5666_v20, %v5665_v6  ;;  %v2791_v43 = vadd.f32 %v5561_v39, %v8237_v48  ;;  %v8375_v37 = vadd.f32 %v5664_v54, %v2788_v18 }
 0x259   : > { %v5562_v46 = vpop.f32.mrb[76].mxu0  ;;  %v8377_v2 = vadd.f32 %v5667_v40, %v2791_v43 }
 0x25a   : > { %v5563_v17 = vpop.f32.mrb[77].mxu0 }
 0x25b   : > { %v5668_v19 = vpop.f32.mrb[76].mxu1  ;;  %v5564_v1 = vadd.f32 %v5563_v17, %v5562_v46  ;;  %v5565_v21 = vpop.f32.mrb[78].mxu0 }
 0x25c   : > { %v5669_v47 = vpop.f32.mrb[77].mxu1  ;;  %v5566_v49 = vpop.f32.mrb[79].mxu0 }
 0x25d   : > { %v5670_v29 = vadd.f32 %v5669_v47, %v5668_v19  ;;  %v5671_v42 = vpop.f32.mrb[78].mxu1  ;;  %v2796_v13 = vadd.f32 %v5564_v1, %v8242_v5  ;;  %v5567_v15 = vadd.f32 %v5566_v49, %v5565_v21 }
 0x25e   : > { %v5672_v0 = vpop.f32.mrb[79].mxu1 }
 0x25f   : > { %v5673_v32 = vadd.f32 %v5672_v0, %v5671_v42  ;;  %v2799_v48 = vadd.f32 %v5567_v15, %v8246_v26  ;;  %v8381_v56 = vadd.f32 %v5670_v29, %v2796_v13 }
 0x261   : > { %v5568_v61 = vpop.f32.mrb[80].mxu0  ;;  %v8383_v41 = vadd.f32 %v5673_v32, %v2799_v48 }
 0x262   : > { %v5569_v16 = vpop.f32.mrb[81].mxu0 }
 0x263   : > { %v5674_v11 = vpop.f32.mrb[80].mxu1  ;;  %v5570_v28 = vadd.f32 %v5569_v16, %v5568_v61  ;;  %v5571_v24 = vpop.f32.mrb[82].mxu0 }
 0x264   : > { %v5675_v27 = vpop.f32.mrb[81].mxu1  ;;  %v5572_v45 = vpop.f32.mrb[83].mxu0 }
 0x265   : > { %v5676_v7 = vadd.f32 %v5675_v27, %v5674_v11  ;;  %v5677_v44 = vpop.f32.mrb[82].mxu1  ;;  %v2804_v5 = vadd.f32 %v5570_v28, %v8251_v25  ;;  %v5573_v54 = vadd.f32 %v5572_v45, %v5571_v24 }
 0x266   : > { %v5678_v4 = vpop.f32.mrb[83].mxu1 }
 0x267   : > { %v5679_v6 = vadd.f32 %v5678_v4, %v5677_v44  ;;  %v2807_v26 = vadd.f32 %v5573_v54, %v8255_v62  ;;  %v8387_v20 = vadd.f32 %v5676_v7, %v2804_v5 }
 0x269   : > { %v5574_v18 = vpop.f32.mrb[84].mxu0  ;;  %v8389_v40 = vadd.f32 %v5679_v6, %v2807_v26 }
 0x26a   : > { %v5575_v43 = vpop.f32.mrb[85].mxu0 }
 0x26b   : > { %v5680_v39 = vpop.f32.mrb[84].mxu1  ;;  %v5576_v19 = vadd.f32 %v5575_v43, %v5574_v18  ;;  %v5577_v17 = vpop.f32.mrb[86].mxu0 }
 0x26c   : > { %v5681_v46 = vpop.f32.mrb[85].mxu1  ;;  %v5578_v21 = vpop.f32.mrb[87].mxu0 }
 0x26d   : > { %v5682_v47 = vadd.f32 %v5681_v46, %v5680_v39  ;;  %v5683_v1 = vpop.f32.mrb[86].mxu1  ;;  %v2812_v29 = vadd.f32 %v5576_v19, %v8260_v10  ;;  %v5579_v42 = vadd.f32 %v5578_v21, %v5577_v17 }
 0x26e   : > { %v5684_v25 = vpop.f32.mrb[87].mxu1 }
 0x26f   : > { %v5685_v49 = vadd.f32 %v5684_v25, %v5683_v1  ;;  %v2815_v62 = vadd.f32 %v5579_v42, %v8264_v59  ;;  %v8393_v0 = vadd.f32 %v5682_v47, %v2812_v29 }
 0x271   : > { %v5580_v13 = vpop.f32.mrb[88].mxu0  ;;  %v8395_v32 = vadd.f32 %v5685_v49, %v2815_v62 }
 0x272   : > { %v5581_v48 = vpop.f32.mrb[89].mxu0 }
 0x273   : > { %v5686_v15 = vpop.f32.mrb[88].mxu1  ;;  %v5582_v11 = vadd.f32 %v5581_v48, %v5580_v13  ;;  %v5583_v16 = vpop.f32.mrb[90].mxu0 }
 0x274   : > { %v5687_v61 = vpop.f32.mrb[89].mxu1  ;;  %v5584_v24 = vpop.f32.mrb[91].mxu0 }
 0x275   : > { %v5688_v27 = vadd.f32 %v5687_v61, %v5686_v15  ;;  %v5689_v28 = vpop.f32.mrb[90].mxu1  ;;  %v2820_v10 = vadd.f32 %v5582_v11, %v8269_v33  ;;  %v5585_v44 = vadd.f32 %v5584_v24, %v5583_v16 }
 0x276   : > { %v5690_v7 = vpop.f32.mrb[91].mxu1 }
 0x277   : > { %v5691_v45 = vadd.f32 %v5690_v7, %v5689_v28  ;;  %v2823_v59 = vadd.f32 %v5585_v44, %v8273_v52  ;;  %v8399_v4 = vadd.f32 %v5688_v27, %v2820_v10 }
 0x279   : > { %v5586_v5 = vpop.f32.mrb[92].mxu0  ;;  %v8401_v6 = vadd.f32 %v5691_v45, %v2823_v59 }
 0x27a   : > { %v5587_v3 = vpop.f32.mrb[93].mxu0 }
 0x27b   : > { %v5692_v54 = vpop.f32.mrb[92].mxu1  ;;  %v5588_v18 = vadd.f32 %v5587_v3, %v5586_v5  ;;  %v5589_v39 = vpop.f32.mrb[94].mxu0 }
 0x27c   : > { %v5693_v26 = vpop.f32.mrb[93].mxu1  ;;  %v5590_v19 = vpop.f32.mrb[95].mxu0 }
 0x27d   : > { %v5694_v43 = vadd.f32 %v5693_v26, %v5692_v54  ;;  %v5695_v46 = vpop.f32.mrb[94].mxu1  ;;  %v2828_v33 = vadd.f32 %v5588_v18, %v8278_v53  ;;  %v5591_v47 = vadd.f32 %v5590_v19, %v5589_v39 }
 0x27e   : > { %v5696_v17 = vpop.f32.mrb[95].mxu1 }
 0x27f   : > { %v5697_v1 = vadd.f32 %v5696_v17, %v5695_v46  ;;  %v2831_v52 = vadd.f32 %v5591_v47, %v8282_v58  ;;  %v8405_v21 = vadd.f32 %v5694_v43, %v2828_v33  ;;  %v8415_v43 = vld [vmem:[#allocation8 + $0x200] sm:$0xff]  }
 0x280   : > { %6105 = vmatprep.subr.bf16.mxu0 %v8415_v43 }
 0x281   : > { %v5592_v25 = vpop.f32.mrb[96].mxu0  ;;  %v8407_v42 = vadd.f32 %v5697_v1, %v2831_v52 }
 0x282   : > { %v5593_v49 = vpop.f32.mrb[97].mxu0 }
 0x283   : > { %v5698_v29 = vpop.f32.mrb[96].mxu1  ;;  %v5594_v13 = vadd.f32 %v5593_v49, %v5592_v25  ;;  %v5595_v15 = vpop.f32.mrb[98].mxu0 }
 0x284   : > { %v5699_v62 = vpop.f32.mrb[97].mxu1  ;;  %v5596_v11 = vpop.f32.mrb[99].mxu0 }
 0x285   : > { %v5700_v48 = vadd.f32 %v5699_v62, %v5698_v29  ;;  %v5701_v61 = vpop.f32.mrb[98].mxu1  ;;  %v2836_v53 = vadd.f32 %v5594_v13, %v8287_v8  ;;  %v5597_v27 = vadd.f32 %v5596_v11, %v5595_v15 }
 0x286   : > { %v5702_v16 = vpop.f32.mrb[99].mxu1 }
 0x287   : > { %v5703_v28 = vadd.f32 %v5702_v16, %v5701_v61  ;;  %v2839_v58 = vadd.f32 %v5597_v27, %v8291_v30  ;;  %v8411_v24 = vadd.f32 %v5700_v48, %v2836_v53 }
 0x289   : > { %v5598_v7 = vpop.f32.mrb[100].mxu0  ;;  %v8413_v44 = vadd.f32 %v5703_v28, %v2839_v58 }
 0x28a   : > { %v5599_v45 = vpop.f32.mrb[101].mxu0 }
 0x28b   : > { %v5704_v10 = vpop.f32.mrb[100].mxu1  ;;  %v5600_v5 = vadd.f32 %v5599_v45, %v5598_v7  ;;  %v5601_v54 = vpop.f32.mrb[102].mxu0 }
 0x28c   : > { %v5705_v59 = vpop.f32.mrb[101].mxu1  ;;  %v5602_v18 = vpop.f32.mrb[103].mxu0 }
 0x28d   : > { %v5706_v3 = vadd.f32 %v5705_v59, %v5704_v10  ;;  %v5707_v26 = vpop.f32.mrb[102].mxu1  ;;  %v2844_v8 = vadd.f32 %v5600_v5, %v8296_v12  ;;  %v5603_v46 = vadd.f32 %v5602_v18, %v5601_v54 }
 0x28e   : > { %v5708_v39 = vpop.f32.mrb[103].mxu1 }
 0x28f   : > { %v5709_v30 = vadd.f32 %v5708_v39, %v5707_v26  ;;  %v2847_v19 = vadd.f32 %v5603_v46, %v8301_v60  ;;  %v8420_v17 = vadd.f32 %v5706_v3, %v2844_v8 }
 0x291   : > { %v5604_v33 = vpop.f32.mrb[104].mxu0  ;;  %v8422_v1 = vadd.f32 %v5709_v30, %v2847_v19 }
 0x292   : > { %v5605_v52 = vpop.f32.mrb[105].mxu0 }
 0x293   : > { %v5710_v47 = vpop.f32.mrb[104].mxu1  ;;  %v5606_v29 = vadd.f32 %v5605_v52, %v5604_v33  ;;  %v5607_v49 = vpop.f32.mrb[106].mxu0 }
 0x294   : > { %v5711_v25 = vpop.f32.mrb[105].mxu1  ;;  %v5608_v15 = vpop.f32.mrb[107].mxu0 }
 0x295   : > { %v5712_v62 = vadd.f32 %v5711_v25, %v5710_v47  ;;  %v5713_v13 = vpop.f32.mrb[106].mxu1  ;;  %v2852_v48 = vadd.f32 %v5606_v29, %v8309_v63  ;;  %v5609_v61 = vadd.f32 %v5608_v15, %v5607_v49 }
 0x296   : > { %v5714_v12 = vpop.f32.mrb[107].mxu1 }
 0x297   : > { %v5715_v11 = vadd.f32 %v5714_v12, %v5713_v13  ;;  %v2855_v60 = vadd.f32 %v5609_v61, %v8314_v23  ;;  %v8426_v16 = vadd.f32 %v5712_v62, %v2852_v48 }
 0x299   : > { %v5610_v53 = vpop.f32.mrb[108].mxu0  ;;  %v8428_v28 = vadd.f32 %v5715_v11, %v2855_v60 }
 0x29a   : > { %v5611_v58 = vpop.f32.mrb[109].mxu0 }
 0x29b   : > { %v5716_v27 = vpop.f32.mrb[108].mxu1  ;;  %v5612_v10 = vadd.f32 %v5611_v58, %v5610_v53  ;;  %v5613_v45 = vpop.f32.mrb[110].mxu0 }
 0x29c   : > { %v5717_v7 = vpop.f32.mrb[109].mxu1  ;;  %v5614_v54 = vpop.f32.mrb[111].mxu0 }
 0x29d   : > { %v5718_v59 = vadd.f32 %v5717_v7, %v5716_v27  ;;  %v5719_v5 = vpop.f32.mrb[110].mxu1  ;;  %v2860_v63 = vadd.f32 %v5612_v10, %v8320_v35  ;;  %v5615_v26 = vadd.f32 %v5614_v54, %v5613_v45  ;;  %v3230_v27 = vlaneseq }
 0x29e   : > { %v5720_v3 = vpop.f32.mrb[111].mxu1 }
 0x29f   : > { %v5721_v18 = vadd.f32 %v5720_v3, %v5719_v5  ;;  %v2863_v23 = vadd.f32 %v5615_v26, %v8325_v22  ;;  %v8432_v39 = vadd.f32 %v5718_v59, %v2860_v63  ;;  %v8443_v5 = vstv %s5156_s6  ;;  %s6717_s6 = sshll.u32 %s6854_s2, 4  ;;  %s6718_s6 = int_to_ptr.vmem [resolvable:$false] %s6717_s6 }
 0x2a0   : > { %v8446_v63 = vshrl.u32 %v3230_v27, 7  ;;  %vm3234_vm3 = vcmp.ge.s32.totalorder %v8443_v5, 0  ;;  %vm3244_vm4 = vcmp.lt.s32.totalorder %v8443_v5, 16  ;;  %s6719_s21 = scalar_lea.vmem %s6718_s6, 4096  ;;  %p6720_p10 = scmp.lt.s32.totalorder %s9231_s15, %s6718_s6 }
 0x2a1   : > { %v5616_v8 = vpop.f32.mrb[112].mxu0  ;;  %v8434_v30 = vadd.f32 %v5721_v18, %v2863_v23  ;;  %vm8456_vm5 = vmand %vm3234_vm3, %vm3244_vm4  ;;  %p6721_p11 = scmp.lt.s32.totalorder %s6719_s21, %s6713_s29 }
 0x2a2   : > { %v5617_v19 = vpop.f32.mrb[113].mxu0  ;;  %vm3264_vm6 = vcmp.ge.s32.totalorder %v8446_v63, 1 }
 0x2a3   : > { %v5722_v46 = vpop.f32.mrb[112].mxu1  ;;  %v5618_v47 = vadd.f32 %v5617_v19, %v5616_v8  ;;  %v5619_v52 = vpop.f32.mrb[114].mxu0  ;;  %vm8469_vm7 = vmand %vm8456_vm5, %vm3264_vm6  ;;  %p6722_p0 = por %p6721_p11, %p6720_p10 }
 0x2a4   : > { %v5723_v33 = vpop.f32.mrb[113].mxu1  ;;  %v5620_v49 = vpop.f32.mrb[115].mxu0  ;;  %vm5230_vm14 = vmpackc.low %vm8456_vm5, %vm8469_vm7 }
 0x2a5   : > { %v5724_v25 = vadd.f32 %v5723_v33, %v5722_v46  ;;  %v5725_v29 = vpop.f32.mrb[114].mxu1  ;;  %v2868_v35 = vadd.f32 %v5618_v47, %v8329_v55  ;;  %v5621_v13 = vadd.f32 %v5620_v49, %v5619_v52  ;;  %p6723_p5 = pnand %p6722_p0, %p6716_p13 }
 0x2a6   : > { %v5726_v62 = vpop.f32.mrb[115].mxu1 }
 0x2a7   : > { %v5727_v15 = vadd.f32 %v5726_v62, %v5725_v29  ;;  %v2871_v22 = vadd.f32 %v5621_v13, %v8334_v34  ;;  %v8439_v12 = vadd.f32 %v5724_v25, %v2868_v35  ;;  %v8463_v25 = vadd.s32 16, %v8446_v63 }
 0x2a9   : > { %v5622_v48 = vpop.f32.mrb[116].mxu0  ;;  %v8441_v11 = vadd.f32 %v5727_v15, %v2871_v22  ;;  %vm9342_vm8 = vcmp.le.s32.totalorder %v8463_v25, 16  ;;  %v3221_v15 = vadd.s32 1, %v8443_v5 }
 0x2aa   : > { %v5623_v60 = vpop.f32.mrb[117].mxu0  ;;  %vm3302_vm9 = vmand %vm8456_vm5, %vm9342_vm8 }
 0x2ab   : > { %v5728_v61 = vpop.f32.mrb[116].mxu1  ;;  %v5624_v58 = vadd.f32 %v5623_v60, %v5622_v48  ;;  %v5625_v7 = vpop.f32.mrb[118].mxu0  ;;  %vm3235_vm10 = vcmp.ge.s32.totalorder %v3221_v15, 0  ;;  %vm3245_vm11 = vcmp.lt.s32.totalorder %v3221_v15, 16 }
 0x2ac   : > { %v5729_v53 = vpop.f32.mrb[117].mxu1  ;;  %v5626_v55 = vpop.f32.mrb[119].mxu0  ;;  %vm8485_vm12 = vmand %vm3235_vm10, %vm3245_vm11 }
 0x2ad   : > { %v5730_v10 = vadd.f32 %v5729_v53, %v5728_v61  ;;  %v5731_v45 = vpop.f32.mrb[118].mxu1  ;;  %v2876_v34 = vadd.f32 %v5624_v58, %v8341_v9  ;;  %v5627_v54 = vadd.f32 %v5626_v55, %v5625_v7  ;;  %vm8494_vm13 = vmand %vm8485_vm12, %vm3264_vm6 }
 0x2ae   : > { %v5732_v59 = vpop.f32.mrb[119].mxu1  ;;  %vm3305_vm15 = vmand %vm8485_vm12, %vm9342_vm8 }
 0x2af   : > { %v5733_v3 = vadd.f32 %v5732_v59, %v5731_v45  ;;  %v2879_v26 = vadd.f32 %v5627_v54, %v8346_v50  ;;  %v8451_v18 = vadd.f32 %v5730_v10, %v2876_v34 }
 0x2b1   : > { %v3069_v23 = vpop.f32.mrb[120].mxu0  ;;  %v8453_v8 = vadd.f32 %v5733_v3, %v2879_v26 }
 0x2b2   : > { %v3070_v46 = vadd.f32 %v3069_v23, %v8355_v14  ;;  %v6047_v9 = vpop.f32.mrb[121].mxu0 }
 0x2b3   : > { %v3072_v33 = vpop.f32.mrb[122].mxu0  ;;  %v6554_v9 = vld [vmem:[#allocation8 + $0x1c8] sm:$0xff]  }
 0x2b4   : > { %v3188_v50 = vmax.f32 %v3070_v46, 0.0  ;;  %v3073_v47 = vadd.f32 %v3072_v33, %v8357_v31  ;;  %v6048_v52 = vpop.f32.mrb[123].mxu0 }
 0x2b6   : > { %v3189_v29 = vmax.f32 %v3073_v47, 0.0  ;;  %v3330_v49 = vsel %vm8469_vm7, %v3188_v50, 0.0  ;;  %v3222_v47 = vadd.s32 2, %v8443_v5  ;;  %vm9341_vm7 = vmpackc.low %vm8485_vm12, %vm8494_vm13 }
 0x2b8   : > { %v3331_v62 = vsel %vm8456_vm5, %v3189_v29, 0.0  ;;  %v5231_v31 = vpack.c.bf16 %v3189_v29, %v3188_v50  ;;  %vm3236_vm2 = vcmp.ge.s32.totalorder %v3222_v47, 0  ;;  %vm3246_vm3 = vcmp.lt.s32.totalorder %v3222_v47, 16 }
 0x2b9   : > { %v3360_v35 = vpack.c.bf16 %v3331_v62, %v3330_v49  ;;  %v3077_v13 = vpop.f32.mrb[124].mxu0  ;;  %v6530_v62 = vld [vmem:[#allocation8 + $0x80] sm:$0xff]   ;;  %vm8519_vm4 = vmand %vm3236_vm2, %vm3246_vm3 }
 0x2ba   : > { %v3078_v22 = vadd.f32 %v3077_v13, %v8363_v51  ;;  %v6051_v48 = vpop.f32.mrb[125].mxu0  ;;  %v6531_v13 = vld [vmem:[#allocation8 + $0xc8] sm:$0xff]   ;;  %vm8528_vm5 = vmand %vm8519_vm4, %vm3264_vm6 }
 0x2bb   : > { %v3383_v61 = vshll.u32 %v3360_v35, 16  ;;  %v3080_v60 = vpop.f32.mrb[126].mxu0  ;;  %v3500_v51 = vrot.slane %v3360_v35, 1  ;;  %v3381_v3 = vshrl.u32 %v3360_v35, 16  ;;  %vm8597_vm2 = vmpackc.low %vm8519_vm4, %vm8528_vm5 }
 0x2bc   : > { %v3190_v53 = vmax.f32 %v3078_v22, 0.0  ;;  %v3081_v27 = vadd.f32 %v3080_v60, %v8365_v57  ;;  %v6052_v58 = vpop.f32.mrb[127].mxu0 }
 0x2bd   : > { %v3385_v45 = vrot.slane %v3383_v61, 1  ;;  %v6532_v61 = vld [vmem:[#allocation8 + $0x88] sm:$0xff]   ;;  %v6533_v58 = vld [vmem:[#allocation8 + $0xd0] sm:$0xff]  }
 0x2be   : > { %v3332_v7 = vsel %vm3302_vm9, %v3190_v53, 0.0  ;;  %v3191_v26 = vmax.f32 %v3081_v27, 0.0  ;;  %vm3308_vm9 = vmand %vm8519_vm4, %vm9342_vm8 }
 0x2bf   : > { %v3361_v10 = vpack.c.bf16 %v3332_v7, %v3332_v7  ;;  %v3386_v50 = vor.u32 %v3385_v45, %v3381_v3 }
 0x2c0   : > { %v3333_v15 = vsel %vm8494_vm13, %v3191_v26, 0.0 }
 0x2c1   : > { %v3388_v59 = vshll.u32 %v3361_v10, 16  ;;  %v3501_v34 = vrot.slane %v3361_v10, 1  ;;  %v3085_v54 = vpop.f32.mrb[128].mxu0 }
 0x2c2   : > { %v3086_v23 = vadd.f32 %v3085_v54, %v8369_v36  ;;  %v6055_v46 = vpop.f32.mrb[129].mxu0 }
 0x2c3   : > { %v3390_v57 = vrot.slane %v3388_v59, 1  ;;  %v3088_v33 = vpop.f32.mrb[130].mxu0  ;;  %v8500_v52 = vsel %vm9344_vm1, %v3500_v51, %v3501_v34 }
 0x2c4   : > { %v3192_v36 = vmax.f32 %v3086_v23, 0.0  ;;  %v3089_v29 = vadd.f32 %v3088_v33, %v8371_v38  ;;  %v6056_v49 = vpop.f32.mrb[131].mxu0 }
 0x2c5   : > { %v3391_v35 = vsel %vm9343_vm0, %v3386_v50, %v3390_v57  ;;  %v6535_v49 = vld [vmem:[#allocation8 + $0xd8] sm:$0xff]  }
 0x2c6   : > { %v3334_v19 = vsel %vm8485_vm12, %v3192_v36, 0.0  ;;  %v8516_v14 = vpack.c.bf16 %v3192_v36, %v3191_v26  ;;  %v3193_v22 = vmax.f32 %v3089_v29, 0.0  ;;  %4185 = vmatprep.mubr.bf16.mxu1 %v3391_v35  ;;  %v8540_v36 = vld [vmem:[#allocation8 + $0x208] sm:$0xff]  }
 0x2c7   : > { %v3362_v38 = vpack.c.bf16 %v3334_v19, %v3333_v15  ;;  %5232 = vmatmul.mubr.msk.bf16.vlgmr.msra.gmra.mrb[120].mxu1 %vm5230_vm14, %v5231_v31 }
 0x2c8   : > { %v3335_v48 = vsel %vm3305_vm15, %v3193_v22, 0.0  ;;  %5822 = vmatpush3.bf16.msra.mxu1 %v6530_v62  ;;  %v3223_v22 = vadd.s32 3, %v8443_v5 }
 0x2c9   : > { %v3395_v60 = vshll.u32 %v3362_v38, 16  ;;  %v3363_v53 = vpack.c.bf16 %v3335_v48, %v3335_v48  ;;  %v3093_v27 = vpop.f32.mrb[132].mxu0  ;;  %5823 = vmatprep.subr.bf16.mxu1 %v6531_v13  ;;  %v3503_v51 = vrot.slane %v3362_v38, 1  ;;  %v3393_v54 = vshrl.u32 %v3362_v38, 16 }
 0x2ca   : > { %v3094_v7 = vadd.f32 %v3093_v27, %v8375_v37  ;;  %v6059_v45 = vpop.f32.mrb[133].mxu0  ;;  %vm3237_vm10 = vcmp.ge.s32.totalorder %v3223_v22, 0  ;;  %vm3247_vm11 = vcmp.lt.s32.totalorder %v3223_v22, 16 }
 0x2cb   : > { %v3400_v59 = vshll.u32 %v3363_v53, 16  ;;  %v3504_v31 = vrot.slane %v3363_v53, 1  ;;  %v3096_v34 = vpop.f32.mrb[134].mxu0  ;;  %v3397_v3 = vrot.slane %v3395_v60, 1  ;;  %v8559_v60 = vld [vmem:[#allocation8 + $0x210] sm:$0xff]   ;;  %vm8570_vm14 = vmand %vm3237_vm10, %vm3247_vm11 }
 0x2cc   : > { %v3194_v26 = vmax.f32 %v3094_v7, 0.0  ;;  %v3097_v23 = vadd.f32 %v3096_v34, %v8377_v2  ;;  %v6060_v46 = vpop.f32.mrb[135].mxu0  ;;  %5824 = vmatpush3.bf16.msra.mxu1 %v6532_v61  ;;  %v6534_v2 = vld [vmem:[#allocation8 + $0x90] sm:$0xff]   ;;  %v6536_v61 = vld [vmem:[#allocation8 + $0x98] sm:$0xff]   ;;  %vm8581_vm15 = vmand %vm8570_vm14, %vm3264_vm6 }
 0x2cd   : > { %v3402_v57 = vrot.slane %v3400_v59, 1  ;;  %v8533_v33 = vsel %vm9344_vm1, %v3503_v51, %v3504_v31  ;;  %v3398_v50 = vor.u32 %v3397_v3, %v3393_v54  ;;  %5825 = vmatprep.subr.bf16.mxu1 %v6533_v58  ;;  %v6537_v58 = vld [vmem:[#allocation8 + $0xe0] sm:$0xff]   ;;  %v8568_v59 = vld [vmem:[#allocation8 + $0x218] sm:$0xff]   ;;  %v6539_v54 = vld [vmem:[#allocation8 + $0xe8] sm:$0xff]  }
 0x2ce   : > { %v3195_v47 = vmax.f32 %v3097_v23, 0.0  ;;  %4379 = vmatprep.mubr.bf16.mxu0 %v8533_v33  ;;  %v3336_v62 = vsel %vm8528_vm5, %v3194_v26, 0.0  ;;  %v6538_v51 = vld [vmem:[#allocation8 + $0xa0] sm:$0xff]   ;;  %vm8605_vm3 = vmand %vm8570_vm14, %vm9342_vm8 }
 0x2cf   : > { %v3403_v29 = vsel %vm9343_vm0, %v3398_v50, %v3402_v57  ;;  %vm8656_vm11 = vmpackc.low %vm8570_vm14, %vm8581_vm15 }
 0x2d0   : > { %v3337_v35 = vsel %vm8519_vm4, %v3195_v47, 0.0  ;;  %v8547_v13 = vpack.c.bf16 %v3195_v47, %v3194_v26  ;;  %4193 = vmatprep.mubr.bf16.mxu1 %v3403_v29  ;;  %4380 = vmatmul.mubr.bf16.vlgmr.msra.gmra.mrb[180].mxu0 %v3403_v29 }
 0x2d1   : > { %v3364_v15 = vpack.c.bf16 %v3337_v35, %v3336_v62  ;;  %v3101_v19 = vpop.f32.mrb[136].mxu0  ;;  %5235 = vmatmul.mubr.msk.bf16.gmra.mrb[124].mxu1 %vm9341_vm7, %v8516_v14  ;;  %6106 = vmatpush3.bf16.msra.mxu0 %v8415_v43 }
 0x2d2   : > { %v3102_v38 = vadd.f32 %v3101_v19, %v8381_v56  ;;  %v6063_v48 = vpop.f32.mrb[137].mxu0  ;;  %5826 = vmatpush3.bf16.msra.mxu1 %v6534_v2  ;;  %6107 = vmatprep.subr.bf16.mxu0 %v8540_v36  ;;  %v8589_v19 = vld [vmem:[#allocation8 + $0x220] sm:$0xff]  }
 0x2d3   : > { %v3407_v53 = vshll.u32 %v3364_v15, 16  ;;  %v3104_v27 = vpop.f32.mrb[138].mxu0  ;;  %5827 = vmatprep.subr.bf16.mxu1 %v6535_v49  ;;  %v3506_v46 = vrot.slane %v3364_v15, 1  ;;  %v3405_v57 = vshrl.u32 %v3364_v15, 16 }
 0x2d4   : > { %v3196_v7 = vmax.f32 %v3102_v38, 0.0  ;;  %v3105_v43 = vadd.f32 %v3104_v27, %v8383_v41  ;;  %v6064_v56 = vpop.f32.mrb[139].mxu0 }
 0x2d5   : > { %6108 = vmatpush3.bf16.msra.mxu0 %v8540_v36  ;;  %v3409_v34 = vrot.slane %v3407_v53, 1  ;;  %v6540_v53 = vld [vmem:[#allocation8 + $0xa8] sm:$0xff]  }
 0x2d6   : > { %v3338_v45 = vsel %vm3308_vm9, %v3196_v7, 0.0  ;;  %5828 = vmatpush3.bf16.msra.mxu1 %v6536_v61  ;;  %6109 = vmatprep.subr.bf16.mxu0 %v8559_v60  ;;  %v3197_v50 = vmax.f32 %v3105_v43, 0.0  ;;  %v8621_v56 = vld [vmem:[#allocation8 + $0x228] sm:$0xff]  }
 0x2d7   : > { %v3365_v31 = vpack.c.bf16 %v3338_v45, %v3338_v45  ;;  %5829 = vmatprep.subr.bf16.mxu1 %v6537_v58  ;;  %v3410_v15 = vor.u32 %v3409_v34, %v3405_v57  ;;  %v6542_v58 = vld [vmem:[#allocation8 + $0xf0] sm:$0xff]  }
 0x2d8   : > { %v3339_v10 = vsel %vm8581_vm15, %v3197_v50, 0.0 }
 0x2d9   : > { %v3412_v41 = vshll.u32 %v3365_v31, 16  ;;  %v3507_v26 = vrot.slane %v3365_v31, 1  ;;  %v3109_v23 = vpop.f32.mrb[140].mxu0  ;;  %6110 = vmatpush3.bf16.msra.mxu0 %v8559_v60  ;;  %v6543_v31 = vld [vmem:[#allocation8 + $0xb0] sm:$0xff]  }
 0x2da   : > { %v3110_v47 = vadd.f32 %v3109_v23, %v8387_v20  ;;  %v6067_v2 = vpop.f32.mrb[141].mxu0  ;;  %5830 = vmatpush3.bf16.msra.mxu1 %v6538_v51  ;;  %6111 = vmatprep.subr.bf16.mxu0 %v8568_v59  ;;  %v3224_v20 = vadd.s32 4, %v8443_v5 }
 0x2db   : > { %v3414_v29 = vrot.slane %v3412_v41, 1  ;;  %v3112_v62 = vpop.f32.mrb[142].mxu0  ;;  %v8586_v35 = vsel %vm9344_vm1, %v3506_v46, %v3507_v26  ;;  %5831 = vmatprep.subr.bf16.mxu1 %v6539_v54  ;;  %v6546_v26 = vld [vmem:[#allocation8 + $0xf8] sm:$0xff]  }
 0x2dc   : > { %v3198_v22 = vmax.f32 %v3110_v47, 0.0  ;;  %v3113_v38 = vadd.f32 %v3112_v62, %v8389_v40  ;;  %v6068_v48 = vpop.f32.mrb[143].mxu0  ;;  %4387 = vmatprep.mubr.bf16.mxu0 %v8586_v35  ;;  %vm3238_vm4 = vcmp.ge.s32.totalorder %v3224_v20, 0  ;;  %vm3248_vm5 = vcmp.lt.s32.totalorder %v3224_v20, 16  ;;  %v8636_v47 = vld [vmem:[#allocation8 + $0x230] sm:$0xff]  }
 0x2dd   : > { %v8610_v40 = vsel %vm9343_vm0, %v3410_v15, %v3414_v29  ;;  %6112 = vmatpush3.bf16.msra.mxu0 %v8568_v59  ;;  %vm8631_vm9 = vmand %vm3238_vm4, %vm3248_vm5 }
 0x2de   : > { %v3340_v37 = vsel %vm8570_vm14, %v3198_v22, 0.0  ;;  %v8617_v7 = vpack.c.bf16 %v3198_v22, %v3197_v50  ;;  %v3199_v43 = vmax.f32 %v3113_v38, 0.0  ;;  %4201 = vmatprep.mubr.bf16.mxu1 %v8610_v40  ;;  %4388 = vmatmul.mubr.bf16.gmra.mrb[184].mxu0 %v8610_v40  ;;  %vm8643_vm10 = vmand %vm8631_vm9, %vm3264_vm6 }
 0x2df   : > { %v3366_v45 = vpack.c.bf16 %v3340_v37, %v3339_v10  ;;  %5238 = vmatmul.mubr.msk.bf16.gmra.mrb[128].mxu1 %vm8597_vm2, %v8547_v13  ;;  %6113 = vmatprep.subr.bf16.mxu0 %v8589_v19  ;;  %v6547_v37 = vld [vmem:[#allocation8 + $0xb8] sm:$0xff]   ;;  %vm3314_vm14 = vmand %vm8631_vm9, %vm9342_vm8 }
 0x2e0   : > { %v3341_v51 = vsel %vm8605_vm3, %v3199_v43, 0.0  ;;  %5832 = vmatpush3.bf16.msra.mxu1 %v6540_v53  ;;  %v8661_v43 = vld [vmem:[#allocation8 + $0x238] sm:$0xff]  }
 0x2e1   : > { %v3419_v34 = vshll.u32 %v3366_v45, 16  ;;  %v3367_v54 = vpack.c.bf16 %v3341_v51, %v3341_v51  ;;  %v3117_v41 = vpop.f32.mrb[144].mxu0  ;;  %5833 = vmatprep.subr.bf16.mxu1 %v6542_v58  ;;  %6114 = vmatpush3.bf16.msra.mxu0 %v8589_v19  ;;  %v3509_v50 = vrot.slane %v3366_v45, 1  ;;  %v3417_v15 = vshrl.u32 %v3366_v45, 16  ;;  %v6550_v51 = vld [vmem:[#allocation8 + $0x1c0] sm:$0xff]  }
 0x2e2   : > { %v3118_v23 = vadd.f32 %v3117_v41, %v8393_v0  ;;  %v6071_v57 = vpop.f32.mrb[145].mxu0  ;;  %6115 = vmatprep.subr.bf16.mxu0 %v8621_v56  ;;  %v3225_v41 = vadd.s32 5, %v8443_v5 }
 0x2e3   : > { %v3424_v2 = vshll.u32 %v3367_v54, 16  ;;  %v3510_v29 = vrot.slane %v3367_v54, 1  ;;  %v3120_v62 = vpop.f32.mrb[146].mxu0  ;;  %v3421_v20 = vrot.slane %v3419_v34, 1 }
 0x2e4   : > { %v3200_v22 = vmax.f32 %v3118_v23, 0.0  ;;  %v3121_v38 = vadd.f32 %v3120_v62, %v8395_v32  ;;  %v6072_v48 = vpop.f32.mrb[147].mxu0  ;;  %5834 = vmatpush3.bf16.msra.mxu1 %v6543_v31  ;;  %vm3239_vm15 = vcmp.ge.s32.totalorder %v3225_v41, 0  ;;  %vm3249_vm3 = vcmp.lt.s32.totalorder %v3225_v41, 16 }
 0x2e5   : > { %v3426_v0 = vrot.slane %v3424_v2, 1  ;;  %v8648_v27 = vsel %vm9344_vm1, %v3509_v50, %v3510_v29  ;;  %v3422_v58 = vor.u32 %v3421_v20, %v3417_v15  ;;  %5835 = vmatprep.subr.bf16.mxu1 %v6546_v26  ;;  %6116 = vmatpush3.bf16.msra.mxu0 %v8621_v56  ;;  %vm8687_vm4 = vmand %vm3239_vm15, %vm3249_vm3 }
 0x2e6   : > { %v3201_v10 = vmax.f32 %v3121_v38, 0.0  ;;  %4395 = vmatprep.mubr.bf16.mxu0 %v8648_v27  ;;  %6117 = vmatprep.subr.bf16.mxu0 %v8636_v47  ;;  %v3342_v31 = vsel %vm8643_vm10, %v3200_v22, 0.0  ;;  %vm8696_vm5 = vmand %vm8687_vm4, %vm3264_vm6 }
 0x2e7   : > { %v8664_v45 = vsel %vm9343_vm0, %v3422_v58, %v3426_v0  ;;  %vm3317_vm15 = vmand %vm8687_vm4, %vm9342_vm8 }
 0x2e8   : > { %v3343_v49 = vsel %vm8631_vm9, %v3201_v10, 0.0  ;;  %v8670_v3 = vpack.c.bf16 %v3201_v10, %v3200_v22  ;;  %4209 = vmatprep.mubr.bf16.mxu1 %v8664_v45  ;;  %4396 = vmatmul.mubr.bf16.gmra.mrb[188].mxu0 %v8664_v45 }
 0x2e9   : > { %v3368_v34 = vpack.c.bf16 %v3343_v49, %v3342_v31  ;;  %v3125_v54 = vpop.f32.mrb[148].mxu0  ;;  %5241 = vmatmul.mubr.msk.bf16.gmra.mrb[132].mxu1 %vm8656_vm11, %v8617_v7  ;;  %6118 = vmatpush3.bf16.msra.mxu0 %v8636_v47 }
 0x2ea   : > { %v3126_v26 = vadd.f32 %v3125_v54, %v8399_v4  ;;  %v6075_v23 = vpop.f32.mrb[149].mxu0  ;;  %5836 = vmatpush3.bf16.msra.mxu1 %v6547_v37  ;;  %6119 = vmatprep.subr.bf16.mxu0 %v8661_v43 }
 0x2eb   : > { %v3431_v57 = vshll.u32 %v3368_v34, 16  ;;  %v3128_v50 = vpop.f32.mrb[150].mxu0  ;;  %5949 = vmatprep.subr.bf16.mxu1 %v6550_v51  ;;  %v3512_v58 = vrot.slane %v3368_v34, 1  ;;  %v3429_v10 = vshrl.u32 %v3368_v34, 16  ;;  %v3226_v34 = vadd.s32 6, %v8443_v5 }
 0x2ec   : > { %v3202_v2 = vmax.f32 %v3126_v26, 0.0  ;;  %v3129_v29 = vadd.f32 %v3128_v50, %v8401_v6  ;;  %v6076_v62 = vpop.f32.mrb[151].mxu0 }
 0x2ed   : > { %6120 = vmatpush3.bf16.msra.mxu0 %v8661_v43  ;;  %v3433_v20 = vrot.slane %v3431_v57, 1 }
 0x2ee   : > { %v3344_v4 = vsel %vm3314_vm14, %v3202_v2, 0.0  ;;  %v3203_v37 = vmax.f32 %v3129_v29, 0.0  ;;  %vm8710_vm14 = vmpackc.low %vm8631_vm9, %vm8643_vm10  ;;  %vm3240_vm9 = vcmp.ge.s32.totalorder %v3226_v34, 0  ;;  %vm3250_vm10 = vcmp.lt.s32.totalorder %v3226_v34, 16 }
 0x2ef   : > { %v3369_v15 = vpack.c.bf16 %v3344_v4, %v3344_v4  ;;  %v3434_v26 = vor.u32 %v3433_v20, %v3429_v10  ;;  %vm8733_vm3 = vmand %vm3240_vm9, %vm3250_vm10 }
 0x2f0   : > { %vm8754_vm9 = vmpackc.low %vm8687_vm4, %vm8696_vm5 }
 0x2f1   : > { %v3436_v38 = vshll.u32 %v3369_v15, 16  ;;  %v3513_v48 = vrot.slane %v3369_v15, 1  ;;  %v3133_v0 = vpop.f32.mrb[152].mxu0 }
 0x2f2   : > { %v3134_v6 = vadd.f32 %v3133_v0, %v8405_v21  ;;  %v6079_v51 = vpop.f32.mrb[153].mxu0 }
 0x2f3   : > { %v3438_v31 = vrot.slane %v3436_v38, 1  ;;  %v3136_v54 = vpop.f32.mrb[154].mxu0  ;;  %v8701_v41 = vsel %vm9344_vm1, %v3512_v58, %v3513_v48 }
 0x2f4   : > { %v3204_v23 = vmax.f32 %v3134_v6, 0.0  ;;  %v3137_v21 = vadd.f32 %v3136_v54, %v8407_v42  ;;  %v6080_v57 = vpop.f32.mrb[155].mxu0  ;;  %4403 = vmatprep.mubr.bf16.mxu0 %v8701_v41  ;;  %v3345_v42 = vsel %vm8696_vm5, %v3203_v37, 0.0 }
 0x2f5   : > { %v8719_v2 = vsel %vm9343_vm0, %v3434_v26, %v3438_v31 }
 0x2f6   : > { %v3346_v53 = vsel %vm8687_vm4, %v3204_v23, 0.0  ;;  %v8725_v29 = vpack.c.bf16 %v3204_v23, %v3203_v37  ;;  %v3205_v46 = vmax.f32 %v3137_v21, 0.0  ;;  %4217 = vmatprep.mubr.bf16.mxu1 %v8719_v2  ;;  %4404 = vmatmul.mubr.bf16.gmra.mrb[192].mxu0 %v8719_v2  ;;  %vm3320_vm4 = vmand %vm8733_vm3, %vm9342_vm8 }
 0x2f7   : > { %v3370_v62 = vpack.c.bf16 %v3346_v53, %v3345_v42  ;;  %5244 = vmatmul.mubr.msk.bf16.gmra.mrb[136].mxu1 %vm8710_vm14, %v8670_v3 }
 0x2f8   : > { %v3347_v4 = vsel %vm3317_vm15, %v3205_v46, 0.0  ;;  %vm8742_vm15 = vmand %vm8733_vm3, %vm3264_vm6 }
 0x2f9   : > { %v3443_v15 = vshll.u32 %v3370_v62, 16  ;;  %v3371_v20 = vpack.c.bf16 %v3347_v4, %v3347_v4  ;;  %v3141_v38 = vpop.f32.mrb[156].mxu0  ;;  %v3515_v10 = vrot.slane %v3370_v62, 1  ;;  %v3441_v31 = vshrl.u32 %v3370_v62, 16 }
 0x2fa   : > { %v3142_v48 = vadd.f32 %v3141_v38, %v8411_v24  ;;  %v6083_v58 = vpop.f32.mrb[157].mxu0 }
 0x2fb   : > { %v3448_v37 = vshll.u32 %v3371_v20, 16  ;;  %v3516_v6 = vrot.slane %v3371_v20, 1  ;;  %v3144_v51 = vpop.f32.mrb[158].mxu0  ;;  %v3445_v54 = vrot.slane %v3443_v15, 1  ;;  %v3227_v20 = vadd.s32 7, %v8443_v5 }
 0x2fc   : > { %v3206_v26 = vmax.f32 %v3142_v48, 0.0  ;;  %v3145_v34 = vadd.f32 %v3144_v51, %v8413_v44  ;;  %v6084_v23 = vpop.f32.mrb[159].mxu0 }
 0x2fd   : > { %v3450_v21 = vrot.slane %v3448_v37, 1  ;;  %v8747_v57 = vsel %vm9344_vm1, %v3515_v10, %v3516_v6  ;;  %v3446_v42 = vor.u32 %v3445_v54, %v3441_v31  ;;  %vm3241_vm5 = vcmp.ge.s32.totalorder %v3227_v20, 0 }
 0x2fe   : > { %v3207_v53 = vmax.f32 %v3145_v34, 0.0  ;;  %4411 = vmatprep.mubr.bf16.mxu0 %v8747_v57  ;;  %v3348_v62 = vsel %vm8742_vm15, %v3206_v26, 0.0  ;;  %vm3251_vm10 = vcmp.lt.s32.totalorder %v3227_v20, 16 }
 0x2ff   : > { %v8759_v46 = vsel %vm9343_vm0, %v3446_v42, %v3450_v21  ;;  %vm8779_vm7 = vmand %vm3241_vm5, %vm3251_vm10 }
 0x300   : > { %v3349_v4 = vsel %vm8733_vm3, %v3207_v53, 0.0  ;;  %v8765_v15 = vpack.c.bf16 %v3207_v53, %v3206_v26  ;;  %4225 = vmatprep.mubr.bf16.mxu1 %v8759_v46  ;;  %4412 = vmatmul.mubr.bf16.gmra.mrb[196].mxu0 %v8759_v46  ;;  %vm8802_vm5 = vmpackc.low %vm8733_vm3, %vm8742_vm15 }
 0x301   : > { %v3372_v22 = vpack.c.bf16 %v3349_v4, %v3348_v62  ;;  %v3149_v49 = vpop.f32.mrb[160].mxu0  ;;  %5247 = vmatmul.mubr.msk.bf16.gmra.mrb[140].mxu1 %vm8754_vm9, %v8725_v29  ;;  %vm3323_vm10 = vmand %vm8779_vm7, %vm9342_vm8 }
 0x302   : > { %v3150_v38 = vadd.f32 %v3149_v49, %v8420_v17  ;;  %v6087_v48 = vpop.f32.mrb[161].mxu0 }
 0x303   : > { %v3455_v58 = vshll.u32 %v3372_v22, 16  ;;  %v3152_v10 = vpop.f32.mrb[162].mxu0  ;;  %v3518_v42 = vrot.slane %v3372_v22, 1  ;;  %v3453_v53 = vshrl.u32 %v3372_v22, 16  ;;  %v3228_v22 = vadd.s32 8, %v8443_v5 }
 0x304   : > { %v3208_v37 = vmax.f32 %v3150_v38, 0.0  ;;  %v3153_v6 = vadd.f32 %v3152_v10, %v8422_v1  ;;  %v6088_v51 = vpop.f32.mrb[163].mxu0 }
 0x305   : > { %v3457_v26 = vrot.slane %v3455_v58, 1  ;;  %vm3242_vm3 = vcmp.ge.s32.totalorder %v3228_v22, 0  ;;  %vm3252_vm15 = vcmp.lt.s32.totalorder %v3228_v22, 16 }
 0x306   : > { %v3350_v31 = vsel %vm3320_vm4, %v3208_v37, 0.0  ;;  %v3209_v62 = vmax.f32 %v3153_v6, 0.0  ;;  %vm8788_vm4 = vmand %vm8779_vm7, %vm3264_vm6 }
 0x307   : > { %v3373_v54 = vpack.c.bf16 %v3350_v31, %v3350_v31  ;;  %v3458_v58 = vor.u32 %v3457_v26, %v3453_v53  ;;  %vm8825_vm8 = vmand %vm3242_vm3, %vm3252_vm15 }
 0x308   : > { %vm8846_vm3 = vmpackc.low %vm8779_vm7, %vm8788_vm4 }
 0x309   : > { %v3460_v17 = vshll.u32 %v3373_v54, 16  ;;  %v3519_v23 = vrot.slane %v3373_v54, 1  ;;  %v3157_v21 = vpop.f32.mrb[164].mxu0 }
 0x30a   : > { %v3158_v4 = vadd.f32 %v3157_v21, %v8426_v16  ;;  %v6091_v49 = vpop.f32.mrb[165].mxu0 }
 0x30b   : > { %v3462_v1 = vrot.slane %v3460_v17, 1  ;;  %v3160_v38 = vpop.f32.mrb[166].mxu0  ;;  %v8793_v48 = vsel %vm9344_vm1, %v3518_v42, %v3519_v23 }
 0x30c   : > { %v3210_v10 = vmax.f32 %v3158_v4, 0.0  ;;  %v3161_v16 = vadd.f32 %v3160_v38, %v8428_v28  ;;  %v6092_v37 = vpop.f32.mrb[167].mxu0  ;;  %4419 = vmatprep.mubr.bf16.mxu0 %v8793_v48  ;;  %v3351_v28 = vsel %vm8788_vm4, %v3209_v62, 0.0  ;;  %vm9496_vm4 = vcmp.le.s32.totalorder %v8463_v25, 16 }
 0x30d   : > { %v8811_v51 = vsel %vm9343_vm0, %v3458_v58, %v3462_v1  ;;  %vm3326_vm15 = vmand %vm8825_vm8, %vm9496_vm4 }
 0x30e   : > { %v3352_v24 = vsel %vm8779_vm7, %v3210_v10, 0.0  ;;  %v8817_v31 = vpack.c.bf16 %v3210_v10, %v3209_v62  ;;  %v3211_v0 = vmax.f32 %v3161_v16, 0.0  ;;  %4233 = vmatprep.mubr.bf16.mxu1 %v8811_v51  ;;  %4420 = vmatmul.mubr.bf16.gmra.mrb[200].mxu0 %v8811_v51  ;;  %vm9495_vm7 = vmpackc.low %vm8485_vm12, %vm8494_vm13 }
 0x30f   : > { %v3374_v54 = vpack.c.bf16 %v3352_v24, %v3351_v28  ;;  %5250 = vmatmul.mubr.msk.bf16.gmra.mrb[144].mxu1 %vm8802_vm5, %v8765_v15  ;;  %vm9502_vm13 = vmmov %vm9496_vm4 }
 0x310   : > { %v3353_v26 = vsel %vm3323_vm10, %v3211_v0, 0.0  ;;  %vm8834_vm10 = vmand %vm8825_vm8, %vm3264_vm6 }
 0x311   : > { %v3467_v17 = vshll.u32 %v3374_v54, 16  ;;  %v3375_v23 = vpack.c.bf16 %v3353_v26, %v3353_v26  ;;  %v3165_v21 = vpop.f32.mrb[168].mxu0  ;;  %v3521_v4 = vrot.slane %v3374_v54, 1  ;;  %v3465_v58 = vshrl.u32 %v3374_v54, 16 }
 0x312   : > { %v3166_v42 = vadd.f32 %v3165_v21, %v8432_v39  ;;  %v6095_v62 = vpop.f32.mrb[169].mxu0 }
 0x313   : > { %v3472_v49 = vshll.u32 %v3375_v23, 16  ;;  %v3522_v1 = vrot.slane %v3375_v23, 1  ;;  %v3168_v38 = vpop.f32.mrb[170].mxu0  ;;  %v3469_v10 = vrot.slane %v3467_v17, 1 }
 0x314   : > { %v3212_v16 = vmax.f32 %v3166_v42, 0.0  ;;  %v3169_v22 = vadd.f32 %v3168_v38, %v8434_v30  ;;  %v6096_v37 = vpop.f32.mrb[171].mxu0  ;;  %v3229_v42 = vadd.s32 9, %v8443_v5 }
 0x315   : > { %v3474_v28 = vrot.slane %v3472_v49, 1  ;;  %v8839_v24 = vsel %vm9344_vm1, %v3521_v4, %v3522_v1  ;;  %v3470_v0 = vor.u32 %v3469_v10, %v3465_v58  ;;  %v6551_v10 = vld [vmem:[#allocation8 + $0x180] sm:$0xff]  }
 0x316   : > { %v3213_v26 = vmax.f32 %v3169_v22, 0.0  ;;  %4427 = vmatprep.mubr.bf16.mxu0 %v8839_v24  ;;  %v3354_v17 = vsel %vm8834_vm10, %v3212_v16, 0.0  ;;  %vm3253_vm1 = vcmp.lt.s32.totalorder %v3229_v42, 16 }
 0x317   : > { %v8851_v54 = vsel %vm9343_vm0, %v3470_v0, %v3474_v28  ;;  %vm3243_vm0 = vcmp.ge.s32.totalorder %v3229_v42, 0 }
 0x318   : > { %v3355_v23 = vsel %vm8825_vm8, %v3213_v26, 0.0  ;;  %v8857_v21 = vpack.c.bf16 %v3213_v26, %v3212_v16  ;;  %4241 = vmatprep.mubr.bf16.mxu1 %v8851_v54  ;;  %4428 = vmatmul.mubr.bf16.gmra.mrb[204].mxu0 %v8851_v54  ;;  %vm8877_vm12 = vmand %vm3243_vm0, %vm3253_vm1  ;;  %vm9501_vm1 = vcmask 1046528  }
 0x319   : > { %v3376_v34 = vpack.c.bf16 %v3355_v23, %v3354_v17  ;;  %v3173_v20 = vpop.f32.mrb[172].mxu0  ;;  %5253 = vmatmul.mubr.msk.bf16.gmra.mrb[148].mxu1 %vm8846_vm3, %v8817_v31  ;;  %vm8890_vm0 = vmand %vm8877_vm12, %vm3264_vm6 }
 0x31a   : > { %v3174_v62 = vadd.f32 %v3173_v20, %v8439_v12  ;;  %v6099_v4 = vpop.f32.mrb[173].mxu0  ;;  %5256 = vmatprep.mubr.msk.bf16.mxu1 %vm9495_vm7, %v8516_v14  ;;  %v6555_v20 = vld [vmem:[#allocation8 + $0x188] sm:$0xff]   ;;  %vm3329_vm6 = vmand %vm8877_vm12, %vm9502_vm13  ;;  %vm9503_vm7 = vsmask.f32 7424 }
 0x31b   : > { %v3535_v49 = vshll.u32 %v3376_v34, 16  ;;  %v3176_v1 = vpop.f32.mrb[174].mxu0  ;;  %v3547_v0 = vrot.slane %v3376_v34, 1  ;;  %v3533_v26 = vshrl.u32 %v3376_v34, 16  ;;  %v6557_v4 = vld [vmem:[#allocation8 + $0x1d0] sm:$0xff]   ;;  %vm9504_vm4 = vmmov %vm9501_vm1 }
 0x31c   : > { %v3214_v38 = vmax.f32 %v3174_v62, 0.0  ;;  %v3177_v5 = vadd.f32 %v3176_v1, %v8441_v11  ;;  %v6100_v58 = vpop.f32.mrb[175].mxu0 }
 0x31d   : > { %v3537_v16 = vrot.slane %v3535_v49, 1 }
 0x31e   : > { %v3356_v12 = vsel %vm3326_vm15, %v3214_v38, 0.0  ;;  %v3215_v11 = vmax.f32 %v3177_v5, 0.0  ;;  %vm9505_vm15 = vmmov %vm9503_vm7 }
 0x31f   : > { %v3377_v55 = vpack.c.bf16 %v3356_v12, %v3356_v12 }
 0x320   : > { %v3357_v5 = vsel %vm8890_vm0, %v3215_v11, 0.0 }
 0x321   : > { %v3540_v22 = vshll.u32 %v3377_v55, 16  ;;  %v3548_v37 = vrot.slane %v3377_v55, 1  ;;  %v3181_v28 = vpop.f32.mrb[176].mxu0  ;;  %4283 = vmatmul.mubr.bf16.vlgmr.msra.gmra.mrb[152].mxu1 %v8500_v52  ;;  %v6559_v55 = vld [vmem:[#allocation8 + $0x1d8] sm:$0xff]  }
 0x322   : > { %v3182_v17 = vadd.f32 %v3181_v28, %v8451_v18  ;;  %v6103_v23 = vpop.f32.mrb[177].mxu0  ;;  %5259 = vmatprep.mubr.msk.bf16.mxu1 %vm8597_vm2, %v8547_v13  ;;  %5950 = vmatpush3.bf16.msra.mxu1 %v6551_v10  ;;  %v3538_v18 = vor.u32 %v3537_v16, %v3533_v26  ;;  %v6558_v10 = vld [vmem:[#allocation8 + $0x190] sm:$0xff]   ;;  %v6560_v28 = vld [vmem:[#allocation8 + $0x198] sm:$0xff]  }
 0x323   : > { %v3542_v42 = vrot.slane %v3540_v22, 1  ;;  %v3184_v52 = vpop.f32.mrb[178].mxu0  ;;  %v8895_v34 = vsel %vm9501_vm1, %v3547_v0, %v3548_v37  ;;  %5951 = vmatprep.subr.bf16.mxu1 %v6554_v9  ;;  %vm5275_vm1 = vmpackc.low %vm8825_vm8, %vm8834_vm10 }
 0x324   : > { %v3216_v49 = vmax.f32 %v3182_v17, 0.0  ;;  %v3185_v1 = vadd.f32 %v3184_v52, %v8453_v8  ;;  %4435 = vmatprep.mubr.bf16.mxu0 %v8895_v34  ;;  %v6104_v38 = vpop.f32.mrb[179].mxu0 }
 0x325   : > { %v8904_v63 = vsel %vm9503_vm7, %v3538_v18, %v3542_v42  ;;  %v6563_v18 = vld [vmem:[#allocation8 + $0x1e8] sm:$0xff]   ;;  %v6566_v38 = vld [vmem:[#allocation8 + $0x1b0] sm:$0xff]  }
 0x326   : > { %v3358_v58 = vsel %vm8877_vm12, %v3216_v49, 0.0  ;;  %v8910_v12 = vpack.c.bf16 %v3216_v49, %v3215_v11  ;;  %v3217_v8 = vmax.f32 %v3185_v1, 0.0  ;;  %4436 = vmatmul.mubr.bf16.gmra.mrb[208].mxu0 %v8904_v63  ;;  %5952 = vmatpush3.bf16.msra.mxu1 %v6555_v20  ;;  %v6561_v11 = vld [vmem:[#allocation8 + $0x1e0] sm:$0xff]   ;;  %v6564_v49 = vld [vmem:[#allocation8 + $0x1a8] sm:$0xff]   ;;  %v6565_v1 = vld [vmem:[#allocation8 + $0x1f0] sm:$0xff]  }
 0x327   : > { %v3378_v25 = vpack.c.bf16 %v3358_v58, %v3357_v5  ;;  %6121 = vmatprep.mubr.bf16.mxu0 %v8586_v35  ;;  %5953 = vmatprep.subr.bf16.mxu1 %v6557_v4  ;;  %v6567_v5 = vld [vmem:[#allocation8 + $0x1f8] sm:$0xff]   ;;  %v6570_v58 = vld [vmem:[#allocation8 + $0x200] sm:$0xff]  }
 0x328   : > { %v3359_v16 = vsel %vm3329_vm6, %v3217_v8, 0.0 }
 0x329   : > { %v3554_v9 = vshll.u32 %v3378_v25, 16  ;;  %v3379_v22 = vpack.c.bf16 %v3359_v16, %v3359_v16  ;;  %4291 = vmatmul.mubr.bf16.gmra.mrb[156].mxu1 %v8533_v33  ;;  %v3566_v37 = vrot.slane %v3378_v25, 1  ;;  %v3552_v17 = vshrl.u32 %v3378_v25, 16  ;;  %v6562_v33 = vld [vmem:[#allocation8 + $0x1a0] sm:$0xff]  }
 0x32a   : > { %5262 = vmatprep.mubr.msk.bf16.mxu1 %vm8656_vm11, %v8617_v7  ;;  %5954 = vmatpush3.bf16.msra.mxu1 %v6558_v10 }
 0x32b   : > { %v3559_v0 = vshll.u32 %v3379_v22, 16  ;;  %v3567_v26 = vrot.slane %v3379_v22, 1  ;;  %5955 = vmatprep.subr.bf16.mxu1 %v6559_v55  ;;  %v3556_v23 = vrot.slane %v3554_v9, 1 }
 0x32d   : > { %v3561_v20 = vrot.slane %v3559_v0, 1  ;;  %v3557_v42 = vor.u32 %v3556_v23, %v3552_v17  ;;  %v8919_v52 = vsel %vm9504_vm4, %v3566_v37, %v3567_v26 }
 0x32e   : > { %6122 = vmatmul.mubr.bf16.vlgmr.msra.gmra.mrb[212].mxu0 %v8648_v27  ;;  %5956 = vmatpush3.bf16.msra.mxu1 %v6560_v28 }
 0x32f   : > { %6125 = vmatprep.mubr.bf16.mxu0 %v8701_v41  ;;  %5957 = vmatprep.subr.bf16.mxu1 %v6561_v11  ;;  %v3562_v4 = vsel %vm9505_vm15, %v3557_v42, %v3561_v20 }
 0x331   : > { %4299 = vmatmul.mubr.bf16.gmra.mrb[160].mxu1 %v8586_v35  ;;  %v6568_v35 = vld [vmem:[#allocation8 + $0x1b8] sm:$0xff]  }
 0x332   : > { %5265 = vmatprep.mubr.msk.bf16.mxu1 %vm8710_vm14, %v8670_v3  ;;  %5958 = vmatpush3.bf16.msra.mxu1 %v6562_v33 }
 0x333   : > { %5959 = vmatprep.subr.bf16.mxu1 %v6563_v18 }
 0x336   : > { %6126 = vmatmul.mubr.bf16.gmra.mrb[216].mxu0 %v8747_v57  ;;  %5960 = vmatpush3.bf16.msra.mxu1 %v6564_v49 }
 0x337   : > { %6129 = vmatprep.mubr.bf16.mxu0 %v8793_v48  ;;  %5961 = vmatprep.subr.bf16.mxu1 %v6565_v1 }
 0x339   : > { %4307 = vmatmul.mubr.bf16.gmra.mrb[164].mxu1 %v8648_v27 }
 0x33a   : > { %5268 = vmatprep.mubr.msk.bf16.mxu1 %vm8754_vm9, %v8725_v29  ;;  %5962 = vmatpush3.bf16.msra.mxu1 %v6566_v38 }
 0x33b   : > { %5963 = vmatprep.subr.bf16.mxu1 %v6567_v5 }
 0x33e   : > { %6130 = vmatmul.mubr.bf16.gmra.mrb[220].mxu0 %v8839_v24  ;;  %5964 = vmatpush3.bf16.msra.mxu1 %v6568_v35 }
 0x33f   : > { %6137 = vmatprep.subr.bf16.mxu1 %v6570_v58 }
 0x341   : > { %4315 = vmatmul.mubr.bf16.gmra.mrb[168].mxu1 %v8701_v41 }
 0x342   : > { %5271 = vmatprep.mubr.msk.bf16.mxu1 %vm8802_vm5, %v8765_v15 }
 0x349   : > { %4323 = vmatmul.mubr.bf16.gmra.mrb[172].mxu1 %v8747_v57 }
 0x34a   : > { %5274 = vmatprep.mubr.msk.bf16.mxu1 %vm8846_vm3, %v8817_v31 }
 0x351   : > { %4331 = vmatmul.mubr.bf16.gmra.mrb[176].mxu1 %v8793_v48 }
 0x352   : > { %5277 = vmatprep.mubr.msk.bf16.mxu1 %vm5275_vm1, %v8857_v21 }
 0x359   : > { %4339 = vmatmul.mubr.bf16.gmra.mrb[180].mxu1 %v8839_v24 }
 0x35a   : > { %4476 = vmatprep.mubr.bf16.mxu1 %v8610_v40 }
 0x361   : > { %5280 = vmatmul.mubr.msk.bf16.vlgmr.msra.gmra.mrb[184].mxu1 %vm8597_vm2, %v8547_v13  ;;  %vm5299_vm2 = vmpackc.low %vm8877_vm12, %vm8890_vm0 }
 0x362   : > { %4484 = vmatprep.mubr.bf16.mxu1 %v8664_v45  ;;  %6145 = vmatpush3.bf16.msra.mxu1 %v6570_v58 }
 0x363   : > { %6138 = vmatprep.subr.bf16.mxu1 %v8540_v36 }
 0x366   : > { %6146 = vmatpush3.bf16.msra.mxu1 %v8540_v36 }
 0x367   : > { %6139 = vmatprep.subr.bf16.mxu1 %v8559_v60 }
 0x369   : > { %5283 = vmatmul.mubr.msk.bf16.gmra.mrb[188].mxu1 %vm8656_vm11, %v8617_v7 }
 0x36a   : > { %4492 = vmatprep.mubr.bf16.mxu1 %v8719_v2  ;;  %6147 = vmatpush3.bf16.msra.mxu1 %v8559_v60 }
 0x36b   : > { %6140 = vmatprep.subr.bf16.mxu1 %v8568_v59 }
 0x36e   : > { %6148 = vmatpush3.bf16.msra.mxu1 %v8568_v59 }
 0x36f   : > { %6141 = vmatprep.subr.bf16.mxu1 %v8589_v19 }
 0x371   : > { %5286 = vmatmul.mubr.msk.bf16.gmra.mrb[192].mxu1 %vm8710_vm14, %v8670_v3 }
 0x372   : > { %4500 = vmatprep.mubr.bf16.mxu1 %v8759_v46  ;;  %6149 = vmatpush3.bf16.msra.mxu1 %v8589_v19 }
 0x373   : > { %6142 = vmatprep.subr.bf16.mxu1 %v8621_v56 }
 0x376   : > { %6150 = vmatpush3.bf16.msra.mxu1 %v8621_v56 }
 0x377   : > { %6143 = vmatprep.subr.bf16.mxu1 %v8636_v47 }
 0x379   : > { %5289 = vmatmul.mubr.msk.bf16.gmra.mrb[196].mxu1 %vm8754_vm9, %v8725_v29 }
 0x37a   : > { %4508 = vmatprep.mubr.bf16.mxu1 %v8811_v51  ;;  %6151 = vmatpush3.bf16.msra.mxu1 %v8636_v47 }
 0x37b   : > { %6144 = vmatprep.subr.bf16.mxu1 %v8661_v43 }
 0x37e   : > { %6152 = vmatpush3.bf16.msra.mxu1 %v8661_v43 }
 0x381   : > { %5292 = vmatmul.mubr.msk.bf16.gmra.mrb[200].mxu1 %vm8802_vm5, %v8765_v15 }
 0x382   : > { %4516 = vmatprep.mubr.bf16.mxu1 %v8851_v54 }
 0x389   : > { %5295 = vmatmul.mubr.msk.bf16.gmra.mrb[204].mxu1 %vm8846_vm3, %v8817_v31 }
 0x38a   : > { %4524 = vmatprep.mubr.bf16.mxu1 %v8904_v63 }
 0x391   : > { %5298 = vmatmul.mubr.msk.bf16.gmra.mrb[208].mxu1 %vm5275_vm1, %v8857_v21 }
 0x392   : > { %4532 = vmatprep.mubr.bf16.mxu1 %v3562_v4 }
 0x399   : > { %5301 = vmatmul.mubr.msk.bf16.gmra.mrb[212].mxu1 %vm5299_vm2, %v8910_v12 }
 0x39a   : > { %v5773_v36 = vpop.f32.mrb[120].mxu1  ;;  %6133 = vmatprep.mubr.bf16.mxu1 %v8895_v34 }
 0x39b   : > { %v5774_v13 = vpop.f32.mrb[121].mxu1 }
 0x39c   : > { %v9006_v60 = vadd.f32 %v5774_v13, %v5773_v36  ;;  %v5776_v59 = vpop.f32.mrb[122].mxu1 }
 0x39d   : > { %v5777_v19 = vpop.f32.mrb[123].mxu1 }
 0x39e   : > { %v9008_v61 = vadd.f32 %v5777_v19, %v5776_v59 }
 0x3a1   : > { %6134 = vmatmul.mubr.bf16.vlgmr.msra.gmra.mrb[216].mxu1 %v8919_v52 }
 0x3a3   : > { %v5901_v40 = vpop.f32.mrb[180].mxu0 }
 0x3a4   : > { %v5779_v7 = vpop.f32.mrb[124].mxu1  ;;  %v5902_v56 = vpop.f32.mrb[181].mxu0 }
 0x3a5   : > { %v9011_v47 = vadd.f32 %v5902_v56, %v5901_v40  ;;  %v5780_v27 = vpop.f32.mrb[125].mxu1  ;;  %v5904_v32 = vpop.f32.mrb[182].mxu0 }
 0x3a6   : > { %v9013_v43 = vadd.f32 %v5780_v27, %v5779_v7  ;;  %v5782_v45 = vpop.f32.mrb[126].mxu1  ;;  %v5905_v3 = vpop.f32.mrb[183].mxu0 }
 0x3a7   : > { %v9015_v41 = vadd.f32 %v5905_v3, %v5904_v32  ;;  %v5783_v50 = vpop.f32.mrb[127].mxu1 }
 0x3a8   : > { %v9017_v2 = vadd.f32 %v5783_v50, %v5782_v45 }
 0x3b1   : > { %v5907_v29 = vpop.f32.mrb[184].mxu0 }
 0x3b2   : > { %v5785_v57 = vpop.f32.mrb[128].mxu1  ;;  %v5908_v44 = vpop.f32.mrb[185].mxu0 }
 0x3b3   : > { %v9019_v46 = vadd.f32 %v5908_v44, %v5907_v29  ;;  %v5786_v15 = vpop.f32.mrb[129].mxu1  ;;  %v5910_v48 = vpop.f32.mrb[186].mxu0 }
 0x3b4   : > { %v9021_v6 = vadd.f32 %v5786_v15, %v5785_v57  ;;  %v5788_v51 = vpop.f32.mrb[130].mxu1  ;;  %v5911_v31 = vpop.f32.mrb[187].mxu0 }
 0x3b5   : > { %v9023_v53 = vadd.f32 %v5911_v31, %v5910_v48  ;;  %v5789_v39 = vpop.f32.mrb[131].mxu1 }
 0x3b6   : > { %v9025_v24 = vadd.f32 %v5789_v39, %v5788_v51 }
 0x3bb   : > { %v5913_v30 = vpop.f32.mrb[188].mxu0 }
 0x3bc   : > { %v5791_v54 = vpop.f32.mrb[132].mxu1  ;;  %v5914_v21 = vpop.f32.mrb[189].mxu0 }
 0x3bd   : > { %v9027_v14 = vadd.f32 %v5914_v21, %v5913_v30  ;;  %v5792_v62 = vpop.f32.mrb[133].mxu1  ;;  %v5916_v34 = vpop.f32.mrb[190].mxu0 }
 0x3be   : > { %v9029_v63 = vadd.f32 %v5792_v62, %v5791_v54  ;;  %v5794_v12 = vpop.f32.mrb[134].mxu1  ;;  %v5917_v8 = vpop.f32.mrb[191].mxu0 }
 0x3bf   : > { %v9031_v10 = vadd.f32 %v5917_v8, %v5916_v34  ;;  %v5795_v25 = vpop.f32.mrb[135].mxu1  ;;  %v9067_v8 = vld [vmem:[#allocation10] ss:$0 sm:$0xff] }
 0x3c0   : > { %v9033_v55 = vadd.f32 %v5795_v25, %v5794_v12 }
 0x3c9   : > { %v5919_v16 = vpop.f32.mrb[192].mxu0 }
 0x3ca   : > { %v5797_v9 = vpop.f32.mrb[136].mxu1  ;;  %v5920_v22 = vpop.f32.mrb[193].mxu0 }
 0x3cb   : > { %v9035_v37 = vadd.f32 %v5920_v22, %v5919_v16  ;;  %v5798_v28 = vpop.f32.mrb[137].mxu1  ;;  %v5922_v0 = vpop.f32.mrb[194].mxu0 }
 0x3cc   : > { %v9037_v26 = vadd.f32 %v5798_v28, %v5797_v9  ;;  %v5800_v11 = vpop.f32.mrb[138].mxu1  ;;  %v5923_v17 = vpop.f32.mrb[195].mxu0  ;;  %v4188_v9 = vadd.f32 %v9006_v60, %v9067_v8 }
 0x3cd   : > { %v9039_v23 = vadd.f32 %v5923_v17, %v5922_v0  ;;  %v5801_v20 = vpop.f32.mrb[139].mxu1 }
 0x3ce   : > { %v9041_v42 = vadd.f32 %v5801_v20, %v5800_v11  ;;  %v4191_v11 = vadd.f32 %v9008_v61, %v9067_v8  ;;  %v4196_v61 = vadd.f32 %v9013_v43, %v9067_v8 }
 0x3d3   : > { %v5925_v52 = vpop.f32.mrb[196].mxu0 }
 0x3d4   : > { %v5803_v33 = vpop.f32.mrb[140].mxu1  ;;  %v5926_v18 = vpop.f32.mrb[197].mxu0 }
 0x3d5   : > { %v9043_v4 = vadd.f32 %v5926_v18, %v5925_v52  ;;  %v5804_v49 = vpop.f32.mrb[141].mxu1  ;;  %v5928_v1 = vpop.f32.mrb[198].mxu0 }
 0x3d6   : > { %v9045_v38 = vadd.f32 %v5804_v49, %v5803_v33  ;;  %v5806_v5 = vpop.f32.mrb[142].mxu1  ;;  %v5929_v35 = vpop.f32.mrb[199].mxu0 }
 0x3d7   : > { %v9047_v58 = vadd.f32 %v5929_v35, %v5928_v1  ;;  %v5807_v36 = vpop.f32.mrb[143].mxu1 }
 0x3d8   : > { %v9049_v13 = vadd.f32 %v5807_v36, %v5806_v5 }
 0x3e1   : > { %v5931_v59 = vpop.f32.mrb[200].mxu0 }
 0x3e2   : > { %v5809_v19 = vpop.f32.mrb[144].mxu1  ;;  %v5932_v40 = vpop.f32.mrb[201].mxu0 }
 0x3e3   : > { %v9051_v7 = vadd.f32 %v5932_v40, %v5931_v59  ;;  %v5810_v56 = vpop.f32.mrb[145].mxu1  ;;  %v5934_v27 = vpop.f32.mrb[202].mxu0 }
 0x3e4   : > { %v9053_v32 = vadd.f32 %v5810_v56, %v5809_v19  ;;  %v5812_v45 = vpop.f32.mrb[146].mxu1  ;;  %v5935_v3 = vpop.f32.mrb[203].mxu0 }
 0x3e5   : > { %v9055_v50 = vadd.f32 %v5935_v3, %v5934_v27  ;;  %v5813_v29 = vpop.f32.mrb[147].mxu1 }
 0x3e6   : > { %v9057_v57 = vadd.f32 %v5813_v29, %v5812_v45 }
 0x3eb   : > { %v5937_v44 = vpop.f32.mrb[204].mxu0 }
 0x3ec   : > { %v5815_v15 = vpop.f32.mrb[148].mxu1  ;;  %v5938_v48 = vpop.f32.mrb[205].mxu0 }
 0x3ed   : > { %v9059_v51 = vadd.f32 %v5938_v48, %v5937_v44  ;;  %v5816_v31 = vpop.f32.mrb[149].mxu1  ;;  %v5940_v39 = vpop.f32.mrb[206].mxu0 }
 0x3ee   : > { %v9061_v30 = vadd.f32 %v5816_v31, %v5815_v15  ;;  %v5818_v54 = vpop.f32.mrb[150].mxu1  ;;  %v5941_v21 = vpop.f32.mrb[207].mxu0 }
 0x3ef   : > { %v9063_v62 = vadd.f32 %v5941_v21, %v5940_v39  ;;  %v5819_v34 = vpop.f32.mrb[151].mxu1 }
 0x3f0   : > { %v9065_v12 = vadd.f32 %v5819_v34, %v5818_v54 }
 0x3f4   : > { %v5837_v25 = vpop.f32.mrb[152].mxu1 }
 0x3f5   : > { %v5838_v16 = vpop.f32.mrb[153].mxu1 }
 0x3f6   : > { %v5839_v22 = vadd.f32 %v5838_v16, %v5837_v25  ;;  %v5840_v28 = vpop.f32.mrb[154].mxu1  ;;  %v4207_v16 = vadd.f32 %v9025_v24, %v9067_v8  ;;  %v4212_v24 = vadd.f32 %v9029_v63, %v9067_v8 }
 0x3f7   : > { %v5841_v0 = vpop.f32.mrb[155].mxu1 }
 0x3f8   : > { %v4285_v17 = vadd.f32 %v5839_v22, %v4188_v9  ;;  %v5842_v20 = vadd.f32 %v5841_v0, %v5840_v28 }
 0x3f9   : > { %v5943_v52 = vpop.f32.mrb[208].mxu0 }
 0x3fa   : > { %v4288_v33 = vadd.f32 %v5842_v20, %v4191_v11  ;;  %v5944_v18 = vpop.f32.mrb[209].mxu0  ;;  %v9074_v49 = vadd.f32 %v9011_v47, %v4285_v17  ;;  %v4199_v47 = vadd.f32 %v9017_v2, %v9067_v8  ;;  %v4204_v2 = vadd.f32 %v9021_v6, %v9067_v8 }
 0x3fb   : > { %v9076_v1 = vadd.f32 %v5944_v18, %v5943_v52  ;;  %v5946_v5 = vpop.f32.mrb[210].mxu0 }
 0x3fc   : > { %v5843_v35 = vpop.f32.mrb[156].mxu1  ;;  %v5947_v36 = vpop.f32.mrb[211].mxu0  ;;  %v9079_v60 = vadd.f32 %v9015_v41, %v4288_v33 }
 0x3fd   : > { %v9081_v59 = vadd.f32 %v5947_v36, %v5946_v5  ;;  %v5844_v19 = vpop.f32.mrb[157].mxu1 }
 0x3fe   : > { %v5845_v40 = vadd.f32 %v5844_v19, %v5843_v35  ;;  %v5846_v56 = vpop.f32.mrb[158].mxu1  ;;  %v4215_v35 = vadd.f32 %v9033_v55, %v9067_v8  ;;  %v4220_v55 = vadd.f32 %v9037_v26, %v9067_v8  ;;  %v4228_v26 = vadd.f32 %v9045_v38, %v9067_v8 }
 0x3ff   : > { %v5847_v27 = vpop.f32.mrb[159].mxu1  ;;  %v4236_v38 = vadd.f32 %v9053_v32, %v9067_v8  ;;  %v4244_v32 = vadd.f32 %v9061_v30, %v9067_v8 }
 0x400   : > { %v4293_v45 = vadd.f32 %v5845_v40, %v4196_v61  ;;  %v5848_v3 = vadd.f32 %v5847_v27, %v5846_v56 }
 0x401   : > { %v9087_v29 = vpop.f32.mrb[212].mxu0 }
 0x402   : > { %v4296_v44 = vadd.f32 %v5848_v3, %v4199_v47  ;;  %v9089_v15 = vpop.f32.mrb[213].mxu0  ;;  %v9092_v41 = vadd.f32 %v9019_v46, %v4293_v45 }
 0x403   : > { %v9094_v48 = vpop.f32.mrb[214].mxu0 }
 0x404   : > { %v5849_v31 = vpop.f32.mrb[160].mxu1  ;;  %v9096_v43 = vpop.f32.mrb[215].mxu0  ;;  %v9099_v39 = vadd.f32 %v9023_v53, %v4296_v44 }
 0x405   : > { %v5850_v54 = vpop.f32.mrb[161].mxu1 }
 0x406   : > { %v5851_v21 = vadd.f32 %v5850_v54, %v5849_v31  ;;  %v5852_v34 = vpop.f32.mrb[162].mxu1  ;;  %v4223_v54 = vadd.f32 %v9041_v42, %v9067_v8  ;;  %v4231_v42 = vadd.f32 %v9049_v13, %v9067_v8  ;;  %v4239_v13 = vadd.f32 %v9057_v57, %v9067_v8 }
 0x407   : > { %v5853_v25 = vpop.f32.mrb[163].mxu1  ;;  %v4247_v57 = vadd.f32 %v9065_v12, %v9067_v8 }
 0x408   : > { %v4301_v46 = vadd.f32 %v5851_v21, %v4204_v2  ;;  %v5854_v9 = vadd.f32 %v5853_v25, %v5852_v34 }
 0x409   : > { %v9105_v22 = vpop.f32.mrb[216].mxu0 }
 0x40a   : > { %v4304_v28 = vadd.f32 %v5854_v9, %v4207_v16  ;;  %v9107_v0 = vpop.f32.mrb[217].mxu0  ;;  %v9110_v53 = vadd.f32 %v9027_v14, %v4301_v46 }
 0x40b   : > { %v9112_v11 = vpop.f32.mrb[218].mxu0 }
 0x40c   : > { %v5855_v17 = vpop.f32.mrb[164].mxu1  ;;  %v9114_v6 = vpop.f32.mrb[219].mxu0  ;;  %v9117_v20 = vadd.f32 %v9031_v10, %v4304_v28 }
 0x40d   : > { %v5856_v52 = vpop.f32.mrb[165].mxu1 }
 0x40e   : > { %v5857_v33 = vadd.f32 %v5856_v52, %v5855_v17  ;;  %v5858_v18 = vpop.f32.mrb[166].mxu1 }
 0x40f   : > { %v5859_v5 = vpop.f32.mrb[167].mxu1 }
 0x410   : > { %v4309_v14 = vadd.f32 %v5857_v33, %v4212_v24  ;;  %v5860_v36 = vadd.f32 %v5859_v5, %v5858_v18 }
 0x411   : > { %v9123_v19 = vpop.f32.mrb[220].mxu0 }
 0x412   : > { %v4312_v61 = vadd.f32 %v5860_v36, %v4215_v35  ;;  %v9125_v40 = vpop.f32.mrb[221].mxu0  ;;  %v9128_v10 = vadd.f32 %v9035_v37, %v4309_v14 }
 0x413   : > { %v9130_v56 = vpop.f32.mrb[222].mxu0 }
 0x414   : > { %v5861_v27 = vpop.f32.mrb[168].mxu1  ;;  %v9132_v63 = vpop.f32.mrb[223].mxu0  ;;  %v9135_v47 = vadd.f32 %v9039_v23, %v4312_v61 }
 0x415   : > { %v5862_v45 = vpop.f32.mrb[169].mxu1 }
 0x416   : > { %v5863_v3 = vadd.f32 %v5862_v45, %v5861_v27  ;;  %v5864_v44 = vpop.f32.mrb[170].mxu1 }
 0x417   : > { %v5865_v31 = vpop.f32.mrb[171].mxu1 }
 0x418   : > { %v4317_v37 = vadd.f32 %v5863_v3, %v4220_v55  ;;  %v5866_v2 = vadd.f32 %v5865_v31, %v5864_v44 }
 0x41a   : > { %v4320_v21 = vadd.f32 %v5866_v2, %v4223_v54  ;;  %v9142_v34 = vadd.f32 %v9043_v4, %v4317_v37 }
 0x41c   : > { %v5867_v25 = vpop.f32.mrb[172].mxu1  ;;  %v9145_v23 = vadd.f32 %v9047_v58, %v4320_v21 }
 0x41d   : > { %v5868_v16 = vpop.f32.mrb[173].mxu1 }
 0x41e   : > { %v5869_v46 = vadd.f32 %v5868_v16, %v5867_v25  ;;  %v5870_v9 = vpop.f32.mrb[174].mxu1 }
 0x41f   : > { %v5871_v28 = vpop.f32.mrb[175].mxu1 }
 0x420   : > { %v4325_v17 = vadd.f32 %v5869_v46, %v4228_v26  ;;  %v5872_v52 = vadd.f32 %v5871_v28, %v5870_v9 }
 0x422   : > { %v4328_v24 = vadd.f32 %v5872_v52, %v4231_v42  ;;  %v9152_v4 = vadd.f32 %v9051_v7, %v4325_v17 }
 0x424   : > { %v5873_v33 = vpop.f32.mrb[176].mxu1  ;;  %v9155_v58 = vadd.f32 %v9055_v50, %v4328_v24 }
 0x425   : > { %v5874_v18 = vpop.f32.mrb[177].mxu1 }
 0x426   : > { %v5875_v5 = vadd.f32 %v5874_v18, %v5873_v33  ;;  %v5876_v35 = vpop.f32.mrb[178].mxu1 }
 0x427   : > { %v5877_v14 = vpop.f32.mrb[179].mxu1 }
 0x428   : > { %v4333_v36 = vadd.f32 %v5875_v5, %v4236_v38  ;;  %v5878_v61 = vadd.f32 %v5877_v14, %v5876_v35 }
 0x42a   : > { %v4336_v27 = vadd.f32 %v5878_v61, %v4239_v13  ;;  %v9162_v7 = vadd.f32 %v9059_v51, %v4333_v36 }
 0x42c   : > { %v5879_v45 = vpop.f32.mrb[180].mxu1  ;;  %v9165_v50 = vadd.f32 %v9063_v62, %v4336_v27 }
 0x42d   : > { %v5880_v55 = vpop.f32.mrb[181].mxu1 }
 0x42e   : > { %v5881_v3 = vadd.f32 %v5880_v55, %v5879_v45  ;;  %v5882_v44 = vpop.f32.mrb[182].mxu1 }
 0x42f   : > { %v5883_v31 = vpop.f32.mrb[183].mxu1 }
 0x430   : > { %v4341_v54 = vadd.f32 %v5881_v3, %v4244_v32  ;;  %v5884_v37 = vadd.f32 %v5883_v31, %v5882_v44 }
 0x432   : > { %v4344_v2 = vadd.f32 %v5884_v37, %v4247_v57  ;;  %v9172_v51 = vadd.f32 %v9076_v1, %v4341_v54 }
 0x434   : > { %v5965_v21 = vpop.f32.mrb[184].mxu1  ;;  %v9175_v62 = vadd.f32 %v9081_v59, %v4344_v2 }
 0x435   : > { %v5966_v25 = vpop.f32.mrb[185].mxu1 }
 0x436   : > { %v5967_v30 = vadd.f32 %v5966_v25, %v5965_v21  ;;  %v5968_v16 = vpop.f32.mrb[186].mxu1 }
 0x437   : > { %v5969_v26 = vpop.f32.mrb[187].mxu1 }
 0x438   : > { %v4479_v46 = vadd.f32 %v5967_v30, %v9074_v49  ;;  %v5970_v12 = vadd.f32 %v5969_v26, %v5968_v16 }
 0x43a   : > { %v4576_v8 = vadd.f32 %v9089_v15, %v4479_v46  ;;  %v4482_v9 = vadd.f32 %v5970_v12, %v9079_v60 }
 0x43c   : > { %v4638_v1 = vmax.f32 %v4576_v8, 0.0  ;;  %v4579_v28 = vadd.f32 %v9096_v43, %v4482_v9  ;;  %v5971_v42 = vpop.f32.mrb[188].mxu1 }
 0x43d   : > { %v5972_v59 = vpop.f32.mrb[189].mxu1 }
 0x43e   : > { %4654 = vst [vmem:[%s9184_s30] sm:$0xff] %v4638_v1  ;;  %v4639_v17 = vmax.f32 %v4579_v28, 0.0  ;;  %v5973_v52 = vadd.f32 %v5972_v59, %v5971_v42  ;;  %v5974_v24 = vpop.f32.mrb[190].mxu1 }
 0x43f   : > { %v5975_v49 = vpop.f32.mrb[191].mxu1 }
 0x440   : > { %4655 = vst [vmem:[%s9184_s30 + $0x8] sm:$0xff] %v4639_v17  ;;  %v4487_v15 = vadd.f32 %v5973_v52, %v9092_v41  ;;  %v5976_v60 = vadd.f32 %v5975_v49, %v5974_v24 }
 0x442   : > { %v4584_v33 = vadd.f32 %v9087_v29, %v4487_v15  ;;  %v4490_v43 = vadd.f32 %v5976_v60, %v9099_v39 }
 0x444   : > { %v4640_v18 = vmax.f32 %v4584_v33, 0.0  ;;  %v4587_v38 = vadd.f32 %v9094_v48, %v4490_v43  ;;  %v5977_v5 = vpop.f32.mrb[192].mxu1 }
 0x445   : > { %v5978_v35 = vpop.f32.mrb[193].mxu1 }
 0x446   : > { %4656 = vst [vmem:[%s9184_s30 + $0x10] sm:$0xff] %v4640_v18  ;;  %v4641_v14 = vmax.f32 %v4587_v38, 0.0  ;;  %v5979_v13 = vadd.f32 %v5978_v35, %v5977_v5  ;;  %v5980_v36 = vpop.f32.mrb[194].mxu1 }
 0x447   : > { %v5981_v61 = vpop.f32.mrb[195].mxu1 }
 0x448   : > { %4657 = vst [vmem:[%s9184_s30 + $0x18] sm:$0xff] %v4641_v14  ;;  %v4495_v41 = vadd.f32 %v5979_v13, %v9110_v53  ;;  %v5982_v27 = vadd.f32 %v5981_v61, %v5980_v36 }
 0x44a   : > { %v4592_v29 = vadd.f32 %v9107_v0, %v4495_v41  ;;  %v4498_v39 = vadd.f32 %v5982_v27, %v9117_v20 }
 0x44c   : > { %v4642_v45 = vmax.f32 %v4592_v29, 0.0  ;;  %v4595_v48 = vadd.f32 %v9114_v6, %v4498_v39  ;;  %v5983_v55 = vpop.f32.mrb[196].mxu1 }
 0x44d   : > { %v5984_v32 = vpop.f32.mrb[197].mxu1 }
 0x44e   : > { %4658 = vst [vmem:[%s9184_s30 + $0x20] sm:$0xff] %v4642_v45  ;;  %v4643_v3 = vmax.f32 %v4595_v48, 0.0  ;;  %v5985_v44 = vadd.f32 %v5984_v32, %v5983_v55  ;;  %v5986_v31 = vpop.f32.mrb[198].mxu1 }
 0x44f   : > { %v5987_v57 = vpop.f32.mrb[199].mxu1 }
 0x450   : > { %4659 = vst [vmem:[%s9184_s30 + $0x28] sm:$0xff] %v4643_v3  ;;  %v4503_v53 = vadd.f32 %v5985_v44, %v9128_v10  ;;  %v5988_v54 = vadd.f32 %v5987_v57, %v5986_v31 }
 0x452   : > { %v4600_v0 = vadd.f32 %v9105_v22, %v4503_v53  ;;  %v4506_v20 = vadd.f32 %v5988_v54, %v9135_v47 }
 0x454   : > { %v4644_v37 = vmax.f32 %v4600_v0, 0.0  ;;  %v4603_v6 = vadd.f32 %v9112_v11, %v4506_v20  ;;  %v5989_v2 = vpop.f32.mrb[200].mxu1 }
 0x455   : > { %v5990_v21 = vpop.f32.mrb[201].mxu1 }
 0x456   : > { %4660 = vst [vmem:[%s9184_s30 + $0x30] sm:$0xff] %v4644_v37  ;;  %v4645_v25 = vmax.f32 %v4603_v6, 0.0  ;;  %v5991_v30 = vadd.f32 %v5990_v21, %v5989_v2  ;;  %v5992_v16 = vpop.f32.mrb[202].mxu1 }
 0x457   : > { %v5993_v26 = vpop.f32.mrb[203].mxu1 }
 0x458   : > { %4661 = vst [vmem:[%s9184_s30 + $0x38] sm:$0xff] %v4645_v25  ;;  %v4511_v10 = vadd.f32 %v5991_v30, %v9142_v34  ;;  %v5994_v46 = vadd.f32 %v5993_v26, %v5992_v16 }
 0x45a   : > { %v4608_v22 = vadd.f32 %v9125_v40, %v4511_v10  ;;  %v4514_v47 = vadd.f32 %v5994_v46, %v9145_v23 }
 0x45c   : > { %v4646_v12 = vmax.f32 %v4608_v22, 0.0  ;;  %v4611_v11 = vadd.f32 %v9132_v63, %v4514_v47  ;;  %v5995_v8 = vpop.f32.mrb[204].mxu1 }
 0x45d   : > { %v5996_v9 = vpop.f32.mrb[205].mxu1 }
 0x45e   : > { %4662 = vst [vmem:[%s9184_s30 + $0x40] sm:$0xff] %v4646_v12  ;;  %v4647_v1 = vmax.f32 %v4611_v11, 0.0  ;;  %v5997_v28 = vadd.f32 %v5996_v9, %v5995_v8  ;;  %v5998_v42 = vpop.f32.mrb[206].mxu1 }
 0x45f   : > { %v5999_v59 = vpop.f32.mrb[207].mxu1 }
 0x460   : > { %4663 = vst [vmem:[%s9184_s30 + $0x48] sm:$0xff] %v4647_v1  ;;  %v4519_v34 = vadd.f32 %v5997_v28, %v9152_v4  ;;  %v6000_v17 = vadd.f32 %v5999_v59, %v5998_v42 }
 0x462   : > { %v4616_v40 = vadd.f32 %v9123_v19, %v4519_v34  ;;  %v4522_v23 = vadd.f32 %v6000_v17, %v9155_v58 }
 0x464   : > { %v4648_v52 = vmax.f32 %v4616_v40, 0.0  ;;  %v4619_v63 = vadd.f32 %v9130_v56, %v4522_v23  ;;  %v6001_v24 = vpop.f32.mrb[208].mxu1 }
 0x465   : > { %v6002_v49 = vpop.f32.mrb[209].mxu1 }
 0x466   : > { %4664 = vst [vmem:[%s9184_s30 + $0x50] sm:$0xff] %v4648_v52  ;;  %v4649_v15 = vmax.f32 %v4619_v63, 0.0  ;;  %v6003_v60 = vadd.f32 %v6002_v49, %v6001_v24  ;;  %v6004_v33 = vpop.f32.mrb[210].mxu1 }
 0x467   : > { %v6005_v43 = vpop.f32.mrb[211].mxu1 }
 0x468   : > { %4665 = vst [vmem:[%s9184_s30 + $0x58] sm:$0xff] %v4649_v15  ;;  %v6006_v18 = vadd.f32 %v6005_v43, %v6004_v33  ;;  %v4527_v4 = vadd.f32 %v6003_v60, %v9162_v7 }
 0x46a   : > { %v4530_v19 = vadd.f32 %v6006_v18, %v9165_v50 }
 0x46c   : > { %v6007_v38 = vpop.f32.mrb[212].mxu1 }
 0x46d   : > { %v6008_v58 = vpop.f32.mrb[213].mxu1 }
 0x46e   : > { %v6009_v5 = vadd.f32 %v6008_v58, %v6007_v38  ;;  %v6010_v56 = vpop.f32.mrb[214].mxu1 }
 0x46f   : > { %v6011_v35 = vpop.f32.mrb[215].mxu1 }
 0x470   : > { %v6012_v14 = vadd.f32 %v6011_v35, %v6010_v56  ;;  %v4535_v13 = vadd.f32 %v6009_v5, %v9172_v51 }
 0x472   : > { %v4538_v36 = vadd.f32 %v6012_v14, %v9175_v62 }
 0x474   : > { %v6135_v61 = vpop.f32.mrb[216].mxu1 }
 0x475   : > { %v4632_v7 = vadd.f32 %v6135_v61, %v4535_v13  ;;  %v4623_v41 = vpop.f32.mrb[217].mxu1 }
 0x476   : > { %v4624_v50 = vadd.f32 %v4623_v41, %v4527_v4  ;;  %v6136_v27 = vpop.f32.mrb[218].mxu1 }
 0x477   : > { %v4652_v29 = vmax.f32 %v4632_v7, 0.0  ;;  %v4635_v51 = vadd.f32 %v6136_v27, %v4538_v36  ;;  %v4626_v39 = vpop.f32.mrb[219].mxu1 }
 0x478   : > { %v4650_v45 = vmax.f32 %v4624_v50, 0.0  ;;  %v4627_v48 = vadd.f32 %v4626_v39, %v4530_v19 }
 0x479   : > { %4668 = vst [vmem:[%s9184_s30 + $0x70] sm:$0xff] %v4652_v29  ;;  %v4653_v62 = vmax.f32 %v4635_v51, 0.0 }
 0x47a   : > { %4666 = vst [vmem:[%s9184_s30 + $0x60] sm:$0xff] %v4650_v45  ;;  %v4651_v55 = vmax.f32 %v4627_v48, 0.0 }
 0x47b   : > { %4669 = vst [vmem:[%s9184_s30 + $0x78] sm:$0xff] %v4653_v62 }
 0x47c   : > { %4667 = vst [vmem:[%s9184_s30 + $0x68] sm:$0xff] %v4651_v55 }
 0x47d   : > { %6726 = shalt.err (!%p6723_p5)
}
 0x47e   : > { %s6727_s7 = scalar_lea.hbm %s9229_s3, 2048  ;;  %s6731_s9 = scalar_lea.hbm %s9510_s14, 8192 }
 0x47f   : > { %p6728_p8 = scmp.ne.s32.totalorder %s9229_s3, %s6727_s7  ;;  %p6732_p7 = scmp.lt.u32.totalorder %s9229_s3, %s9510_s14 }
 0x480   : > { %p6733_p9 = scmp.lt.u32.totalorder %s6731_s9, %s6727_s7  ;;  %p6735_p3 = scmp.lt.u32.totalorder %s6727_s7, %s9229_s3 }
 0x481   : > { %p6729_p12 = pnand %p6728_p8, %p9511_p4 }
 0x482   : > { %p6734_p1 = por %p6733_p9, %p6732_p7 }
 0x483   : > { %p6730_p2 = pneg %p6729_p12 }
 0x484   : > { %p6736_p6 = por %p6735_p3, %p6734_p1 }
 0x486   : > { %p6737_p13 = pnand %p6736_p6, %p6730_p2 }
 0x488   : > { %6740 = shalt.err (!%p6737_p13)
}
 0x489   : > { %s6855_s17 = smov 128   ;;  %s6856_s5 = smov 8  }
 0x48a   : > { %6174 = dma.vmem_to_hbm [thread:$0]  (%p9511_p4), %s9231_s15, 2048, %s9229_s3, %s9238_s4, %s6855_s17, %s6855_s17, %s6856_s5  }
 0x48b PF: > { %s9512_s24 = sld [smem:[#allocation16_spill]]  ;;  %s9513_s18 = sld [smem:[#allocation20_spill]] }
 0x48c   : > { %p6206_p10 = scmp.ge.s32.totalorder %s6843_s28, 2 }
 0x491   : > { %s4702_s19 = sand.u32 1, %s9512_s24   ;;  %p9514_p11 = scmp.ne.s32.totalorder %s9513_s18, 0 }
 0x492   : > { %s4703_s29 = scalar_lea.sflag [#allocation4], %s4702_s19 }
 0x493   : > { %p6194_p0 = pnand %p6206_p10, %p9514_p11 }
 0x495   : > { %6798 = dma.done.wait (!%p6194_p0), %s4703_s29, 2048  }
 0x496   : > { %6800 = vsyncadd (!%p6194_p0), %s4703_s29, 4294965248  ;;  %s23_s28 = sadd.s32 1, %s6843_s28   ;;  %s9515_s18 = sld [smem:[#allocation17_spill]] }
 0x497   : > { %p20_p5 = scmp.ge.s32.totalorder %s23_s28, 6   ;;  %s9516_s19 = smov %s6811_s20 }
 0x498   : > { %s9517_s20 = smov %s7097_s1  ;;  %s9518_s21 = smov %s6819_s22 }
 0x499   : > { %s9519_s22 = smov %s6823_s23  ;;  %s9520_s23 = smov %s7100_s25 }
 0x49a   : > { %s9521_s24 = smov %s6835_s26  ;;  %s9522_s25 = smov %s6839_s27 }
 0x49b   : > { %s9523_s26 = smov %s9526_s11  ;;  %s9524_s27 = smov %s9530_s13 }
 0x49c   :  { %22 = sbr.rel (!%p20_p5) target bundleno = 17 (0x11), region = 103 }
 0x4a3   :  { %4708 = vsyncpa [#allocation3], 1 }
 0x4a4   :  { %4710 = vsyncpa [#allocation3 + $0x1], 1 }
 0x4a5   :  { %4711 = vsyncpa [#allocation6], 1 }
 0x4a6   :  { %4712 = vsyncpa [#allocation9], 1 }
 0x4a7   :  { %4713 = vsyncpa [#allocation4], 1 }
 0x4a8   :  { %4715 = vsyncpa [#allocation4 + $0x1], 1 }

</bundles_post_ra>
